<compile_context>
chip_gen: v6e
topology: v6e:2x2x1
jax: 0.10.0
libtpu: 0.0.40
codegen_flags: <defaults>
</compile_context>

<pallas_src>
import functools

import jax
import jax.numpy as jnp
from jax.experimental import pallas as pl
from jax.experimental.pallas import tpu as pltpu

LN_EPS = 1e-5                                   # torch.nn.LayerNorm default
NEG_MAX = float(-jnp.finfo(jnp.float32).max)    # torch masked_fill value


def _layernorm(x, gamma, beta):
    mu = jnp.mean(x, axis=-1, keepdims=True)
    var = jnp.mean((x - mu) ** 2, axis=-1, keepdims=True)
    return (x - mu) * jax.lax.rsqrt(var + LN_EPS) * gamma + beta


# ----------------------------------------------------------------------------
# Fused layer kernel: PreNorm + self-attention + residual, then
# PreNorm + Linear + GEGLU + Linear + residual.  One grid step == block_b batch
# elements (whole sequence resident in VMEM).
# ----------------------------------------------------------------------------
def _layer_kernel(*refs, heads, dim_head, kt, hc, masked):
    if masked:
        x_ref, bias_ref = refs[0], refs[1]
        rest = refs[2:]
    else:
        x_ref, bias_ref = refs[0], None
        rest = refs[1:]
    (ln1_g_ref, ln1_b_ref, wq_ref, wk_ref, wv_ref, wo_ref, bo_ref,
     ln2_g_ref, ln2_b_ref, w1v_ref, w1g_ref, b1v_ref, b1g_ref, w2_ref, b2_ref,
     out_ref, k_scr, v_scr) = rest

    Bt, T, D = x_ref.shape
    H, dh = heads, dim_head
    inner = H * dh
    BH = Bt * H
    hidden = w2_ref.shape[0]
    n_kc = T // kt
    n_hc = hidden // hc

    x = x_ref[...].astype(jnp.float32)                       # (Bt, T, D) residual stream

    # ---------------- PreNorm + multi-head self-attention + residual ----------
    xn = _layernorm(x, ln1_g_ref[...], ln1_b_ref[...])
    xf = xn.reshape(Bt * T, D).astype(jnp.bfloat16)          # batch folded into matmul M

    # 1/sqrt(dim_head) is pre-folded into wq at init -> no in-kernel scale multiply.
    q = jnp.dot(xf, wq_ref[...], preferred_element_type=jnp.float32)
    k = jnp.dot(xf, wk_ref[...], preferred_element_type=jnp.float32)
    v = jnp.dot(xf, wv_ref[...], preferred_element_type=jnp.float32)

    def to_bh_t_d(t):                                        # (Bt*T, inner) -> (Bt*H, T, d)
        t = t.astype(jnp.bfloat16).reshape(Bt, T, H, dh)
        return jnp.transpose(t, (0, 2, 1, 3)).reshape(BH, T, dh)

    qh = to_bh_t_d(q)
    k_scr[...] = to_bh_t_d(k)                                # keys/values parked in VMEM
    v_scr[...] = to_bh_t_d(v)

    # Flash-style online softmax over key chunks: only a (BH, T, kt) score tile
    # is live at any time.  TODO(synk): for very long T also tile the query dim
    # (and move key chunks to a grid axis) so the whole sequence need not be resident.
    def kv_step(c, carry):
        m_i, l_i, acc = carry
        j0 = pl.multiple_of(c * kt, kt)
        kh = k_scr[:, pl.ds(j0, kt), :]                      # (BH, kt, d) bf16
        vh = v_scr[:, pl.ds(j0, kt), :]
        sim = jnp.einsum('bid,bjd->bij', qh, kh,
                         preferred_element_type=jnp.float32)  # (BH, T, kt) f32
        if masked:
            bias_c = bias_ref[:, pl.ds(c, 1), :]             # (Bt, 1, kt): 0 / -f32.max
            sim = (sim.reshape(Bt, H, T, kt)
                   + bias_c[:, :, None, :]).reshape(BH, T, kt)
        m_new = jnp.maximum(m_i, jnp.max(sim, axis=-1, keepdims=True))
        alpha = jnp.exp(m_i - m_new)
        # TODO(synk): on v6e/v7x the exp could run in bf16 (bf16 EUP, ~2x); kept f32
        # so the same kernel also runs at full rate on v5e.
        p = jnp.exp(sim - m_new)
        l_new = alpha * l_i + jnp.sum(p, axis=-1, keepdims=True)
        acc_new = alpha * acc + jnp.einsum('bij,bjd->bid', p.astype(jnp.bfloat16), vh,
                                           preferred_element_type=jnp.float32)
        return m_new, l_new, acc_new

    # NEG_MAX (not -inf) init: fully-masked rows stay finite and reproduce torch's
    # masked_fill(-f32.max) -> uniform-attention semantics.
    m0 = jnp.full((BH, T, 1), NEG_MAX, jnp.float32)
    l0 = jnp.zeros((BH, T, 1), jnp.float32)
    a0 = jnp.zeros((BH, T, dh), jnp.float32)
    _, l_i, acc = jax.lax.fori_loop(0, n_kc, kv_step, (m0, l0, a0))

    # Deferred softmax normalization on the output; reciprocal uses the EUP slot.
    o = (acc * pl.reciprocal(l_i, approx=True)).astype(jnp.bfloat16)
    o = jnp.transpose(o.reshape(Bt, H, T, dh), (0, 2, 1, 3)).reshape(Bt * T, inner)
    attn = jnp.dot(o, wo_ref[...], preferred_element_type=jnp.float32) + bo_ref[...]
    x = x + attn.reshape(Bt, T, D)                           # residual

    # ---------------- PreNorm + Linear + GEGLU + Linear + residual ------------
    yn = _layernorm(x, ln2_g_ref[...], ln2_b_ref[...])
    yf = yn.reshape(Bt * T, D).astype(jnp.bfloat16)

    # Hidden dimension processed in chunks of hc: bounds the GEGLU intermediate to
    # O(M * hc) instead of materializing the full (M, 2*hidden) f32 tensor.
    def ff_step(c, acc_ff):
        h0 = pl.multiple_of(c * hc, hc)
        w_val = w1v_ref[pl.ds(h0, hc), :]                    # (hc, D) bf16
        w_gate = w1g_ref[pl.ds(h0, hc), :]
        val = jnp.einsum('md,hd->mh', yf, w_val,
                         preferred_element_type=jnp.float32) + b1v_ref[pl.ds(c, 1), :]
        gate = jnp.einsum('md,hd->mh', yf, w_gate,
                          preferred_element_type=jnp.float32) + b1g_ref[pl.ds(c, 1), :]
        # TODO(synk): torch F.gelu defaults to exact erf GELU; tanh approximation is
        # used for robust Mosaic lowering (max abs diff ~1e-3).
        gated = (val * jax.nn.gelu(gate, approximate=True)).astype(jnp.bfloat16)
        return acc_ff + jnp.dot(gated, w2_ref[pl.ds(h0, hc), :],
                                preferred_element_type=jnp.float32)

    ff0 = jnp.zeros((Bt * T, D), jnp.float32)
    ff = jax.lax.fori_loop(0, n_hc, ff_step, ff0) + b2_ref[...]
    x = x + ff.reshape(Bt, T, D)                             # residual

    out_ref[...] = x.astype(out_ref.dtype)


# ----------------------------------------------------------------------------
# Wrapper / tiling helpers.
# ----------------------------------------------------------------------------
def _pick_block_b(B, T, max_rows=4096):
    """Batch tile: keep >=4 grid steps when possible (>=2 per TensorCore on v7x),
    aim for block_b*T >= 256 MXU rows, cap the resident rows per step."""
    divisors = [d for d in range(1, B + 1) if B % d == 0]
    pool = ([d for d in divisors if B // d >= 4]
            or [d for d in divisors if B // d >= 2]
            or divisors)
    fits = [d for d in pool if d * T <= max_rows] or [min(pool)]
    good = [d for d in fits if d * T >= 256]
    return max(good) if good else max(fits)


def _pick_chunk(total, target):
    """Largest lane-aligned (multiple of 128) divisor of `total` <= target; falls
    back to `total` (no chunking) so all in-kernel slices stay aligned."""
    if total <= target:
        return total
    start = target - (target % 128)
    for c in range(start, 127, -128):
        if total % c == 0:
            return c
    return total


def _physical_vmem_bytes():
    try:
        info = pltpu.get_tpu_info()
        for name in ("vmem_capacity_bytes", "vmem_bytes", "vmem_size_bytes"):
            v = getattr(info, name, None)
            if v:
                return int(v)
    except Exception:
        pass
    return 64 << 20   # v7x per-core floor: a safe lower bound for every generation


def _vmem_limit_bytes(block_b, T, D, heads, dim_head, kt, hc,
                      weight_bytes, in_itemsize, out_itemsize, masked):
    M = block_b * T
    BH = block_b * heads
    inner = heads * dim_head
    b = weight_bytes                                         # single-buffered weights
    b += 2 * block_b * T * D * (in_itemsize + out_itemsize)  # pipelined x / out blocks
    if masked:
        b += 2 * block_b * T * 4
    b += 2 * M * D * 4                                       # residual stream + normed copy
    b += 3 * M * inner * 4 + 3 * M * inner * 2               # q/k/v f32 results + bf16 copies
    b += 2 * BH * T * kt * 4                                 # score tile + probs
    b += BH * T * (dim_head + 2 * 128) * 4                   # acc + lane-padded m / l
    b += 3 * M * hc * 4                                      # GEGLU val / gate / gated chunk
    b += 2 * M * D * 4                                       # ff accumulator + attn output
    return int(b * 1.4) + (4 << 20)


def _weight_specs(shapes, single_buffer):
    def const_map(ndim):
        return lambda b: (0,) * ndim
    specs = []
    for s in shapes:
        if single_buffer:
            specs.append(pl.BlockSpec(s, const_map(len(s)),
                                      pipeline_mode=pl.Buffered(1)))
        else:
            specs.append(pl.BlockSpec(s, const_map(len(s))))
    return specs


def transformer_layer(x, bias, p, heads, dim_head, ff_expansion, block_b,
                      out_dtype=None, key_chunk=256, ff_chunk=512):
    B, T, D = x.shape
    inner = heads * dim_head
    hidden = D * ff_expansion
    masked = bias is not None
    out_dtype = x.dtype if out_dtype is None else out_dtype

    kt = _pick_chunk(T, key_chunk)        # key-chunk of the online softmax
    hc = _pick_chunk(hidden, ff_chunk)    # hidden-chunk of the GEGLU FF
    n_kc, n_hc = T // kt, hidden // hc

    kernel = functools.partial(_layer_kernel, heads=heads, dim_head=dim_head,
                               kt=kt, hc=hc, masked=masked)

    x_spec = pl.BlockSpec((block_b, T, D), lambda b: (b, 0, 0))
    out_spec = pl.BlockSpec((block_b, T, D), lambda b: (b, 0, 0))

    inputs = [x]
    data_specs = [x_spec]
    if masked:
        inputs.append(bias.reshape(B, n_kc, kt))
        data_specs.append(pl.BlockSpec((block_b, n_kc, kt), lambda b: (b, 0, 0)))

    weights = [p["ln1_g"], p["ln1_b"], p["wq"], p["wk"], p["wv"], p["wo"], p["bo"],
               p["ln2_g"], p["ln2_b"], p["w1v"], p["w1g"],
               p["b1v"].reshape(n_hc, hc), p["b1g"].reshape(n_hc, hc),
               p["w2"], p["b2"]]
    inputs += weights
    weight_bytes = sum(int(w.size) * w.dtype.itemsize for w in weights)

    est = _vmem_limit_bytes(block_b, T, D, heads, dim_head, kt, hc, weight_bytes,
                            x.dtype.itemsize, jnp.dtype(out_dtype).itemsize, masked)
    vmem_limit = max(32 << 20, min(est, int(_physical_vmem_bytes() * 0.9)))

    Mtot = B * T
    cost = pl.CostEstimate(
        flops=int(2 * Mtot * D * inner * 3            # q / k / v projections
                  + 4 * B * heads * T * T * dim_head  # QK^T and PV
                  + 2 * Mtot * inner * D              # output projection
                  + 2 * Mtot * D * hidden * 3),       # GEGLU value/gate + down proj
        transcendentals=int(B * heads * T * T + Mtot * hidden),
        bytes_accessed=int(weight_bytes
                           + Mtot * D * (x.dtype.itemsize + jnp.dtype(out_dtype).itemsize)
                           + (Mtot * 4 if masked else 0)))

    # TODO(synk): cross-call prefetch of the next layer's weights (P10) would hide
    # the per-layer weight DMA prologue for small B*T / decode-like regimes.
    def build(single_buffer_weights):
        w_specs = _weight_specs([w.shape for w in weights], single_buffer_weights)
        return pl.pallas_call(
            kernel,
            out_shape=jax.ShapeDtypeStruct((B, T, D), out_dtype),
            grid=(B // block_b,),
            in_specs=data_specs + w_specs,
            out_specs=out_spec,
            scratch_shapes=[pltpu.VMEM((block_b * heads, T, dim_head), jnp.bfloat16),
                            pltpu.VMEM((block_b * heads, T, dim_head), jnp.bfloat16)],
            compiler_params=pltpu.CompilerParams(
                dimension_semantics=("parallel",),
                vmem_limit_bytes=vmem_limit),
            cost_estimate=cost,
        )

    # Weights have constant index maps (fetched once); pl.Buffered(1) drops their
    # second pipeline buffer and halves resident-weight VMEM.  Fall back to default
    # double-buffered specs if this jax version rejects single buffering.
    try:
        return build(True)(*inputs)
    except Exception:
        return build(False)(*inputs)


def transformer(x, params, heads, dim_head, ff_expansion, mask=None, block_b=None,
                interlayer_dtype=jnp.bfloat16):
    """Forward pass of Transformer.  x:(B,T,D), mask:(B,T) bool or None -> (B,T,D)."""
    B, T, D = x.shape
    if block_b is None:
        block_b = _pick_block_b(B, T)
    assert B % block_b == 0
    bias = None
    if mask is not None:
        bias = jnp.where(mask, 0.0, NEG_MAX).astype(jnp.float32)   # (B, T)
    layers = params["layers"]
    final_dtype = x.dtype
    for i, layer in enumerate(layers):
        last = (i == len(layers) - 1)
        # Inter-layer activations carried in bf16 (halves HBM traffic); final layer
        # restores the caller's dtype.
        x = transformer_layer(x, bias, layer, heads, dim_head, ff_expansion, block_b,
                              out_dtype=final_dtype if last else interlayer_dtype)
    return x


# ----------------------------------------------------------------------------
# Deterministic parameter init (shapes from the module __init__).  Matmul weights
# are bf16 (MXU operands); LN params & biases stay f32.  Dropout probs are 0.0.
# ----------------------------------------------------------------------------
def init_params(key, dim, depth, heads, dim_head, ff_expansion):
    inner = heads * dim_head
    hidden = dim * ff_expansion
    qk_scale = dim_head ** (-0.5)

    def uniform(k, shape, fan_in):
        return jax.random.uniform(k, shape, jnp.float32, -1.0, 1.0) / jnp.sqrt(fan_in)

    layers = []
    for li in range(depth):
        ks = jax.random.split(jax.random.fold_in(key, li), 12)
        layers.append(dict(
            ln1_g=jnp.ones((1, dim), jnp.float32),
            ln1_b=jnp.zeros((1, dim), jnp.float32),
            # to_q / to_kv carry no bias (torch: bias=False); 1/sqrt(dim_head) is
            # folded into wq so the kernel skips the q*scale multiply.
            wq=(uniform(ks[0], (dim, inner), dim) * qk_scale).astype(jnp.bfloat16),
            wk=uniform(ks[1], (dim, inner), dim).astype(jnp.bfloat16),
            wv=uniform(ks[2], (dim, inner), dim).astype(jnp.bfloat16),
            wo=uniform(ks[3], (inner, dim), inner).astype(jnp.bfloat16),
            bo=uniform(ks[4], (1, dim), inner),
            ln2_g=jnp.ones((1, dim), jnp.float32),
            ln2_b=jnp.zeros((1, dim), jnp.float32),
            # FF first linear split into value / gate halves; stored (hidden, dim)
            # (torch weight layout) so the kernel chunks along hidden via sublane slices.
            w1v=uniform(ks[5], (hidden, dim), dim).astype(jnp.bfloat16),
            w1g=uniform(ks[6], (hidden, dim), dim).astype(jnp.bfloat16),
            b1v=uniform(ks[7], (hidden,), dim),
            b1g=uniform(ks[8], (hidden,), dim),
            w2=uniform(ks[9], (hidden, dim), hidden).astype(jnp.bfloat16),
            b2=uniform(ks[10], (1, dim), hidden),
        ))
    return dict(layers=layers)


# ----------------------------------------------------------------------------
# Pure-JAX reference (same parameterization, f32 math) for correctness checking.
# ----------------------------------------------------------------------------
def _reference(x, params, heads, dim_head, ff_expansion, mask=None):
    H, dh = heads, dim_head
    B, T, D = x.shape
    x = x.astype(jnp.float32)
    for p in params["layers"]:
        xn = _layernorm(x, p["ln1_g"], p["ln1_b"])
        xf = xn.reshape(B * T, D)
        q = xf @ p["wq"].astype(jnp.float32)     # scale already folded into wq
        k = xf @ p["wk"].astype(jnp.float32)
        v = xf @ p["wv"].astype(jnp.float32)
        q = q.reshape(B, T, H, dh).transpose(0, 2, 1, 3)
        k = k.reshape(B, T, H, dh).transpose(0, 2, 1, 3)
        v = v.reshape(B, T, H, dh).transpose(0, 2, 1, 3)
        sim = jnp.einsum('bhid,bhjd->bhij', q, k)
        if mask is not None:
            sim = sim + jnp.where(mask[:, None, None, :], 0.0, NEG_MAX)
        attn = jax.nn.softmax(sim, axis=-1)
        o = jnp.einsum('bhij,bhjd->bhid', attn, v)
        o = o.transpose(0, 2, 1, 3).reshape(B * T, H * dh)
        x = x + (o @ p["wo"].astype(jnp.float32) + p["bo"]).reshape(B, T, D)
        yn = _layernorm(x, p["ln2_g"], p["ln2_b"])
        yf = yn.reshape(B * T, D)
        val = yf @ p["w1v"].astype(jnp.float32).T + p["b1v"][None, :]
        gate = yf @ p["w1g"].astype(jnp.float32).T + p["b1g"][None, :]
        ff = (val * jax.nn.gelu(gate, approximate=True)) @ p["w2"].astype(jnp.float32) + p["b2"]
        x = x + ff.reshape(B, T, D)
    return x


if __name__ == "__main__":
    key = jax.random.PRNGKey(0)
    B, T = 2, 8
    dim, depth, heads, dim_head, ff_expansion = 128, 2, 2, 64, 4

    kx, kp = jax.random.split(key, 2)
    x = jax.random.normal(kx, (B, T, dim), jnp.float32)
    params = init_params(kp, dim, depth, heads, dim_head, ff_expansion)

    def _close(a, b):
        err = float(jnp.max(jnp.abs(a - b)))
        scale = float(jnp.max(jnp.abs(b)))
        return err <= 5e-2 * scale + 5e-2

    # mask=None path (kernel variant with no bias input)
    out = jax.block_until_ready(
        transformer(x, params, heads, dim_head, ff_expansion, mask=None))
    assert out.shape == (B, T, dim) and out.dtype == jnp.float32
    assert bool(jnp.all(jnp.isfinite(out)))
    assert _close(out, _reference(x, params, heads, dim_head, ff_expansion, mask=None))

    # masked path: a full-True mask must match the mask=None result.
    full_mask = jnp.ones((B, T), dtype=bool)
    out_full = jax.block_until_ready(
        transformer(x, params, heads, dim_head, ff_expansion, mask=full_mask))
    assert bool(jnp.allclose(out, out_full, atol=1e-3))

    # masked path with some keys masked out (batch 1 drops its last 3 keys).
    part_mask = full_mask.at[1, T - 3:].set(False)
    out_part = jax.block_until_ready(
        transformer(x, params, heads, dim_head, ff_expansion, mask=part_mask))
    assert out_part.shape == (B, T, dim)
    assert bool(jnp.all(jnp.isfinite(out_part)))
    assert _close(out_part,
                  _reference(x, params, heads, dim_head, ff_expansion, mask=part_mask))

    print("KERNEL_OK")
</pallas_src>

<mosaic_0001>
module attributes {stable_mosaic.version = 11 : i64} {
  func.func @_layer_kernel(%arg0: i32, %arg1: memref<1x8x128xf32, #tpu.memory_space<vmem>>, %arg2: memref<1x128xf32, #tpu.memory_space<vmem>>, %arg3: memref<1x128xf32, #tpu.memory_space<vmem>>, %arg4: memref<128x128xbf16, #tpu.memory_space<vmem>>, %arg5: memref<128x128xbf16, #tpu.memory_space<vmem>>, %arg6: memref<128x128xbf16, #tpu.memory_space<vmem>>, %arg7: memref<128x128xbf16, #tpu.memory_space<vmem>>, %arg8: memref<1x128xf32, #tpu.memory_space<vmem>>, %arg9: memref<1x128xf32, #tpu.memory_space<vmem>>, %arg10: memref<1x128xf32, #tpu.memory_space<vmem>>, %arg11: memref<512x128xbf16, #tpu.memory_space<vmem>>, %arg12: memref<512x128xbf16, #tpu.memory_space<vmem>>, %arg13: memref<1x512xf32, #tpu.memory_space<vmem>>, %arg14: memref<1x512xf32, #tpu.memory_space<vmem>>, %arg15: memref<512x128xbf16, #tpu.memory_space<vmem>>, %arg16: memref<1x128xf32, #tpu.memory_space<vmem>>, %arg17: memref<1x8x128xbf16, #tpu.memory_space<vmem>>, %arg18: memref<2x8x64xbf16, #tpu.memory_space<vmem>>, %arg19: memref<2x8x64xbf16, #tpu.memory_space<vmem>>) attributes {dimension_semantics = [#tpu.dimension_semantics<parallel>], iteration_bounds = array<i64: 2>, scalar_prefetch = 0 : i64, scratch_operands = 2 : i64, tpu.core_type = #tpu.core_type<tc>, window_params = [{transform_indices = @transform_0, window_bounds = array<i64: 1, 8, 128>}, {pipeline_mode = #tpu.pipeline_mode<synchronous>, transform_indices = @transform_1, window_bounds = array<i64: 1, 128>}, {pipeline_mode = #tpu.pipeline_mode<synchronous>, transform_indices = @transform_2, window_bounds = array<i64: 1, 128>}, {pipeline_mode = #tpu.pipeline_mode<synchronous>, transform_indices = @transform_3, window_bounds = array<i64: 128, 128>}, {pipeline_mode = #tpu.pipeline_mode<synchronous>, transform_indices = @transform_4, window_bounds = array<i64: 128, 128>}, {pipeline_mode = #tpu.pipeline_mode<synchronous>, transform_indices = @transform_5, window_bounds = array<i64: 128, 128>}, {pipeline_mode = #tpu.pipeline_mode<synchronous>, transform_indices = @transform_6, window_bounds = array<i64: 128, 128>}, {pipeline_mode = #tpu.pipeline_mode<synchronous>, transform_indices = @transform_7, window_bounds = array<i64: 1, 128>}, {pipeline_mode = #tpu.pipeline_mode<synchronous>, transform_indices = @transform_8, window_bounds = array<i64: 1, 128>}, {pipeline_mode = #tpu.pipeline_mode<synchronous>, transform_indices = @transform_9, window_bounds = array<i64: 1, 128>}, {pipeline_mode = #tpu.pipeline_mode<synchronous>, transform_indices = @transform_10, window_bounds = array<i64: 512, 128>}, {pipeline_mode = #tpu.pipeline_mode<synchronous>, transform_indices = @transform_11, window_bounds = array<i64: 512, 128>}, {pipeline_mode = #tpu.pipeline_mode<synchronous>, transform_indices = @transform_12, window_bounds = array<i64: 1, 512>}, {pipeline_mode = #tpu.pipeline_mode<synchronous>, transform_indices = @transform_13, window_bounds = array<i64: 1, 512>}, {pipeline_mode = #tpu.pipeline_mode<synchronous>, transform_indices = @transform_14, window_bounds = array<i64: 512, 128>}, {pipeline_mode = #tpu.pipeline_mode<synchronous>, transform_indices = @transform_15, window_bounds = array<i64: 1, 128>}, {transform_indices = @transform_16, window_bounds = array<i64: 1, 8, 128>}]} {
    %c0 = arith.constant 0 : index
    %c0_0 = arith.constant 0 : index
    %c0_1 = arith.constant 0 : index
    %0 = vector.load %arg1[%c0, %c0_0, %c0_1] : memref<1x8x128xf32, #tpu.memory_space<vmem>>, vector<1x8x128xf32>
    %c0_2 = arith.constant 0 : index
    %c0_3 = arith.constant 0 : index
    %1 = vector.load %arg2[%c0_2, %c0_3] : memref<1x128xf32, #tpu.memory_space<vmem>>, vector<1x128xf32>
    %c0_4 = arith.constant 0 : index
    %c0_5 = arith.constant 0 : index
    %2 = vector.load %arg3[%c0_4, %c0_5] : memref<1x128xf32, #tpu.memory_space<vmem>>, vector<1x128xf32>
    %cst = arith.constant dense<0.000000e+00> : vector<1x8xf32>
    %3 = vector.multi_reduction <add>, %0, %cst [2] : vector<1x8x128xf32> to vector<1x8xf32>
    %4 = vector.shape_cast %3 : vector<1x8xf32> to vector<1x8x1xf32>
    %cst_6 = arith.constant 1.280000e+02 : f32
    %5 = vector.broadcast %cst_6 : f32 to vector<1x8x1xf32>
    %6 = arith.divf %4, %5 : vector<1x8x1xf32>
    %7 = vector.broadcast %6 : vector<1x8x1xf32> to vector<1x8x128xf32>
    %8 = arith.subf %0, %7 : vector<1x8x128xf32>
    %9 = arith.mulf %8, %8 : vector<1x8x128xf32>
    %cst_7 = arith.constant dense<0.000000e+00> : vector<1x8xf32>
    %10 = vector.multi_reduction <add>, %9, %cst_7 [2] : vector<1x8x128xf32> to vector<1x8xf32>
    %11 = vector.shape_cast %10 : vector<1x8xf32> to vector<1x8x1xf32>
    %cst_8 = arith.constant 1.280000e+02 : f32
    %12 = vector.broadcast %cst_8 : f32 to vector<1x8x1xf32>
    %13 = arith.divf %11, %12 : vector<1x8x1xf32>
    %14 = vector.broadcast %6 : vector<1x8x1xf32> to vector<1x8x128xf32>
    %15 = arith.subf %0, %14 : vector<1x8x128xf32>
    %cst_9 = arith.constant 9.99999974E-6 : f32
    %16 = vector.broadcast %cst_9 : f32 to vector<1x8x1xf32>
    %17 = arith.addf %13, %16 : vector<1x8x1xf32>
    %18 = math.rsqrt %17 : vector<1x8x1xf32>
    %19 = vector.broadcast %18 : vector<1x8x1xf32> to vector<1x8x128xf32>
    %20 = arith.mulf %15, %19 : vector<1x8x128xf32>
    %21 = vector.shape_cast %1 : vector<1x128xf32> to vector<1x1x128xf32>
    %22 = vector.broadcast %21 : vector<1x1x128xf32> to vector<1x8x128xf32>
    %23 = arith.mulf %20, %22 : vector<1x8x128xf32>
    %24 = vector.shape_cast %2 : vector<1x128xf32> to vector<1x1x128xf32>
    %25 = vector.broadcast %24 : vector<1x1x128xf32> to vector<1x8x128xf32>
    %26 = arith.addf %23, %25 : vector<1x8x128xf32>
    %27 = vector.shape_cast %26 : vector<1x8x128xf32> to vector<8x128xf32>
    %28 = arith.truncf %27 : vector<8x128xf32> to vector<8x128xbf16>
    %c0_10 = arith.constant 0 : index
    %c0_11 = arith.constant 0 : index
    %29 = vector.load %arg4[%c0_10, %c0_11] : memref<128x128xbf16, #tpu.memory_space<vmem>>, vector<128x128xbf16>
    %cst_12 = arith.constant dense<0.000000e+00> : vector<8x128xf32>
    %30 = tpu.matmul %28, %29, %cst_12 {dimension_numbers = #tpu.dot_dimension_numbers<[1], [0], [0], [1], [0, 0, 1, 1], [], []>} : vector<8x128xbf16>, vector<128x128xbf16>, vector<8x128xf32> -> vector<8x128xf32>
    %c0_13 = arith.constant 0 : index
    %c0_14 = arith.constant 0 : index
    %31 = vector.load %arg5[%c0_13, %c0_14] : memref<128x128xbf16, #tpu.memory_space<vmem>>, vector<128x128xbf16>
    %cst_15 = arith.constant dense<0.000000e+00> : vector<8x128xf32>
    %32 = tpu.matmul %28, %31, %cst_15 {dimension_numbers = #tpu.dot_dimension_numbers<[1], [0], [0], [1], [0, 0, 1, 1], [], []>} : vector<8x128xbf16>, vector<128x128xbf16>, vector<8x128xf32> -> vector<8x128xf32>
    %c0_16 = arith.constant 0 : index
    %c0_17 = arith.constant 0 : index
    %33 = vector.load %arg6[%c0_16, %c0_17] : memref<128x128xbf16, #tpu.memory_space<vmem>>, vector<128x128xbf16>
    %cst_18 = arith.constant dense<0.000000e+00> : vector<8x128xf32>
    %34 = tpu.matmul %28, %33, %cst_18 {dimension_numbers = #tpu.dot_dimension_numbers<[1], [0], [0], [1], [0, 0, 1, 1], [], []>} : vector<8x128xbf16>, vector<128x128xbf16>, vector<8x128xf32> -> vector<8x128xf32>
    %35 = arith.truncf %30 : vector<8x128xf32> to vector<8x128xbf16>
    %36 = vector.shape_cast %35 : vector<8x128xbf16> to vector<1x8x2x64xbf16>
    %37 = tpu.transpose %36, [0, 2, 1, 3] : vector<1x8x2x64xbf16> -> vector<1x2x8x64xbf16>
    %38 = vector.shape_cast %37 : vector<1x2x8x64xbf16> to vector<2x8x64xbf16>
    %39 = arith.truncf %32 : vector<8x128xf32> to vector<8x128xbf16>
    %40 = vector.shape_cast %39 : vector<8x128xbf16> to vector<1x8x2x64xbf16>
    %41 = tpu.transpose %40, [0, 2, 1, 3] : vector<1x8x2x64xbf16> -> vector<1x2x8x64xbf16>
    %42 = vector.shape_cast %41 : vector<1x2x8x64xbf16> to vector<2x8x64xbf16>
    %c0_19 = arith.constant 0 : index
    %c0_20 = arith.constant 0 : index
    %c0_21 = arith.constant 0 : index
    %43 = vector.load %arg18[%c0_19, %c0_20, %c0_21] : memref<2x8x64xbf16, #tpu.memory_space<vmem>>, vector<2x8x64xbf16>
    tpu.vector_store %arg18[%c0_19, %c0_20, %c0_21], %42 {strides = array<i32>} : memref<2x8x64xbf16, #tpu.memory_space<vmem>>, vector<2x8x64xbf16>,
    %44 = arith.truncf %34 : vector<8x128xf32> to vector<8x128xbf16>
    %45 = vector.shape_cast %44 : vector<8x128xbf16> to vector<1x8x2x64xbf16>
    %46 = tpu.transpose %45, [0, 2, 1, 3] : vector<1x8x2x64xbf16> -> vector<1x2x8x64xbf16>
    %47 = vector.shape_cast %46 : vector<1x2x8x64xbf16> to vector<2x8x64xbf16>
    %c0_22 = arith.constant 0 : index
    %c0_23 = arith.constant 0 : index
    %c0_24 = arith.constant 0 : index
    %48 = vector.load %arg19[%c0_22, %c0_23, %c0_24] : memref<2x8x64xbf16, #tpu.memory_space<vmem>>, vector<2x8x64xbf16>
    tpu.vector_store %arg19[%c0_22, %c0_23, %c0_24], %47 {strides = array<i32>} : memref<2x8x64xbf16, #tpu.memory_space<vmem>>, vector<2x8x64xbf16>,
    %cst_25 = arith.constant -3.40282347E+38 : f32
    %49 = vector.broadcast %cst_25 : f32 to vector<2x8x1xf32>
    %cst_26 = arith.constant 0.000000e+00 : f32
    %50 = vector.broadcast %cst_26 : f32 to vector<2x8x1xf32>
    %cst_27 = arith.constant 0.000000e+00 : f32
    %51 = vector.broadcast %cst_27 : f32 to vector<2x8x64xf32>
    %c0_i32 = arith.constant 0 : i32
    %c8_i32 = arith.constant 8 : i32
    %52 = arith.muli %c0_i32, %c8_i32 : i32
    %53 = tpu.assume_multiple %52, 8 : i32
    %c0_28 = arith.constant 0 : index
    %54 = arith.index_cast %53 : i32 to index
    %c0_29 = arith.constant 0 : index
    %55 = vector.load %arg18[%c0_28, %54, %c0_29] : memref<2x8x64xbf16, #tpu.memory_space<vmem>>, vector<2x8x64xbf16>
    %c0_30 = arith.constant 0 : index
    %56 = arith.index_cast %53 : i32 to index
    %c0_31 = arith.constant 0 : index
    %57 = vector.load %arg19[%c0_30, %56, %c0_31] : memref<2x8x64xbf16, #tpu.memory_space<vmem>>, vector<2x8x64xbf16>
    "tpu.trace_start"() <{level = 10 : i32, message = "bid,bjd->bij"}> : () -> ()
    %cst_32 = arith.constant dense<0.000000e+00> : vector<2x8x8xf32>
    %58 = tpu.matmul %38, %55, %cst_32 {dimension_numbers = #tpu.dot_dimension_numbers<[2], [2], [1], [1], [0, 0, 0, 1, 1, 1], [0], [0]>} : vector<2x8x64xbf16>, vector<2x8x64xbf16>, vector<2x8x8xf32> -> vector<2x8x8xf32>
    "tpu.trace_stop"() : () -> ()
    %cst_33 = arith.constant dense<0xFF800000> : vector<2x8xf32>
    %59 = vector.multi_reduction <maximumf>, %58, %cst_33 [2] : vector<2x8x8xf32> to vector<2x8xf32>
    %60 = vector.shape_cast %59 : vector<2x8xf32> to vector<2x8x1xf32>
    %61 = arith.maximumf %49, %60 : vector<2x8x1xf32>
    %62 = arith.subf %49, %61 : vector<2x8x1xf32>
    %63 = math.exp %62 : vector<2x8x1xf32>
    %64 = vector.broadcast %61 : vector<2x8x1xf32> to vector<2x8x8xf32>
    %65 = arith.subf %58, %64 : vector<2x8x8xf32>
    %66 = math.exp %65 : vector<2x8x8xf32>
    %67 = arith.mulf %63, %50 : vector<2x8x1xf32>
    %cst_34 = arith.constant dense<0.000000e+00> : vector<2x8xf32>
    %68 = vector.multi_reduction <add>, %66, %cst_34 [2] : vector<2x8x8xf32> to vector<2x8xf32>
    %69 = vector.shape_cast %68 : vector<2x8xf32> to vector<2x8x1xf32>
    %70 = arith.addf %67, %69 : vector<2x8x1xf32>
    %71 = vector.broadcast %63 : vector<2x8x1xf32> to vector<2x8x64xf32>
    %72 = arith.mulf %71, %51 : vector<2x8x64xf32>
    %73 = arith.truncf %66 : vector<2x8x8xf32> to vector<2x8x8xbf16>
    "tpu.trace_start"() <{level = 10 : i32, message = "bij,bjd->bid"}> : () -> ()
    %cst_35 = arith.constant dense<0.000000e+00> : vector<2x8x64xf32>
    %74 = tpu.matmul %73, %57, %cst_35 {dimension_numbers = #tpu.dot_dimension_numbers<[2], [1], [1], [2], [0, 0, 0, 1, 1, 2], [0], [0]>} : vector<2x8x8xbf16>, vector<2x8x64xbf16>, vector<2x8x64xf32> -> vector<2x8x64xf32>
    "tpu.trace_stop"() : () -> ()
    %75 = arith.addf %72, %74 : vector<2x8x64xf32>
    %c1_i32 = arith.constant 1 : i32
    %76 = tpu.reciprocal %70 {approx = true} : vector<2x8x1xf32> -> vector<2x8x1xf32>
    %77 = vector.broadcast %76 : vector<2x8x1xf32> to vector<2x8x64xf32>
    %78 = arith.mulf %75, %77 : vector<2x8x64xf32>
    %79 = arith.truncf %78 : vector<2x8x64xf32> to vector<2x8x64xbf16>
    %80 = vector.shape_cast %79 : vector<2x8x64xbf16> to vector<1x2x8x64xbf16>
    %81 = tpu.transpose %80, [0, 2, 1, 3] : vector<1x2x8x64xbf16> -> vector<1x8x2x64xbf16>
    %82 = vector.shape_cast %81 : vector<1x8x2x64xbf16> to vector<8x128xbf16>
    %c0_36 = arith.constant 0 : index
    %c0_37 = arith.constant 0 : index
    %83 = vector.load %arg7[%c0_36, %c0_37] : memref<128x128xbf16, #tpu.memory_space<vmem>>, vector<128x128xbf16>
    %cst_38 = arith.constant dense<0.000000e+00> : vector<8x128xf32>
    %84 = tpu.matmul %82, %83, %cst_38 {dimension_numbers = #tpu.dot_dimension_numbers<[1], [0], [0], [1], [0, 0, 1, 1], [], []>} : vector<8x128xbf16>, vector<128x128xbf16>, vector<8x128xf32> -> vector<8x128xf32>
    %c0_39 = arith.constant 0 : index
    %c0_40 = arith.constant 0 : index
    %85 = vector.load %arg8[%c0_39, %c0_40] : memref<1x128xf32, #tpu.memory_space<vmem>>, vector<1x128xf32>
    %86 = vector.broadcast %85 : vector<1x128xf32> to vector<8x128xf32>
    %87 = arith.addf %84, %86 : vector<8x128xf32>
    %88 = vector.shape_cast %87 : vector<8x128xf32> to vector<1x8x128xf32>
    %89 = arith.addf %0, %88 : vector<1x8x128xf32>
    %c0_41 = arith.constant 0 : index
    %c0_42 = arith.constant 0 : index
    %90 = vector.load %arg9[%c0_41, %c0_42] : memref<1x128xf32, #tpu.memory_space<vmem>>, vector<1x128xf32>
    %c0_43 = arith.constant 0 : index
    %c0_44 = arith.constant 0 : index
    %91 = vector.load %arg10[%c0_43, %c0_44] : memref<1x128xf32, #tpu.memory_space<vmem>>, vector<1x128xf32>
    %cst_45 = arith.constant dense<0.000000e+00> : vector<1x8xf32>
    %92 = vector.multi_reduction <add>, %89, %cst_45 [2] : vector<1x8x128xf32> to vector<1x8xf32>
    %93 = vector.shape_cast %92 : vector<1x8xf32> to vector<1x8x1xf32>
    %cst_46 = arith.constant 1.280000e+02 : f32
    %94 = vector.broadcast %cst_46 : f32 to vector<1x8x1xf32>
    %95 = arith.divf %93, %94 : vector<1x8x1xf32>
    %96 = vector.broadcast %95 : vector<1x8x1xf32> to vector<1x8x128xf32>
    %97 = arith.subf %89, %96 : vector<1x8x128xf32>
    %98 = arith.mulf %97, %97 : vector<1x8x128xf32>
    %cst_47 = arith.constant dense<0.000000e+00> : vector<1x8xf32>
    %99 = vector.multi_reduction <add>, %98, %cst_47 [2] : vector<1x8x128xf32> to vector<1x8xf32>
    %100 = vector.shape_cast %99 : vector<1x8xf32> to vector<1x8x1xf32>
    %cst_48 = arith.constant 1.280000e+02 : f32
    %101 = vector.broadcast %cst_48 : f32 to vector<1x8x1xf32>
    %102 = arith.divf %100, %101 : vector<1x8x1xf32>
    %103 = vector.broadcast %95 : vector<1x8x1xf32> to vector<1x8x128xf32>
    %104 = arith.subf %89, %103 : vector<1x8x128xf32>
    %cst_49 = arith.constant 9.99999974E-6 : f32
    %105 = vector.broadcast %cst_49 : f32 to vector<1x8x1xf32>
    %106 = arith.addf %102, %105 : vector<1x8x1xf32>
    %107 = math.rsqrt %106 : vector<1x8x1xf32>
    %108 = vector.broadcast %107 : vector<1x8x1xf32> to vector<1x8x128xf32>
    %109 = arith.mulf %104, %108 : vector<1x8x128xf32>
    %110 = vector.shape_cast %90 : vector<1x128xf32> to vector<1x1x128xf32>
    %111 = vector.broadcast %110 : vector<1x1x128xf32> to vector<1x8x128xf32>
    %112 = arith.mulf %109, %111 : vector<1x8x128xf32>
    %113 = vector.shape_cast %91 : vector<1x128xf32> to vector<1x1x128xf32>
    %114 = vector.broadcast %113 : vector<1x1x128xf32> to vector<1x8x128xf32>
    %115 = arith.addf %112, %114 : vector<1x8x128xf32>
    %116 = vector.shape_cast %115 : vector<1x8x128xf32> to vector<8x128xf32>
    %117 = arith.truncf %116 : vector<8x128xf32> to vector<8x128xbf16>
    %cst_50 = arith.constant 0.000000e+00 : f32
    %118 = vector.broadcast %cst_50 : f32 to vector<8x128xf32>
    %c0_i32_51 = arith.constant 0 : i32
    %c512_i32 = arith.constant 512 : i32
    %119 = arith.muli %c0_i32_51, %c512_i32 : i32
    %120 = tpu.assume_multiple %119, 512 : i32
    %121 = arith.index_cast %120 : i32 to index
    %c0_52 = arith.constant 0 : index
    %122 = vector.load %arg11[%121, %c0_52] : memref<512x128xbf16, #tpu.memory_space<vmem>>, vector<512x128xbf16>
    %123 = arith.index_cast %120 : i32 to index
    %c0_53 = arith.constant 0 : index
    %124 = vector.load %arg12[%123, %c0_53] : memref<512x128xbf16, #tpu.memory_space<vmem>>, vector<512x128xbf16>
    "tpu.trace_start"() <{level = 10 : i32, message = "md,hd->mh"}> : () -> ()
    %cst_54 = arith.constant dense<0.000000e+00> : vector<8x512xf32>
    %125 = tpu.matmul %117, %122, %cst_54 {dimension_numbers = #tpu.dot_dimension_numbers<[1], [1], [0], [0], [0, 0, 1, 0], [], []>} : vector<8x128xbf16>, vector<512x128xbf16>, vector<8x512xf32> -> vector<8x512xf32>
    "tpu.trace_stop"() : () -> ()
    %126 = arith.index_cast %c0_i32_51 : i32 to index
    %c0_55 = arith.constant 0 : index
    %127 = vector.load %arg13[%126, %c0_55] : memref<1x512xf32, #tpu.memory_space<vmem>>, vector<1x512xf32>
    %128 = vector.broadcast %127 : vector<1x512xf32> to vector<8x512xf32>
    %129 = arith.addf %125, %128 : vector<8x512xf32>
    "tpu.trace_start"() <{level = 10 : i32, message = "md,hd->mh"}> : () -> ()
    %cst_56 = arith.constant dense<0.000000e+00> : vector<8x512xf32>
    %130 = tpu.matmul %117, %124, %cst_56 {dimension_numbers = #tpu.dot_dimension_numbers<[1], [1], [0], [0], [0, 0, 1, 0], [], []>} : vector<8x128xbf16>, vector<512x128xbf16>, vector<8x512xf32> -> vector<8x512xf32>
    "tpu.trace_stop"() : () -> ()
    %131 = arith.index_cast %c0_i32_51 : i32 to index
    %c0_57 = arith.constant 0 : index
    %132 = vector.load %arg14[%131, %c0_57] : memref<1x512xf32, #tpu.memory_space<vmem>>, vector<1x512xf32>
    %133 = vector.broadcast %132 : vector<1x512xf32> to vector<8x512xf32>
    %134 = arith.addf %130, %133 : vector<8x512xf32>
    %135 = arith.mulf %134, %134 : vector<8x512xf32>
    %136 = arith.mulf %134, %135 : vector<8x512xf32>
    %cst_58 = arith.constant 4.471500e-02 : f32
    %137 = vector.broadcast %cst_58 : f32 to vector<8x512xf32>
    %138 = arith.mulf %137, %136 : vector<8x512xf32>
    %139 = arith.addf %134, %138 : vector<8x512xf32>
    %cst_59 = arith.constant 0.797884583 : f32
    %140 = vector.broadcast %cst_59 : f32 to vector<8x512xf32>
    %141 = arith.mulf %140, %139 : vector<8x512xf32>
    %142 = math.tanh %141 : vector<8x512xf32>
    %cst_60 = arith.constant 1.000000e+00 : f32
    %143 = vector.broadcast %cst_60 : f32 to vector<8x512xf32>
    %144 = arith.addf %143, %142 : vector<8x512xf32>
    %cst_61 = arith.constant 5.000000e-01 : f32
    %145 = vector.broadcast %cst_61 : f32 to vector<8x512xf32>
    %146 = arith.mulf %145, %144 : vector<8x512xf32>
    %147 = arith.mulf %134, %146 : vector<8x512xf32>
    %148 = arith.mulf %129, %147 : vector<8x512xf32>
    %149 = arith.truncf %148 : vector<8x512xf32> to vector<8x512xbf16>
    %150 = arith.index_cast %120 : i32 to index
    %c0_62 = arith.constant 0 : index
    %151 = vector.load %arg15[%150, %c0_62] : memref<512x128xbf16, #tpu.memory_space<vmem>>, vector<512x128xbf16>
    %cst_63 = arith.constant dense<0.000000e+00> : vector<8x128xf32>
    %152 = tpu.matmul %149, %151, %cst_63 {dimension_numbers = #tpu.dot_dimension_numbers<[1], [0], [0], [1], [0, 0, 1, 1], [], []>} : vector<8x512xbf16>, vector<512x128xbf16>, vector<8x128xf32> -> vector<8x128xf32>
    %153 = arith.addf %118, %152 : vector<8x128xf32>
    %c1_i32_64 = arith.constant 1 : i32
    %c0_65 = arith.constant 0 : index
    %c0_66 = arith.constant 0 : index
    %154 = vector.load %arg16[%c0_65, %c0_66] : memref<1x128xf32, #tpu.memory_space<vmem>>, vector<1x128xf32>
    %155 = vector.broadcast %154 : vector<1x128xf32> to vector<8x128xf32>
    %156 = arith.addf %153, %155 : vector<8x128xf32>
    %157 = vector.shape_cast %156 : vector<8x128xf32> to vector<1x8x128xf32>
    %158 = arith.addf %89, %157 : vector<1x8x128xf32>
    %159 = arith.truncf %158 : vector<1x8x128xf32> to vector<1x8x128xbf16>
    %c0_67 = arith.constant 0 : index
    %c0_68 = arith.constant 0 : index
    %c0_69 = arith.constant 0 : index
    %160 = vector.load %arg17[%c0_67, %c0_68, %c0_69] : memref<1x8x128xbf16, #tpu.memory_space<vmem>>, vector<1x8x128xbf16>
    tpu.vector_store %arg17[%c0_67, %c0_68, %c0_69], %159 {strides = array<i32>} : memref<1x8x128xbf16, #tpu.memory_space<vmem>>, vector<1x8x128xbf16>,
    return
  }
  func.func @transform_0(%arg0: i32) -> (i32, i32, i32) {
    %c0_i32 = arith.constant 0 : i32
    %c0_i32_0 = arith.constant 0 : i32
    %c0_i32_1 = arith.constant 0 : i32
    return %arg0, %c0_i32, %c0_i32_0 : i32, i32, i32
  }
  func.func @transform_1(%arg0: i32) -> (i32, i32) {
    %c0_i32 = arith.constant 0 : i32
    %c0_i32_0 = arith.constant 0 : i32
    %c0_i32_1 = arith.constant 0 : i32
    return %c0_i32, %c0_i32_0 : i32, i32
  }
  func.func @transform_2(%arg0: i32) -> (i32, i32) {
    %c0_i32 = arith.constant 0 : i32
    %c0_i32_0 = arith.constant 0 : i32
    %c0_i32_1 = arith.constant 0 : i32
    return %c0_i32, %c0_i32_0 : i32, i32
  }
  func.func @transform_3(%arg0: i32) -> (i32, i32) {
    %c0_i32 = arith.constant 0 : i32
    %c0_i32_0 = arith.constant 0 : i32
    %c0_i32_1 = arith.constant 0 : i32
    return %c0_i32, %c0_i32_0 : i32, i32
  }
  func.func @transform_4(%arg0: i32) -> (i32, i32) {
    %c0_i32 = arith.constant 0 : i32
    %c0_i32_0 = arith.constant 0 : i32
    %c0_i32_1 = arith.constant 0 : i32
    return %c0_i32, %c0_i32_0 : i32, i32
  }
  func.func @transform_5(%arg0: i32) -> (i32, i32) {
    %c0_i32 = arith.constant 0 : i32
    %c0_i32_0 = arith.constant 0 : i32
    %c0_i32_1 = arith.constant 0 : i32
    return %c0_i32, %c0_i32_0 : i32, i32
  }
  func.func @transform_6(%arg0: i32) -> (i32, i32) {
    %c0_i32 = arith.constant 0 : i32
    %c0_i32_0 = arith.constant 0 : i32
    %c0_i32_1 = arith.constant 0 : i32
    return %c0_i32, %c0_i32_0 : i32, i32
  }
  func.func @transform_7(%arg0: i32) -> (i32, i32) {
    %c0_i32 = arith.constant 0 : i32
    %c0_i32_0 = arith.constant 0 : i32
    %c0_i32_1 = arith.constant 0 : i32
    return %c0_i32, %c0_i32_0 : i32, i32
  }
  func.func @transform_8(%arg0: i32) -> (i32, i32) {
    %c0_i32 = arith.constant 0 : i32
    %c0_i32_0 = arith.constant 0 : i32
    %c0_i32_1 = arith.constant 0 : i32
    return %c0_i32, %c0_i32_0 : i32, i32
  }
  func.func @transform_9(%arg0: i32) -> (i32, i32) {
    %c0_i32 = arith.constant 0 : i32
    %c0_i32_0 = arith.constant 0 : i32
    %c0_i32_1 = arith.constant 0 : i32
    return %c0_i32, %c0_i32_0 : i32, i32
  }
  func.func @transform_10(%arg0: i32) -> (i32, i32) {
    %c0_i32 = arith.constant 0 : i32
    %c0_i32_0 = arith.constant 0 : i32
    %c0_i32_1 = arith.constant 0 : i32
    return %c0_i32, %c0_i32_0 : i32, i32
  }
  func.func @transform_11(%arg0: i32) -> (i32, i32) {
    %c0_i32 = arith.constant 0 : i32
    %c0_i32_0 = arith.constant 0 : i32
    %c0_i32_1 = arith.constant 0 : i32
    return %c0_i32, %c0_i32_0 : i32, i32
  }
  func.func @transform_12(%arg0: i32) -> (i32, i32) {
    %c0_i32 = arith.constant 0 : i32
    %c0_i32_0 = arith.constant 0 : i32
    %c0_i32_1 = arith.constant 0 : i32
    return %c0_i32, %c0_i32_0 : i32, i32
  }
  func.func @transform_13(%arg0: i32) -> (i32, i32) {
    %c0_i32 = arith.constant 0 : i32
    %c0_i32_0 = arith.constant 0 : i32
    %c0_i32_1 = arith.constant 0 : i32
    return %c0_i32, %c0_i32_0 : i32, i32
  }
  func.func @transform_14(%arg0: i32) -> (i32, i32) {
    %c0_i32 = arith.constant 0 : i32
    %c0_i32_0 = arith.constant 0 : i32
    %c0_i32_1 = arith.constant 0 : i32
    return %c0_i32, %c0_i32_0 : i32, i32
  }
  func.func @transform_15(%arg0: i32) -> (i32, i32) {
    %c0_i32 = arith.constant 0 : i32
    %c0_i32_0 = arith.constant 0 : i32
    %c0_i32_1 = arith.constant 0 : i32
    return %c0_i32, %c0_i32_0 : i32, i32
  }
  func.func @transform_16(%arg0: i32) -> (i32, i32, i32) {
    %c0_i32 = arith.constant 0 : i32
    %c0_i32_0 = arith.constant 0 : i32
    %c0_i32_1 = arith.constant 0 : i32
    return %arg0, %c0_i32, %c0_i32_0 : i32, i32, i32
  }
}

module attributes {stable_mosaic.version = 11 : i64} {
  func.func @_layer_kernel(%arg0: i32, %arg1: memref<1x8x128xf32, #tpu.memory_space<vmem>>, %arg2: memref<1x128xf32, #tpu.memory_space<vmem>>, %arg3: memref<1x128xf32, #tpu.memory_space<vmem>>, %arg4: memref<128x128xbf16, #tpu.memory_space<vmem>>, %arg5: memref<128x128xbf16, #tpu.memory_space<vmem>>, %arg6: memref<128x128xbf16, #tpu.memory_space<vmem>>, %arg7: memref<128x128xbf16, #tpu.memory_space<vmem>>, %arg8: memref<1x128xf32, #tpu.memory_space<vmem>>, %arg9: memref<1x128xf32, #tpu.memory_space<vmem>>, %arg10: memref<1x128xf32, #tpu.memory_space<vmem>>, %arg11: memref<512x128xbf16, #tpu.memory_space<vmem>>, %arg12: memref<512x128xbf16, #tpu.memory_space<vmem>>, %arg13: memref<1x512xf32, #tpu.memory_space<vmem>>, %arg14: memref<1x512xf32, #tpu.memory_space<vmem>>, %arg15: memref<512x128xbf16, #tpu.memory_space<vmem>>, %arg16: memref<1x128xf32, #tpu.memory_space<vmem>>, %arg17: memref<1x8x128xbf16, #tpu.memory_space<vmem>>, %arg18: memref<2x8x64xbf16, #tpu.memory_space<vmem>>, %arg19: memref<2x8x64xbf16, #tpu.memory_space<vmem>>) attributes {dimension_semantics = [#tpu.dimension_semantics<parallel>], iteration_bounds = array<i64: 2>, scalar_prefetch = 0 : i64, scratch_operands = 2 : i64, tpu.core_type = #tpu.core_type<tc>, window_params = [{transform_indices = @transform_0, window_bounds = array<i64: 1, 8, 128>}, {pipeline_mode = #tpu.pipeline_mode<synchronous>, transform_indices = @transform_1, window_bounds = array<i64: 1, 128>}, {pipeline_mode = #tpu.pipeline_mode<synchronous>, transform_indices = @transform_2, window_bounds = array<i64: 1, 128>}, {pipeline_mode = #tpu.pipeline_mode<synchronous>, transform_indices = @transform_3, window_bounds = array<i64: 128, 128>}, {pipeline_mode = #tpu.pipeline_mode<synchronous>, transform_indices = @transform_4, window_bounds = array<i64: 128, 128>}, {pipeline_mode = #tpu.pipeline_mode<synchronous>, transform_indices = @transform_5, window_bounds = array<i64: 128, 128>}, {pipeline_mode = #tpu.pipeline_mode<synchronous>, transform_indices = @transform_6, window_bounds = array<i64: 128, 128>}, {pipeline_mode = #tpu.pipeline_mode<synchronous>, transform_indices = @transform_7, window_bounds = array<i64: 1, 128>}, {pipeline_mode = #tpu.pipeline_mode<synchronous>, transform_indices = @transform_8, window_bounds = array<i64: 1, 128>}, {pipeline_mode = #tpu.pipeline_mode<synchronous>, transform_indices = @transform_9, window_bounds = array<i64: 1, 128>}, {pipeline_mode = #tpu.pipeline_mode<synchronous>, transform_indices = @transform_10, window_bounds = array<i64: 512, 128>}, {pipeline_mode = #tpu.pipeline_mode<synchronous>, transform_indices = @transform_11, window_bounds = array<i64: 512, 128>}, {pipeline_mode = #tpu.pipeline_mode<synchronous>, transform_indices = @transform_12, window_bounds = array<i64: 1, 512>}, {pipeline_mode = #tpu.pipeline_mode<synchronous>, transform_indices = @transform_13, window_bounds = array<i64: 1, 512>}, {pipeline_mode = #tpu.pipeline_mode<synchronous>, transform_indices = @transform_14, window_bounds = array<i64: 512, 128>}, {pipeline_mode = #tpu.pipeline_mode<synchronous>, transform_indices = @transform_15, window_bounds = array<i64: 1, 128>}, {transform_indices = @transform_16, window_bounds = array<i64: 1, 8, 128>}]} {
    %c0 = arith.constant 0 : index
    %c0_0 = arith.constant 0 : index
    %c0_1 = arith.constant 0 : index
    %0 = vector.load %arg1[%c0, %c0_0, %c0_1] : memref<1x8x128xf32, #tpu.memory_space<vmem>>, vector<1x8x128xf32>
    %c0_2 = arith.constant 0 : index
    %c0_3 = arith.constant 0 : index
    %1 = vector.load %arg2[%c0_2, %c0_3] : memref<1x128xf32, #tpu.memory_space<vmem>>, vector<1x128xf32>
    %c0_4 = arith.constant 0 : index
    %c0_5 = arith.constant 0 : index
    %2 = vector.load %arg3[%c0_4, %c0_5] : memref<1x128xf32, #tpu.memory_space<vmem>>, vector<1x128xf32>
    %cst = arith.constant dense<0.000000e+00> : vector<1x8xf32>
    %3 = vector.multi_reduction <add>, %0, %cst [2] : vector<1x8x128xf32> to vector<1x8xf32>
    %4 = vector.shape_cast %3 : vector<1x8xf32> to vector<1x8x1xf32>
    %cst_6 = arith.constant 1.280000e+02 : f32
    %5 = vector.broadcast %cst_6 : f32 to vector<1x8x1xf32>
    %6 = arith.divf %4, %5 : vector<1x8x1xf32>
    %7 = vector.broadcast %6 : vector<1x8x1xf32> to vector<1x8x128xf32>
    %8 = arith.subf %0, %7 : vector<1x8x128xf32>
    %9 = arith.mulf %8, %8 : vector<1x8x128xf32>
    %cst_7 = arith.constant dense<0.000000e+00> : vector<1x8xf32>
    %10 = vector.multi_reduction <add>, %9, %cst_7 [2] : vector<1x8x128xf32> to vector<1x8xf32>
    %11 = vector.shape_cast %10 : vector<1x8xf32> to vector<1x8x1xf32>
    %cst_8 = arith.constant 1.280000e+02 : f32
    %12 = vector.broadcast %cst_8 : f32 to vector<1x8x1xf32>
    %13 = arith.divf %11, %12 : vector<1x8x1xf32>
    %14 = vector.broadcast %6 : vector<1x8x1xf32> to vector<1x8x128xf32>
    %15 = arith.subf %0, %14 : vector<1x8x128xf32>
    %cst_9 = arith.constant 9.99999974E-6 : f32
    %16 = vector.broadcast %cst_9 : f32 to vector<1x8x1xf32>
    %17 = arith.addf %13, %16 : vector<1x8x1xf32>
    %18 = math.rsqrt %17 : vector<1x8x1xf32>
    %19 = vector.broadcast %18 : vector<1x8x1xf32> to vector<1x8x128xf32>
    %20 = arith.mulf %15, %19 : vector<1x8x128xf32>
    %21 = vector.shape_cast %1 : vector<1x128xf32> to vector<1x1x128xf32>
    %22 = vector.broadcast %21 : vector<1x1x128xf32> to vector<1x8x128xf32>
    %23 = arith.mulf %20, %22 : vector<1x8x128xf32>
    %24 = vector.shape_cast %2 : vector<1x128xf32> to vector<1x1x128xf32>
    %25 = vector.broadcast %24 : vector<1x1x128xf32> to vector<1x8x128xf32>
    %26 = arith.addf %23, %25 : vector<1x8x128xf32>
    %27 = vector.shape_cast %26 : vector<1x8x128xf32> to vector<8x128xf32>
    %28 = arith.truncf %27 : vector<8x128xf32> to vector<8x128xbf16>
    %c0_10 = arith.constant 0 : index
    %c0_11 = arith.constant 0 : index
    %29 = vector.load %arg4[%c0_10, %c0_11] : memref<128x128xbf16, #tpu.memory_space<vmem>>, vector<128x128xbf16>
    %cst_12 = arith.constant dense<0.000000e+00> : vector<8x128xf32>
    %30 = tpu.matmul %28, %29, %cst_12 {dimension_numbers = #tpu.dot_dimension_numbers<[1], [0], [0], [1], [0, 0, 1, 1], [], []>} : vector<8x128xbf16>, vector<128x128xbf16>, vector<8x128xf32> -> vector<8x128xf32>
    %c0_13 = arith.constant 0 : index
    %c0_14 = arith.constant 0 : index
    %31 = vector.load %arg5[%c0_13, %c0_14] : memref<128x128xbf16, #tpu.memory_space<vmem>>, vector<128x128xbf16>
    %cst_15 = arith.constant dense<0.000000e+00> : vector<8x128xf32>
    %32 = tpu.matmul %28, %31, %cst_15 {dimension_numbers = #tpu.dot_dimension_numbers<[1], [0], [0], [1], [0, 0, 1, 1], [], []>} : vector<8x128xbf16>, vector<128x128xbf16>, vector<8x128xf32> -> vector<8x128xf32>
    %c0_16 = arith.constant 0 : index
    %c0_17 = arith.constant 0 : index
    %33 = vector.load %arg6[%c0_16, %c0_17] : memref<128x128xbf16, #tpu.memory_space<vmem>>, vector<128x128xbf16>
    %cst_18 = arith.constant dense<0.000000e+00> : vector<8x128xf32>
    %34 = tpu.matmul %28, %33, %cst_18 {dimension_numbers = #tpu.dot_dimension_numbers<[1], [0], [0], [1], [0, 0, 1, 1], [], []>} : vector<8x128xbf16>, vector<128x128xbf16>, vector<8x128xf32> -> vector<8x128xf32>
    %35 = arith.truncf %30 : vector<8x128xf32> to vector<8x128xbf16>
    %36 = vector.shape_cast %35 : vector<8x128xbf16> to vector<1x8x2x64xbf16>
    %37 = tpu.transpose %36, [0, 2, 1, 3] : vector<1x8x2x64xbf16> -> vector<1x2x8x64xbf16>
    %38 = vector.shape_cast %37 : vector<1x2x8x64xbf16> to vector<2x8x64xbf16>
    %39 = arith.truncf %32 : vector<8x128xf32> to vector<8x128xbf16>
    %40 = vector.shape_cast %39 : vector<8x128xbf16> to vector<1x8x2x64xbf16>
    %41 = tpu.transpose %40, [0, 2, 1, 3] : vector<1x8x2x64xbf16> -> vector<1x2x8x64xbf16>
    %42 = vector.shape_cast %41 : vector<1x2x8x64xbf16> to vector<2x8x64xbf16>
    %c0_19 = arith.constant 0 : index
    %c0_20 = arith.constant 0 : index
    %c0_21 = arith.constant 0 : index
    %43 = vector.load %arg18[%c0_19, %c0_20, %c0_21] : memref<2x8x64xbf16, #tpu.memory_space<vmem>>, vector<2x8x64xbf16>
    tpu.vector_store %arg18[%c0_19, %c0_20, %c0_21], %42 {strides = array<i32>} : memref<2x8x64xbf16, #tpu.memory_space<vmem>>, vector<2x8x64xbf16>,
    %44 = arith.truncf %34 : vector<8x128xf32> to vector<8x128xbf16>
    %45 = vector.shape_cast %44 : vector<8x128xbf16> to vector<1x8x2x64xbf16>
    %46 = tpu.transpose %45, [0, 2, 1, 3] : vector<1x8x2x64xbf16> -> vector<1x2x8x64xbf16>
    %47 = vector.shape_cast %46 : vector<1x2x8x64xbf16> to vector<2x8x64xbf16>
    %c0_22 = arith.constant 0 : index
    %c0_23 = arith.constant 0 : index
    %c0_24 = arith.constant 0 : index
    %48 = vector.load %arg19[%c0_22, %c0_23, %c0_24] : memref<2x8x64xbf16, #tpu.memory_space<vmem>>, vector<2x8x64xbf16>
    tpu.vector_store %arg19[%c0_22, %c0_23, %c0_24], %47 {strides = array<i32>} : memref<2x8x64xbf16, #tpu.memory_space<vmem>>, vector<2x8x64xbf16>,
    %cst_25 = arith.constant -3.40282347E+38 : f32
    %49 = vector.broadcast %cst_25 : f32 to vector<2x8x1xf32>
    %cst_26 = arith.constant 0.000000e+00 : f32
    %50 = vector.broadcast %cst_26 : f32 to vector<2x8x1xf32>
    %cst_27 = arith.constant 0.000000e+00 : f32
    %51 = vector.broadcast %cst_27 : f32 to vector<2x8x64xf32>
    %c0_i32 = arith.constant 0 : i32
    %c8_i32 = arith.constant 8 : i32
    %52 = arith.muli %c0_i32, %c8_i32 : i32
    %53 = tpu.assume_multiple %52, 8 : i32
    %c0_28 = arith.constant 0 : index
    %54 = arith.index_cast %53 : i32 to index
    %c0_29 = arith.constant 0 : index
    %55 = vector.load %arg18[%c0_28, %54, %c0_29] : memref<2x8x64xbf16, #tpu.memory_space<vmem>>, vector<2x8x64xbf16>
    %c0_30 = arith.constant 0 : index
    %56 = arith.index_cast %53 : i32 to index
    %c0_31 = arith.constant 0 : index
    %57 = vector.load %arg19[%c0_30, %56, %c0_31] : memref<2x8x64xbf16, #tpu.memory_space<vmem>>, vector<2x8x64xbf16>
    "tpu.trace_start"() <{level = 10 : i32, message = "bid,bjd->bij"}> : () -> ()
    %cst_32 = arith.constant dense<0.000000e+00> : vector<2x8x8xf32>
    %58 = tpu.matmul %38, %55, %cst_32 {dimension_numbers = #tpu.dot_dimension_numbers<[2], [2], [1], [1], [0, 0, 0, 1, 1, 1], [0], [0]>} : vector<2x8x64xbf16>, vector<2x8x64xbf16>, vector<2x8x8xf32> -> vector<2x8x8xf32>
    "tpu.trace_stop"() : () -> ()
    %cst_33 = arith.constant dense<0xFF800000> : vector<2x8xf32>
    %59 = vector.multi_reduction <maximumf>, %58, %cst_33 [2] : vector<2x8x8xf32> to vector<2x8xf32>
    %60 = vector.shape_cast %59 : vector<2x8xf32> to vector<2x8x1xf32>
    %61 = arith.maximumf %49, %60 : vector<2x8x1xf32>
    %62 = arith.subf %49, %61 : vector<2x8x1xf32>
    %63 = math.exp %62 : vector<2x8x1xf32>
    %64 = vector.broadcast %61 : vector<2x8x1xf32> to vector<2x8x8xf32>
    %65 = arith.subf %58, %64 : vector<2x8x8xf32>
    %66 = math.exp %65 : vector<2x8x8xf32>
    %67 = arith.mulf %63, %50 : vector<2x8x1xf32>
    %cst_34 = arith.constant dense<0.000000e+00> : vector<2x8xf32>
    %68 = vector.multi_reduction <add>, %66, %cst_34 [2] : vector<2x8x8xf32> to vector<2x8xf32>
    %69 = vector.shape_cast %68 : vector<2x8xf32> to vector<2x8x1xf32>
    %70 = arith.addf %67, %69 : vector<2x8x1xf32>
    %71 = vector.broadcast %63 : vector<2x8x1xf32> to vector<2x8x64xf32>
    %72 = arith.mulf %71, %51 : vector<2x8x64xf32>
    %73 = arith.truncf %66 : vector<2x8x8xf32> to vector<2x8x8xbf16>
    "tpu.trace_start"() <{level = 10 : i32, message = "bij,bjd->bid"}> : () -> ()
    %cst_35 = arith.constant dense<0.000000e+00> : vector<2x8x64xf32>
    %74 = tpu.matmul %73, %57, %cst_35 {dimension_numbers = #tpu.dot_dimension_numbers<[2], [1], [1], [2], [0, 0, 0, 1, 1, 2], [0], [0]>} : vector<2x8x8xbf16>, vector<2x8x64xbf16>, vector<2x8x64xf32> -> vector<2x8x64xf32>
    "tpu.trace_stop"() : () -> ()
    %75 = arith.addf %72, %74 : vector<2x8x64xf32>
    %c1_i32 = arith.constant 1 : i32
    %76 = tpu.reciprocal %70 {approx = true} : vector<2x8x1xf32> -> vector<2x8x1xf32>
    %77 = vector.broadcast %76 : vector<2x8x1xf32> to vector<2x8x64xf32>
    %78 = arith.mulf %75, %77 : vector<2x8x64xf32>
    %79 = arith.truncf %78 : vector<2x8x64xf32> to vector<2x8x64xbf16>
    %80 = vector.shape_cast %79 : vector<2x8x64xbf16> to vector<1x2x8x64xbf16>
    %81 = tpu.transpose %80, [0, 2, 1, 3] : vector<1x2x8x64xbf16> -> vector<1x8x2x64xbf16>
    %82 = vector.shape_cast %81 : vector<1x8x2x64xbf16> to vector<8x128xbf16>
    %c0_36 = arith.constant 0 : index
    %c0_37 = arith.constant 0 : index
    %83 = vector.load %arg7[%c0_36, %c0_37] : memref<128x128xbf16, #tpu.memory_space<vmem>>, vector<128x128xbf16>
    %cst_38 = arith.constant dense<0.000000e+00> : vector<8x128xf32>
    %84 = tpu.matmul %82, %83, %cst_38 {dimension_numbers = #tpu.dot_dimension_numbers<[1], [0], [0], [1], [0, 0, 1, 1], [], []>} : vector<8x128xbf16>, vector<128x128xbf16>, vector<8x128xf32> -> vector<8x128xf32>
    %c0_39 = arith.constant 0 : index
    %c0_40 = arith.constant 0 : index
    %85 = vector.load %arg8[%c0_39, %c0_40] : memref<1x128xf32, #tpu.memory_space<vmem>>, vector<1x128xf32>
    %86 = vector.broadcast %85 : vector<1x128xf32> to vector<8x128xf32>
    %87 = arith.addf %84, %86 : vector<8x128xf32>
    %88 = vector.shape_cast %87 : vector<8x128xf32> to vector<1x8x128xf32>
    %89 = arith.addf %0, %88 : vector<1x8x128xf32>
    %c0_41 = arith.constant 0 : index
    %c0_42 = arith.constant 0 : index
    %90 = vector.load %arg9[%c0_41, %c0_42] : memref<1x128xf32, #tpu.memory_space<vmem>>, vector<1x128xf32>
    %c0_43 = arith.constant 0 : index
    %c0_44 = arith.constant 0 : index
    %91 = vector.load %arg10[%c0_43, %c0_44] : memref<1x128xf32, #tpu.memory_space<vmem>>, vector<1x128xf32>
    %cst_45 = arith.constant dense<0.000000e+00> : vector<1x8xf32>
    %92 = vector.multi_reduction <add>, %89, %cst_45 [2] : vector<1x8x128xf32> to vector<1x8xf32>
    %93 = vector.shape_cast %92 : vector<1x8xf32> to vector<1x8x1xf32>
    %cst_46 = arith.constant 1.280000e+02 : f32
    %94 = vector.broadcast %cst_46 : f32 to vector<1x8x1xf32>
    %95 = arith.divf %93, %94 : vector<1x8x1xf32>
    %96 = vector.broadcast %95 : vector<1x8x1xf32> to vector<1x8x128xf32>
    %97 = arith.subf %89, %96 : vector<1x8x128xf32>
    %98 = arith.mulf %97, %97 : vector<1x8x128xf32>
    %cst_47 = arith.constant dense<0.000000e+00> : vector<1x8xf32>
    %99 = vector.multi_reduction <add>, %98, %cst_47 [2] : vector<1x8x128xf32> to vector<1x8xf32>
    %100 = vector.shape_cast %99 : vector<1x8xf32> to vector<1x8x1xf32>
    %cst_48 = arith.constant 1.280000e+02 : f32
    %101 = vector.broadcast %cst_48 : f32 to vector<1x8x1xf32>
    %102 = arith.divf %100, %101 : vector<1x8x1xf32>
    %103 = vector.broadcast %95 : vector<1x8x1xf32> to vector<1x8x128xf32>
    %104 = arith.subf %89, %103 : vector<1x8x128xf32>
    %cst_49 = arith.constant 9.99999974E-6 : f32
    %105 = vector.broadcast %cst_49 : f32 to vector<1x8x1xf32>
    %106 = arith.addf %102, %105 : vector<1x8x1xf32>
    %107 = math.rsqrt %106 : vector<1x8x1xf32>
    %108 = vector.broadcast %107 : vector<1x8x1xf32> to vector<1x8x128xf32>
    %109 = arith.mulf %104, %108 : vector<1x8x128xf32>
    %110 = vector.shape_cast %90 : vector<1x128xf32> to vector<1x1x128xf32>
    %111 = vector.broadcast %110 : vector<1x1x128xf32> to vector<1x8x128xf32>
    %112 = arith.mulf %109, %111 : vector<1x8x128xf32>
    %113 = vector.shape_cast %91 : vector<1x128xf32> to vector<1x1x128xf32>
    %114 = vector.broadcast %113 : vector<1x1x128xf32> to vector<1x8x128xf32>
    %115 = arith.addf %112, %114 : vector<1x8x128xf32>
    %116 = vector.shape_cast %115 : vector<1x8x128xf32> to vector<8x128xf32>
    %117 = arith.truncf %116 : vector<8x128xf32> to vector<8x128xbf16>
    %cst_50 = arith.constant 0.000000e+00 : f32
    %118 = vector.broadcast %cst_50 : f32 to vector<8x128xf32>
    %c0_i32_51 = arith.constant 0 : i32
    %c512_i32 = arith.constant 512 : i32
    %119 = arith.muli %c0_i32_51, %c512_i32 : i32
    %120 = tpu.assume_multiple %119, 512 : i32
    %121 = arith.index_cast %120 : i32 to index
    %c0_52 = arith.constant 0 : index
    %122 = vector.load %arg11[%121, %c0_52] : memref<512x128xbf16, #tpu.memory_space<vmem>>, vector<512x128xbf16>
    %123 = arith.index_cast %120 : i32 to index
    %c0_53 = arith.constant 0 : index
    %124 = vector.load %arg12[%123, %c0_53] : memref<512x128xbf16, #tpu.memory_space<vmem>>, vector<512x128xbf16>
    "tpu.trace_start"() <{level = 10 : i32, message = "md,hd->mh"}> : () -> ()
    %cst_54 = arith.constant dense<0.000000e+00> : vector<8x512xf32>
    %125 = tpu.matmul %117, %122, %cst_54 {dimension_numbers = #tpu.dot_dimension_numbers<[1], [1], [0], [0], [0, 0, 1, 0], [], []>} : vector<8x128xbf16>, vector<512x128xbf16>, vector<8x512xf32> -> vector<8x512xf32>
    "tpu.trace_stop"() : () -> ()
    %126 = arith.index_cast %c0_i32_51 : i32 to index
    %c0_55 = arith.constant 0 : index
    %127 = vector.load %arg13[%126, %c0_55] : memref<1x512xf32, #tpu.memory_space<vmem>>, vector<1x512xf32>
    %128 = vector.broadcast %127 : vector<1x512xf32> to vector<8x512xf32>
    %129 = arith.addf %125, %128 : vector<8x512xf32>
    "tpu.trace_start"() <{level = 10 : i32, message = "md,hd->mh"}> : () -> ()
    %cst_56 = arith.constant dense<0.000000e+00> : vector<8x512xf32>
    %130 = tpu.matmul %117, %124, %cst_56 {dimension_numbers = #tpu.dot_dimension_numbers<[1], [1], [0], [0], [0, 0, 1, 0], [], []>} : vector<8x128xbf16>, vector<512x128xbf16>, vector<8x512xf32> -> vector<8x512xf32>
    "tpu.trace_stop"() : () -> ()
    %131 = arith.index_cast %c0_i32_51 : i32 to index
    %c0_57 = arith.constant 0 : index
    %132 = vector.load %arg14[%131, %c0_57] : memref<1x512xf32, #tpu.memory_space<vmem>>, vector<1x512xf32>
    %133 = vector.broadcast %132 : vector<1x512xf32> to vector<8x512xf32>
    %134 = arith.addf %130, %133 : vector<8x512xf32>
    %135 = arith.mulf %134, %134 : vector<8x512xf32>
    %136 = arith.mulf %134, %135 : vector<8x512xf32>
    %cst_58 = arith.constant 4.471500e-02 : f32
    %137 = vector.broadcast %cst_58 : f32 to vector<8x512xf32>
    %138 = arith.mulf %137, %136 : vector<8x512xf32>
    %139 = arith.addf %134, %138 : vector<8x512xf32>
    %cst_59 = arith.constant 0.797884583 : f32
    %140 = vector.broadcast %cst_59 : f32 to vector<8x512xf32>
    %141 = arith.mulf %140, %139 : vector<8x512xf32>
    %142 = math.tanh %141 : vector<8x512xf32>
    %cst_60 = arith.constant 1.000000e+00 : f32
    %143 = vector.broadcast %cst_60 : f32 to vector<8x512xf32>
    %144 = arith.addf %143, %142 : vector<8x512xf32>
    %cst_61 = arith.constant 5.000000e-01 : f32
    %145 = vector.broadcast %cst_61 : f32 to vector<8x512xf32>
    %146 = arith.mulf %145, %144 : vector<8x512xf32>
    %147 = arith.mulf %134, %146 : vector<8x512xf32>
    %148 = arith.mulf %129, %147 : vector<8x512xf32>
    %149 = arith.truncf %148 : vector<8x512xf32> to vector<8x512xbf16>
    %150 = arith.index_cast %120 : i32 to index
    %c0_62 = arith.constant 0 : index
    %151 = vector.load %arg15[%150, %c0_62] : memref<512x128xbf16, #tpu.memory_space<vmem>>, vector<512x128xbf16>
    %cst_63 = arith.constant dense<0.000000e+00> : vector<8x128xf32>
    %152 = tpu.matmul %149, %151, %cst_63 {dimension_numbers = #tpu.dot_dimension_numbers<[1], [0], [0], [1], [0, 0, 1, 1], [], []>} : vector<8x512xbf16>, vector<512x128xbf16>, vector<8x128xf32> -> vector<8x128xf32>
    %153 = arith.addf %118, %152 : vector<8x128xf32>
    %c1_i32_64 = arith.constant 1 : i32
    %c0_65 = arith.constant 0 : index
    %c0_66 = arith.constant 0 : index
    %154 = vector.load %arg16[%c0_65, %c0_66] : memref<1x128xf32, #tpu.memory_space<vmem>>, vector<1x128xf32>
    %155 = vector.broadcast %154 : vector<1x128xf32> to vector<8x128xf32>
    %156 = arith.addf %153, %155 : vector<8x128xf32>
    %157 = vector.shape_cast %156 : vector<8x128xf32> to vector<1x8x128xf32>
    %158 = arith.addf %89, %157 : vector<1x8x128xf32>
    %159 = arith.truncf %158 : vector<1x8x128xf32> to vector<1x8x128xbf16>
    %c0_67 = arith.constant 0 : index
    %c0_68 = arith.constant 0 : index
    %c0_69 = arith.constant 0 : index
    %160 = vector.load %arg17[%c0_67, %c0_68, %c0_69] : memref<1x8x128xbf16, #tpu.memory_space<vmem>>, vector<1x8x128xbf16>
    tpu.vector_store %arg17[%c0_67, %c0_68, %c0_69], %159 {strides = array<i32>} : memref<1x8x128xbf16, #tpu.memory_space<vmem>>, vector<1x8x128xbf16>,
    return
  }
  func.func @transform_0(%arg0: i32) -> (i32, i32, i32) {
    %c0_i32 = arith.constant 0 : i32
    %c0_i32_0 = arith.constant 0 : i32
    %c0_i32_1 = arith.constant 0 : i32
    return %arg0, %c0_i32, %c0_i32_0 : i32, i32, i32
  }
  func.func @transform_1(%arg0: i32) -> (i32, i32) {
    %c0_i32 = arith.constant 0 : i32
    %c0_i32_0 = arith.constant 0 : i32
    %c0_i32_1 = arith.constant 0 : i32
    return %c0_i32, %c0_i32_0 : i32, i32
  }
  func.func @transform_2(%arg0: i32) -> (i32, i32) {
    %c0_i32 = arith.constant 0 : i32
    %c0_i32_0 = arith.constant 0 : i32
    %c0_i32_1 = arith.constant 0 : i32
    return %c0_i32, %c0_i32_0 : i32, i32
  }
  func.func @transform_3(%arg0: i32) -> (i32, i32) {
    %c0_i32 = arith.constant 0 : i32
    %c0_i32_0 = arith.constant 0 : i32
    %c0_i32_1 = arith.constant 0 : i32
    return %c0_i32, %c0_i32_0 : i32, i32
  }
  func.func @transform_4(%arg0: i32) -> (i32, i32) {
    %c0_i32 = arith.constant 0 : i32
    %c0_i32_0 = arith.constant 0 : i32
    %c0_i32_1 = arith.constant 0 : i32
    return %c0_i32, %c0_i32_0 : i32, i32
  }
  func.func @transform_5(%arg0: i32) -> (i32, i32) {
    %c0_i32 = arith.constant 0 : i32
    %c0_i32_0 = arith.constant 0 : i32
    %c0_i32_1 = arith.constant 0 : i32
    return %c0_i32, %c0_i32_0 : i32, i32
  }
  func.func @transform_6(%arg0: i32) -> (i32, i32) {
    %c0_i32 = arith.constant 0 : i32
    %c0_i32_0 = arith.constant 0 : i32
    %c0_i32_1 = arith.constant 0 : i32
    return %c0_i32, %c0_i32_0 : i32, i32
  }
  func.func @transform_7(%arg0: i32) -> (i32, i32) {
    %c0_i32 = arith.constant 0 : i32
    %c0_i32_0 = arith.constant 0 : i32
    %c0_i32_1 = arith.constant 0 : i32
    return %c0_i32, %c0_i32_0 : i32, i32
  }
  func.func @transform_8(%arg0: i32) -> (i32, i32) {
    %c0_i32 = arith.constant 0 : i32
    %c0_i32_0 = arith.constant 0 : i32
    %c0_i32_1 = arith.constant 0 : i32
    return %c0_i32, %c0_i32_0 : i32, i32
  }
  func.func @transform_9(%arg0: i32) -> (i32, i32) {
    %c0_i32 = arith.constant 0 : i32
    %c0_i32_0 = arith.constant 0 : i32
    %c0_i32_1 = arith.constant 0 : i32
    return %c0_i32, %c0_i32_0 : i32, i32
  }
  func.func @transform_10(%arg0: i32) -> (i32, i32) {
    %c0_i32 = arith.constant 0 : i32
    %c0_i32_0 = arith.constant 0 : i32
    %c0_i32_1 = arith.constant 0 : i32
    return %c0_i32, %c0_i32_0 : i32, i32
  }
  func.func @transform_11(%arg0: i32) -> (i32, i32) {
    %c0_i32 = arith.constant 0 : i32
    %c0_i32_0 = arith.constant 0 : i32
    %c0_i32_1 = arith.constant 0 : i32
    return %c0_i32, %c0_i32_0 : i32, i32
  }
  func.func @transform_12(%arg0: i32) -> (i32, i32) {
    %c0_i32 = arith.constant 0 : i32
    %c0_i32_0 = arith.constant 0 : i32
    %c0_i32_1 = arith.constant 0 : i32
    return %c0_i32, %c0_i32_0 : i32, i32
  }
  func.func @transform_13(%arg0: i32) -> (i32, i32) {
    %c0_i32 = arith.constant 0 : i32
    %c0_i32_0 = arith.constant 0 : i32
    %c0_i32_1 = arith.constant 0 : i32
    return %c0_i32, %c0_i32_0 : i32, i32
  }
  func.func @transform_14(%arg0: i32) -> (i32, i32) {
    %c0_i32 = arith.constant 0 : i32
    %c0_i32_0 = arith.constant 0 : i32
    %c0_i32_1 = arith.constant 0 : i32
    return %c0_i32, %c0_i32_0 : i32, i32
  }
  func.func @transform_15(%arg0: i32) -> (i32, i32) {
    %c0_i32 = arith.constant 0 : i32
    %c0_i32_0 = arith.constant 0 : i32
    %c0_i32_1 = arith.constant 0 : i32
    return %c0_i32, %c0_i32_0 : i32, i32
  }
  func.func @transform_16(%arg0: i32) -> (i32, i32, i32) {
    %c0_i32 = arith.constant 0 : i32
    %c0_i32_0 = arith.constant 0 : i32
    %c0_i32_1 = arith.constant 0 : i32
    return %arg0, %c0_i32, %c0_i32_0 : i32, i32, i32
  }
}

</mosaic_0001>

<bundles_post_ra>
// kernel: tpu_custom_call.1
= control target key start
LH: loop header
LB: loop body
LE: loop exit
PB: predicated region body
PF: predicated region fallthrough
CT: control target
= control target key end

     0   :  { %s4824_s0 = inlined_call_operand.hbm [shape: f32[2,8,128], index: 0, kind: input, shape index: {}]   ;;  %s4825_s1 = inlined_call_operand.vmem [shape: f32[1,128], index: 1, kind: input, shape index: {}]   ;;  %s4826_s2 = inlined_call_operand.hbm [shape: f32[1,128], index: 2, kind: input, shape index: {}]   ;;  %s4827_s3 = inlined_call_operand.hbm [shape: bf16[128,128], index: 3, kind: input, shape index: {}]   ;;  %s4828_s4 = inlined_call_operand.hbm [shape: bf16[128,128], index: 4, kind: input, shape index: {}]   ;;  %s4829_s5 = inlined_call_operand.hbm [shape: bf16[128,128], index: 5, kind: input, shape index: {}]   ;;  %s4830_s6 = inlined_call_operand.hbm [shape: bf16[128,128], index: 6, kind: input, shape index: {}]   ;;  %s4831_s7 = inlined_call_operand.vmem [shape: f32[1,128], index: 7, kind: input, shape index: {}]   ;;  %s4832_s8 = inlined_call_operand.vmem [shape: f32[1,128], index: 8, kind: input, shape index: {}]   ;;  %s4833_s9 = inlined_call_operand.vmem [shape: f32[1,128], index: 9, kind: input, shape index: {}]   ;;  %s4834_s10 = inlined_call_operand.hbm [shape: bf16[512,128], index: 10, kind: input, shape index: {}]   ;;  %s4835_s11 = inlined_call_operand.hbm [shape: bf16[512,128], index: 11, kind: input, shape index: {}]   ;;  %s4836_s12 = inlined_call_operand.vmem [shape: f32[1,512], index: 12, kind: input, shape index: {}]   ;;  %s4837_s13 = inlined_call_operand.vmem [shape: f32[1,512], index: 13, kind: input, shape index: {}]   ;;  %s4838_s14 = inlined_call_operand.hbm [shape: bf16[512,128], index: 14, kind: input, shape index: {}]   ;;  %s4839_s15 = inlined_call_operand.vmem [shape: f32[1,128], index: 15, kind: input, shape index: {}]   ;;  %s4840_s16 = inlined_call_operand.hbm [shape: bf16[2,8,128], index: 16, kind: output, shape index: {}]  }
   0x1   :  { %4848 = sst [smem:[#allocation28_spill]] %s4824_s0 }
   0x2   :  { %4849 = sst [smem:[#allocation29_spill]] %s4826_s2 }
   0x3   :  { %4850 = sst [smem:[#allocation30_spill]] %s4827_s3 }
   0x4   :  { %4851 = sst [smem:[#allocation31_spill]] %s4828_s4 }
   0x5   :  { %4852 = sst [smem:[#allocation32_spill]] %s4829_s5 }
   0x6   :  { %4853 = sst [smem:[#allocation33_spill]] %s4830_s6 }
   0x7   :  { %4854 = sst [smem:[#allocation34_spill]] %s4834_s10 }
   0x8   :  { %4855 = sst [smem:[#allocation35_spill]] %s4835_s11 }
   0x9   :  { %4856 = sst [smem:[#allocation36_spill]] %s4838_s14 }
   0xa   :  { %4857 = sst [smem:[#allocation37_spill]] %s4840_s16 }
   0xb   :  { %21 = vsyncpa [#allocation5], 0 }
   0xc   :  { %23 = vsyncpa [#allocation5 + $0x1], 0 }
   0xd   :  { %24 = vsyncpa [#allocation8], 0 }
   0xe   :  { %25 = vsyncpa [#allocation11], 0 }
   0xf   :  { %26 = vsyncpa [#allocation14], 0 }
  0x10   :  { %27 = vsyncpa [#allocation17], 0 }
  0x11   :  { %28 = vsyncpa [#allocation6], 0 }
  0x12   :  { %30 = vsyncpa [#allocation6 + $0x1], 0  ;;  %s4340_s21 = smov 0   ;;  %s4342_s22 = smov 0  }
  0x13   :  { %s4344_s23 = smov 0   ;;  %s4346_s24 = smov 0  }
  0x14 LB: > { %4858 = sst [smem:[#allocation26_spill]] %s4231_s23  ;;  %s4237_s25 = smov [#allocation7]   ;;  %s4235_s24 = sphi %s4346_s24, %s4895_s24   ;;  %s4231_s23 = sphi %s4344_s23, %s4892_s23   ;;  %s4227_s22 = sphi %s4342_s22, %s4894_s22   ;;  %s4223_s21 = sphi %s4340_s21, %s4893_s21  }
  0x15   : > { %s424_s26 = sshll.u32 %s4237_s25, 4  ;;  %s4361_s27 = sadd.s32 4294967295, %s4235_s24   ;;  %s425_s26 = int_to_ptr.vmem [resolvable:$true] %s424_s26 }
  0x16   : > { %p3202_p0 = scmp.ge.s32.totalorder %s4235_s24, 1  ;;  %p4843_p1 = scmp.eq.s32.totalorder %s4361_s27, 0 }
  0x17   : > { %p408_p2 = scmp.lt.s32.totalorder %s4235_s24, 3  ;;  %s4238_s29 = smov [#allocation10]  }
  0x18   : > { %s447_s30 = sshll.u32 %s4238_s29, 4  ;;  %s4239_s17 = smov [#allocation13]   ;;  %s4379_s30 = int_to_ptr.vmem [resolvable:$true] %s447_s30 }
  0x19   : > { %p4366_p3 = pnand %p3202_p0, %p408_p2  ;;  %s473_s18 = sshll.u32 %s4239_s17, 4  ;;  %s4381_s18 = int_to_ptr.vmem [resolvable:$true] %s473_s18 }
  0x1a   : > { %s3930_s20 = scalar_lea.vmem %s425_s26, 16  ;;  %s3937_s25 = scalar_lea.vmem %s425_s26, 32 }
  0x1b   : > { %s4859_s28 = scalar_select %p4366_p3, 1, 0 }
  0x1c   : > { %p3667_p5 = pneg %p4366_p3  ;;  %p3931_p8 = scmp.ne.s32.totalorder %s425_s26, %s3930_s20 }
  0x1d   : > { %p3938_p11 = scmp.lt.s32.totalorder %s425_s26, %s425_s26  ;;  %p3939_p12 = scmp.lt.s32.totalorder %s3937_s25, %s3930_s20 }
  0x1e   : > { %p4375_p6 = pnand %p3667_p5, %p4843_p1 }
  0x1f   : > { %p3940_p13 = por %p3939_p12, %p3938_p11 }
  0x20   : > { %p4385_p7 = pneg %p4375_p6 }
  0x22   : > { %p3933_p9 = pnand %p3931_p8, %p4385_p7 }
  0x24   : > { %p3934_p10 = pneg %p3933_p9 }
  0x26   : > { %p3941_p0 = pnand %p3940_p13, %p3934_p10 }
  0x28   : > { %3944 = shalt.err (!%p3941_p0)
}
  0x29   : > { %s4862_s2 = sld [smem:[#allocation29_spill]]  ;;  %s3956_s16 = scalar_lea.vmem %s4379_s30, 1024 }
  0x2a   : > { %p3957_p2 = scmp.ne.s32.totalorder %s4379_s30, %s3956_s16  ;;  %p3964_p9 = scmp.lt.s32.totalorder %s4379_s30, %s4379_s30 }
  0x2b   : > { %p3965_p11 = scmp.lt.s32.totalorder %s3956_s16, %s3956_s16 }
  0x2c   : > { %p3959_p5 = pnand %p3957_p2, %p4385_p7 }
  0x2d   : > { %p3966_p10 = por %p3965_p11, %p3964_p9 }
  0x2e   : > { %p3960_p8 = pneg %p3959_p5 }
  0x2f   : > { %3670 = dma.hbm_to_vmem [thread:$0]  (!%p4375_p6), %s4862_s2, 16, %s425_s26, [#allocation8]  }
  0x30   : > { %p3967_p12 = pnand %p3966_p10, %p3960_p8 }
  0x32   : > { %3970 = shalt.err (!%p3967_p12)
}
  0x33   : > { %s4240_s20 = smov 64   ;;  %s4241_s25 = smov 4  }
  0x34   : > { %s4863_s4 = sld [smem:[#allocation31_spill]]  ;;  %s3982_s16 = scalar_lea.vmem %s4381_s18, 1024 }
  0x35   : > { %p3983_p13 = scmp.ne.s32.totalorder %s4381_s18, %s3982_s16  ;;  %p3990_p5 = scmp.lt.s32.totalorder %s4381_s18, %s4381_s18 }
  0x36   : > { %p3991_p8 = scmp.lt.s32.totalorder %s3982_s16, %s3982_s16 }
  0x37   : > { %p3985_p0 = pnand %p3983_p13, %p4385_p7 }
  0x38   : > { %p3992_p9 = por %p3991_p8, %p3990_p5 }
  0x39   : > { %p3986_p2 = pneg %p3985_p0 }
  0x3a   : > { %3676 = dma.hbm_to_vmem [thread:$0]  (!%p4375_p6), %s4863_s4, 1024, %s4379_s30, [#allocation11], %s4240_s20, %s4240_s20, %s4241_s25  }
  0x3b   : > { %p3993_p11 = pnand %p3992_p9, %p3986_p2 }
  0x3d   : > { %3996 = shalt.err (!%p3993_p11)
}
  0x3e   : > { %s4864_s6 = sld [smem:[#allocation33_spill]]  ;;  %s4242_s30 = smov [#allocation16]  }
  0x3f   : > { %s508_s29 = sshll.u32 %s4242_s30, 4  ;;  %s4243_s2 = smov [#allocation9]   ;;  %s509_s29 = int_to_ptr.vmem [resolvable:$true] %s508_s29 }
  0x40   : > { %s434_s4 = sshll.u32 %s4243_s2, 4  ;;  %s4008_s16 = scalar_lea.vmem %s509_s29, 4096  ;;  %s435_s4 = int_to_ptr.vmem [resolvable:$true] %s434_s4 }
  0x41   : > { %p4009_p10 = scmp.ne.s32.totalorder %s509_s29, %s4008_s16  ;;  %p4016_p0 = scmp.lt.s32.totalorder %s509_s29, %s509_s29 }
  0x42   : > { %p4017_p2 = scmp.lt.s32.totalorder %s4008_s16, %s4008_s16 }
  0x43   : > { %p4011_p12 = pnand %p4009_p10, %p4385_p7 }
  0x44   : > { %3682 = dma.hbm_to_vmem [thread:$0]  (!%p4375_p6), %s4864_s6, 1024, %s4381_s18, [#allocation14], %s4240_s20, %s4240_s20, %s4241_s25  }
  0x45   : > { %p4012_p13 = pneg %p4011_p12  ;;  %p4018_p5 = por %p4017_p2, %p4016_p0 }
  0x47   : > { %p4019_p8 = pnand %p4018_p5, %p4012_p13 }
  0x49   : > { %4022 = shalt.err (!%p4019_p8)
}
  0x4a   : > { %s4865_s11 = sld [smem:[#allocation35_spill]]  ;;  %s4034_s2 = scalar_lea.vmem %s435_s4, 1024 }
  0x4b   : > { %p4035_p9 = scmp.ne.s32.totalorder %s435_s4, %s4034_s2  ;;  %p4042_p12 = scmp.lt.s32.totalorder %s435_s4, %s435_s4 }
  0x4c   : > { %p4043_p0 = scmp.lt.s32.totalorder %s4034_s2, %s4034_s2 }
  0x4d   : > { %p4037_p11 = pnand %p4035_p9, %p4385_p7 }
  0x4e   : > { %p4044_p13 = por %p4043_p0, %p4042_p12 }
  0x4f   : > { %p4038_p10 = pneg %p4037_p11 }
  0x50   : > { %3688 = dma.hbm_to_vmem [thread:$0]  (!%p4375_p6), %s4865_s11, 4096, %s509_s29, [#allocation17], %s4240_s20, %s4240_s20, %s4241_s25  }
  0x51   : > { %p4045_p2 = pnand %p4044_p13, %p4038_p10 }
  0x53   : > { %4048 = shalt.err (!%p4045_p2)
}
  0x54   : > { %s4866_s3 = sld [smem:[#allocation30_spill]]  ;;  %s4244_s29 = smov [#allocation12]  }
  0x55   : > { %s460_s16 = sshll.u32 %s4244_s29, 4  ;;  %s4245_s18 = smov [#allocation15]   ;;  %s461_s16 = int_to_ptr.vmem [resolvable:$true] %s460_s16 }
  0x56   : > { %s495_s17 = sshll.u32 %s4245_s18, 4  ;;  %s4060_s6 = scalar_lea.vmem %s461_s16, 1024  ;;  %s496_s17 = int_to_ptr.vmem [resolvable:$true] %s495_s17 }
  0x57   : > { %p4061_p5 = scmp.ne.s32.totalorder %s461_s16, %s4060_s6  ;;  %p4068_p11 = scmp.lt.s32.totalorder %s461_s16, %s461_s16 }
  0x58   : > { %p4069_p10 = scmp.lt.s32.totalorder %s4060_s6, %s4060_s6 }
  0x59   : > { %p4063_p8 = pnand %p4061_p5, %p4385_p7 }
  0x5a   : > { %3673 = dma.hbm_to_vmem [thread:$0]  (!%p4375_p6), %s4866_s3, 1024, %s435_s4, [#allocation8], %s4240_s20, %s4240_s20, %s4241_s25  }
  0x5b   : > { %p4064_p9 = pneg %p4063_p8  ;;  %p4070_p12 = por %p4069_p10, %p4068_p11 }
  0x5d   : > { %p4071_p0 = pnand %p4070_p12, %p4064_p9 }
  0x5f   : > { %4074 = shalt.err (!%p4071_p0)
}
  0x60   : > { %s4867_s5 = sld [smem:[#allocation32_spill]]  ;;  %s4086_s26 = scalar_lea.vmem %s496_s17, 4096 }
  0x61   : > { %p4087_p13 = scmp.ne.s32.totalorder %s496_s17, %s4086_s26  ;;  %p4094_p8 = scmp.lt.s32.totalorder %s496_s17, %s496_s17 }
  0x62   : > { %p4095_p11 = scmp.lt.s32.totalorder %s4086_s26, %s4086_s26 }
  0x63   : > { %p4089_p2 = pnand %p4087_p13, %p4385_p7 }
  0x64   : > { %p4096_p9 = por %p4095_p11, %p4094_p8 }
  0x65   : > { %p4090_p5 = pneg %p4089_p2 }
  0x66   : > { %3679 = dma.hbm_to_vmem [thread:$0]  (!%p4375_p6), %s4867_s5, 1024, %s461_s16, [#allocation11], %s4240_s20, %s4240_s20, %s4241_s25  }
  0x67   : > { %p4097_p10 = pnand %p4096_p9, %p4090_p5 }
  0x69   : > { %4100 = shalt.err (!%p4097_p10)
}
  0x6a   : > { %s4868_s10 = sld [smem:[#allocation34_spill]]  ;;  %s4246_s29 = smov [#allocation18]  }
  0x6b   : > { %s527_s16 = sshll.u32 %s4246_s29, 4  ;;  %s528_s16 = int_to_ptr.vmem [resolvable:$true] %s527_s16 }
  0x6c   : > { %s4112_s18 = scalar_lea.vmem %s528_s16, 4096  ;;  %p4120_p2 = scmp.lt.s32.totalorder %s528_s16, %s528_s16 }
  0x6d   : > { %p4113_p12 = scmp.ne.s32.totalorder %s528_s16, %s4112_s18  ;;  %p4121_p5 = scmp.lt.s32.totalorder %s4112_s18, %s4112_s18 }
  0x6f   : > { %p4115_p0 = pnand %p4113_p12, %p4385_p7  ;;  %p4122_p8 = por %p4121_p5, %p4120_p2 }
  0x70   : > { %3685 = dma.hbm_to_vmem [thread:$0]  (!%p4375_p6), %s4868_s10, 4096, %s496_s17, [#allocation14], %s4240_s20, %s4240_s20, %s4241_s25  }
  0x71   : > { %p4116_p13 = pneg %p4115_p0 }
  0x73   : > { %p4123_p11 = pnand %p4122_p8, %p4116_p13 }
  0x75   : > { %4126 = shalt.err (!%p4123_p11)
}
  0x76   : > { %s4869_s14 = sld [smem:[#allocation36_spill]]  ;;  %s3201_s0 = sadd.s32 4294967294, %s4235_s24  }
  0x77   : > { %s4478_s19 = sadd.s32 1, %s4235_s24   ;;  %s43_s26 = sadd.s32 1, %s4231_s23 }
  0x78   : > { %s40_s2 = ssub.s32 %s4235_s24, %s4478_s19  ;;  %p50_p9 = scmp.ne.s32.totalorder %s4231_s23, %s4227_s22 }
  0x79   : > { %p41_p7 = scmp.eq.s32.totalorder %s40_s2, 0  ;;  %p51_p10 = scmp.eq.s32.totalorder %s4235_s24, 0 }
  0x7a   : > { %p56_p12 = scmp.ne.s32.totalorder %s4227_s22, %s4223_s21  ;;  %p395_p13 = scmp.eq.s32.totalorder %s4361_s27, 1 }
  0x7b   : > { %s4489_s6 = scalar_select %p41_p7, %s4231_s23, %s43_s26  }
  0x7c   : > { %3691 = dma.hbm_to_vmem [thread:$0]  (!%p4375_p6), %s4869_s14, 4096, %s528_s16, [#allocation17], %s4240_s20, %s4240_s20, %s4241_s25  }
  0x7d   : > { %4870 = sst [smem:[#allocation27_spill]] %s4489_s6  ;;  %p4491_p0 = por %p51_p10, %p50_p9 }
  0x7e   : > { %p4497_p6 = por %p4843_p1, %p56_p12  ;;  %p401_p2 = scmp.eq.s32.totalorder %s3201_s0, 1 }
  0x7f   : > { %p3708_p5 = scmp.lt.s32.totalorder %s4235_s24, 2  ;;  %s544_s25 = sand.u32 1, %s4231_s23  }
  0x80   : > { %s4872_s20 = scalar_select %p4497_p6, 1, 0 }
  0x81   : > { %p4504_p8 = por %p395_p13, %p50_p9  ;;  %p4508_p11 = por %p401_p2, %p56_p12 }
  0x82   : > { %s3212_s18 = sshll.u32 %s544_s25, 3  ;;  %s3213_s4 = sshll.u32 %s4235_s24, 7 }
  0x83   : > { %s4873_s29 = scalar_select %p4504_p8, 1, 0 }
  0x84   : > { %s4874_s16 = scalar_select %p4508_p11, 1, 0 }
  0x85   : > { %s4875_s26 = sld [smem:[#allocation28_spill]]  ;;  %s548_s0 = scalar_lea.vmem [#allocation4], %s3212_s18 }
  0x86   : > { %s555_s5 = sshll.u32 %s548_s0, 4  ;;  %p4520_p7 = pnand %p3708_p5, %p4491_p0  ;;  %s556_s5 = int_to_ptr.vmem [resolvable:$true] %s555_s5 }
  0x87   : > { %s545_s11 = scalar_lea.sflag [#allocation5], %s544_s25 }
  0x88   : > { %p4129_p10 = pneg %p4520_p7 }
  0x8b   : > { %s4516_s3 = scalar_lea.hbm %s4875_s26, %s3213_s4  ;;  %s4132_s2 = scalar_lea.hbm %s4875_s26, 256 }
  0x8c   : > { %s4127_s14 = scalar_lea.hbm %s4516_s3, 128  ;;  %p4133_p2 = scmp.lt.s32.totalorder %s4516_s3, %s4875_s26 }
  0x8d   : > { %p4128_p9 = scmp.ne.s32.totalorder %s4516_s3, %s4127_s14  ;;  %p4134_p0 = scmp.lt.s32.totalorder %s4132_s2, %s4127_s14 }
  0x8f   : > { %p4130_p12 = pnand %p4129_p10, %p4128_p9  ;;  %p4135_p5 = por %p4134_p0, %p4133_p2 }
  0x91   : > { %p4131_p13 = pneg %p4130_p12 }
  0x93   : > { %p4136_p4 = pnand %p4135_p5, %p4131_p13 }
  0x95   : > { %4139 = shalt.err (!%p4136_p4)
}
  0x96   : > { %s4140_s30 = scalar_lea.vmem %s556_s5, 128  ;;  %s4247_s25 = smov [#allocation4]  }
  0x97   : > { %p4141_p1 = scmp.ne.s32.totalorder %s556_s5, %s4140_s30  ;;  %s4145_s6 = sshll.u32 %s4247_s25, 4  ;;  %s4146_s6 = int_to_ptr.vmem [resolvable:$false] %s4145_s6 }
  0x98   : > { %s4147_s23 = scalar_lea.vmem %s4146_s6, 256  ;;  %p4148_p9 = scmp.lt.s32.totalorder %s556_s5, %s4146_s6 }
  0x99   : > { %p4143_p11 = pnand %p4141_p1, %p4129_p10  ;;  %p4149_p12 = scmp.lt.s32.totalorder %s4147_s23, %s4140_s30 }
  0x9b   : > { %p4144_p8 = pneg %p4143_p11  ;;  %p4150_p6 = por %p4149_p12, %p4148_p9 }
  0x9d   : > { %p4151_p3 = pnand %p4150_p6, %p4144_p8 }
  0x9f   : > { %4154 = shalt.err (!%p4151_p3)
}
  0xa0   : > { %3695 = dma.hbm_to_vmem [thread:$0]  (!%p4520_p7), %s4516_s3, 128, %s556_s5, %s545_s11  }
  0xa1   : > { %p4877_p13 = scmp.ne.s32.totalorder %s4859_s28, 0 }
  0xa2   : > { %s4541_s14 = sand.u32 (!%p4877_p13), 1, %s4227_s22   ;;  %p4878_p1 = scmp.ne.s32.totalorder (!%p4877_p13), %s4872_s20, 0 }
  0xa3   : > { %564 = sbr.rel (%p4877_p13) target bundleno = 2559 (0x9ff), region = 84  ;;  %s3215_s4 = sshll.u32 (!%p4877_p13), %s4541_s14, 3 }
  0xa4   : > { %s567_s17 = scalar_lea.sflag (!%p4877_p13), [#allocation5], %s4541_s14  ;;  %s4545_s6 = scalar_lea.vmem (!%p4877_p13), [#allocation4], %s3215_s4 }
  0xa8   : > { %4198 = dma.done.wait (%p4878_p1), %s567_s17, 128  }
  0xa9   : > { %4200 = vsyncadd (%p4878_p1), %s567_s17, 4294967168  ;;  %p4879_p3 = scmp.eq.s32.totalorder %s4361_s27, 0 }
  0xab   : > { %4202 = dma.done.wait (%p4879_p3), [#allocation8], 1040   ;;  %p4880_p4 = pmov %p4879_p3 }
  0xac   : > { %p4881_p6 = pmov %p4879_p3 }
  0xad   : > { %4204 = vsyncadd (%p4880_p4), [#allocation8], 4294966256 }
  0xae   : > { %4206 = dma.done.wait (%p4881_p6), [#allocation11], 2048   ;;  %p4882_p8 = pmov %p4879_p3 }
  0xaf   : > { %p4883_p11 = pmov %p4879_p3 }
  0xb0   : > { %4208 = vsyncadd (%p4882_p8), [#allocation11], 4294965248 }
  0xb1   : > { %4210 = dma.done.wait (%p4883_p11), [#allocation14], 5120   ;;  %p4884_p7 = pmov %p4879_p3 }
  0xb2   : > { %p4885_p10 = pmov %p4879_p3 }
  0xb3   : > { %4212 = vsyncadd (%p4884_p7), [#allocation14], 4294962176 }
  0xb4   : > { %4214 = dma.done.wait (%p4885_p10), [#allocation17], 8192   ;;  %p4886_p2 = pmov %p4879_p3 }
  0xb5   : > { %v652_v0 = vld [vmem:[%s4545_s6] sm:$0xff]  ;;  %v4248_v4 = vmov 0.0   ;;  %v3772_v12 = vld [vmem:[#allocation9 + $0x20] sm:$0xff]   ;;  %vm4249_vm0 = vmmov 0   ;;  %v3225_v26 = vld [vmem:[%s4825_s1] ss:$0 sm:$0xff]  ;;  %v1001_v57 = vlaneseq }
  0xb6   : > { %4216 = vsyncadd (%p4886_p2), [#allocation17], 4294959104  ;;  %655 = vadd.xlane.f32.xlu0 %v652_v0  ;;  %v3766_v1 = vld [vmem:[#allocation9 + $0x38] sm:$0xff]   ;;  %v3768_v3 = vld [vmem:[#allocation9 + $0x30] sm:$0xff]   ;;  %3527 = vmatprep.subr.bf16.mxu0 %v4248_v4  ;;  %s4250_s10 = smov 64   ;;  %vm1274_vm1 = vcmask 519168  }
  0xb7   : > { %v3767_v2 = vld [vmem:[#allocation10 + $0x38] sm:$0xff]   ;;  %3547 = vmatprep.subr.bf16.mxu1 %v4248_v4  ;;  %v3769_v5 = vld [vmem:[#allocation10 + $0x30] sm:$0xff]   ;;  %3528 = vmatpush3.bf16.msra.mxu0 %v3766_v1  ;;  %v3770_v10 = vld [vmem:[#allocation9 + $0x28] sm:$0xff]   ;;  %v4251_v55 = vmov 1983009808   ;;  %v4613_v59 = vshrl.u32 %v1001_v57, 7 }
  0xb8   : > { %3548 = vmatpush3.bf16.msra.mxu1 %v3767_v2  ;;  %3529 = vmatprep.subr.bf16.mxu0 %v4248_v4  ;;  %v3771_v11 = vld [vmem:[#allocation10 + $0x28] sm:$0xff]   ;;  %v3773_v13 = vld [vmem:[#allocation10 + $0x20] sm:$0xff]   ;;  %v3774_v14 = vld [vmem:[#allocation9 + $0x18] sm:$0xff]   ;;  %v999_v56 = vunpack.c.l.s4 %v4251_v55  ;;  %v4252_v60 = vmov 1934713408   ;;  %vm1424_vm2 = vcmask 523264  }
  0xb9   : > { %3549 = vmatprep.subr.bf16.mxu1 %v4248_v4  ;;  %3543 = vmatprep.mubr.msk.bf16.mxu0 %vm4249_vm0, %v4248_v4  ;;  %v3775_v15 = vld [vmem:[#allocation10 + $0x18] sm:$0xff]   ;;  %v3776_v16 = vld [vmem:[#allocation9 + $0x10] sm:$0xff]   ;;  %v3778_v18 = vld [vmem:[#allocation9 + $0x8] sm:$0xff]   ;;  %v1007_v61 = vunpack.c.l.s4 %v4252_v60  ;;  %vm1553_vm3 = vcmask 1043456   ;;  %vm1517_vm4 = vcmask 64512   ;;  %s3224_s3 = sshll.u32 %s4541_s14, 2 }
  0xba   : > { %3563 = vmatprep.mubr.msk.bf16.mxu1 %vm4249_vm0, %v4248_v4  ;;  %v3777_v17 = vld [vmem:[#allocation10 + $0x10] sm:$0xff]   ;;  %v3779_v19 = vld [vmem:[#allocation10 + $0x8] sm:$0xff]   ;;  %v3780_v20 = vld [vmem:[#allocation9] sm:$0xff]   ;;  %v1000_v58 = vunpack.c.0.s8 %v999_v56  ;;  %s3364_s5 = sshll.u32 %s4361_s27, 6  ;;  %s4887_s20 = sld [smem:[#allocation37_spill]] }
  0xbb   : > { %3530 = vmatpush3.bf16.msra.mxu0 %v3768_v3  ;;  %v3781_v21 = vld [vmem:[#allocation10] sm:$0xff]   ;;  %v3226_v28 = vld [vmem:[#allocation7] ss:$0 sm:$0xff]  ;;  %v3783_v33 = vld [vmem:[#allocation12 + $0x30] sm:$0xff]   ;;  %v1008_v63 = vunpack.c.0.s8 %v1007_v61  ;;  %v4253_v3 = vmov 0   ;;  %s3042_s18 = scalar_lea.sflag [#allocation6], %s4541_s14 }
  0xbc   : > { %3550 = vmatpush3.bf16.msra.mxu1 %v3769_v5  ;;  %3531 = vmatprep.subr.bf16.mxu0 %v4248_v4  ;;  %v3782_v31 = vld [vmem:[#allocation12 + $0x38] sm:$0xff]   ;;  %v3784_v34 = vld [vmem:[#allocation12 + $0x28] sm:$0xff]   ;;  %v3785_v35 = vld [vmem:[#allocation12 + $0x20] sm:$0xff]   ;;  %v4616_v62 = vsub.s32 %v1000_v58, %v4613_v59  ;;  %p4888_p5 = scmp.ne.s32.totalorder %s4873_s29, 0  ;;  %s4254_s30 = smov [#allocation19]  }
  0xbd   : > { %3551 = vmatprep.subr.bf16.mxu1 %v4248_v4  ;;  %v3786_v36 = vld [vmem:[#allocation12 + $0x18] sm:$0xff]   ;;  %v3787_v37 = vld [vmem:[#allocation12 + $0x10] sm:$0xff]   ;;  %v3788_v38 = vld [vmem:[#allocation12 + $0x8] sm:$0xff]   ;;  %v4621_v2 = vsub.s32 %v1008_v63, %v4613_v59  ;;  %s4159_s25 = sshll.u32 %s4254_s30, 4  ;;  %s4160_s25 = int_to_ptr.vmem [resolvable:$false] %s4159_s25 }
  0xbe   : > { %v3789_v39 = vld [vmem:[#allocation12] sm:$0xff]   ;;  %s4161_s27 = scalar_lea.vmem %s4160_s25, 128 }
  0xbf   : > { %3532 = vmatpush3.bf16.msra.mxu0 %v3770_v10 }
  0xc0   : > { %3552 = vmatpush3.bf16.msra.mxu1 %v3771_v11  ;;  %3533 = vmatprep.subr.bf16.mxu0 %v4248_v4  ;;  %s3053_s2 = scalar_lea.hbm %s4887_s20, %s3364_s5 }
  0xc1   : > { %3553 = vmatprep.subr.bf16.mxu1 %v4248_v4 }
  0xc3   : > { %3534 = vmatpush3.bf16.msra.mxu0 %v3772_v12 }
  0xc4   : > { %3554 = vmatpush3.bf16.msra.mxu1 %v3773_v13  ;;  %3535 = vmatprep.subr.bf16.mxu0 %v4248_v4 }
  0xc5   : > { %3555 = vmatprep.subr.bf16.mxu1 %v4248_v4 }
  0xc7   : > { %3536 = vmatpush3.bf16.msra.mxu0 %v3774_v14 }
  0xc8   : > { %3556 = vmatpush3.bf16.msra.mxu1 %v3775_v15  ;;  %3537 = vmatprep.subr.bf16.mxu0 %v4248_v4 }
  0xc9   : > { %3557 = vmatprep.subr.bf16.mxu1 %v4248_v4 }
  0xcb   : > { %3538 = vmatpush3.bf16.msra.mxu0 %v3776_v16 }
  0xcc   : > { %3558 = vmatpush3.bf16.msra.mxu1 %v3777_v17  ;;  %3539 = vmatprep.subr.bf16.mxu0 %v4248_v4 }
  0xcd   : > { %3559 = vmatprep.subr.bf16.mxu1 %v4248_v4 }
  0xcf   : > { %3540 = vmatpush3.bf16.msra.mxu0 %v3778_v18 }
  0xd0   : > { %3560 = vmatpush3.bf16.msra.mxu1 %v3779_v19  ;;  %3541 = vmatprep.subr.bf16.mxu0 %v4248_v4 }
  0xd1   : > { %3561 = vmatprep.subr.bf16.mxu1 %v4248_v4 }
  0xd3   : > { %3542 = vmatpush3.bf16.msra.mxu0 %v3780_v20 }
  0xd4   : > { %3562 = vmatpush3.bf16.msra.mxu1 %v3781_v21  ;;  %3567 = vmatprep.subr.bf16.mxu0 %v4248_v4 }
  0xd5   : > { %3587 = vmatprep.subr.bf16.mxu1 %v4248_v4 }
 0x13f   : > { %v656_v6 = vpop.xlane.xlu0 %655 }
 0x140   : > { %v658_v7 = vmul.f32 0.0078125, %v656_v6 }
 0x142   : > { %v659_v8 = vsub.f32 %v652_v0, %v658_v7 }
 0x144   : > { %v660_v9 = vmul.f32 %v659_v8, %v659_v8 }
 0x146   : > { %661 = vadd.xlane.f32.xlu0 %v660_v9 }
 0x1cf   : > { %v662_v22 = vpop.xlane.xlu0 %661 }
 0x1d0   : > { %v663_v23 = vmul.f32 0.0078125, %v662_v22 }
 0x1d2   : > { %v664_v24 = vadd.f32 1e-05, %v663_v23 }
 0x1d4   : > { %3894 = vrsqrt.f32 %v664_v24 }
 0x1e1   : > { %v3895_v25 = vpop.eup %3894 }
 0x1e2   : > { %v666_v27 = vmul.f32 %v3895_v25, %v659_v8 }
 0x1e4   : > { %v673_v29 = vmul.f32 %v3225_v26, %v666_v27 }
 0x1e6   : > { %v680_v30 = vadd.f32 %v3226_v28, %v673_v29 }
 0x1e8   : > { %v681_v32 = vpack.c.bf16 %v680_v30, %v680_v30 }
 0x1ea   : > { %3544 = vmatmul.mubr.bf16.vlgmr.msra.gmra.mxu0 %v681_v32  ;;  %3564 = vmatmul.mubr.bf16.vlgmr.msra.gmra.mxu1 %v681_v32 }
 0x1eb   : > { %3568 = vmatpush3.bf16.msra.mxu0 %v3782_v31  ;;  %3583 = vmatprep.mubr.msk.bf16.mxu0 %vm4249_vm0, %v4248_v4 }
 0x1ec   : > { %3569 = vmatprep.subr.bf16.mxu0 %v4248_v4  ;;  %3589 = vmatprep.mubr.msk.bf16.mxu1 %vm4249_vm0, %v4248_v4 }
 0x1ef   : > { %3570 = vmatpush3.bf16.msra.mxu0 %v3783_v33 }
 0x1f0   : > { %3571 = vmatprep.subr.bf16.mxu0 %v4248_v4 }
 0x1f3   : > { %3572 = vmatpush3.bf16.msra.mxu0 %v3784_v34 }
 0x1f4   : > { %3573 = vmatprep.subr.bf16.mxu0 %v4248_v4 }
 0x1f7   : > { %3574 = vmatpush3.bf16.msra.mxu0 %v3785_v35 }
 0x1f8   : > { %3575 = vmatprep.subr.bf16.mxu0 %v4248_v4 }
 0x1fb   : > { %3576 = vmatpush3.bf16.msra.mxu0 %v3786_v36 }
 0x1fc   : > { %3577 = vmatprep.subr.bf16.mxu0 %v4248_v4 }
 0x1ff   : > { %3578 = vmatpush3.bf16.msra.mxu0 %v3787_v37 }
 0x200   : > { %3579 = vmatprep.subr.bf16.mxu0 %v4248_v4 }
 0x203   : > { %3580 = vmatpush3.bf16.msra.mxu0 %v3788_v38 }
 0x204   : > { %3581 = vmatprep.subr.bf16.mxu0 %v4248_v4 }
 0x207   : > { %3582 = vmatpush3.bf16.msra.mxu0 %v3789_v39 }
 0x208   : > { %3611 = vmatprep.subr.bf16.mxu0 %v4248_v4 }
 0x20a   : > { %3584 = vmatmul.mubr.bf16.vlgmr.msra.gmra.mxu0 %v681_v32 }
 0x20b   : > { %3627 = vmatprep.mubr.msk.bf16.mxu0 %vm4249_vm0, %v4248_v4 }
 0x2aa   : > { %v780_v40 = vpop.f32.mrf.mxu0  ;;  %v884_v41 = vpop.f32.mrf.mxu1 }
 0x2ab   : > { %v1133_v42 = vpack.c.bf16 %v884_v41, %v884_v41  ;;  %v994_v47 = vpack.c.bf16 %v780_v40, %v780_v40 }
 0x2ac   : > { %v3545_v43 = vpop.f32.mrf.mxu0  ;;  %v3565_v44 = vpop.f32.mrf.mxu1 }
 0x2ad   : > { %1135 = vrot.lane.b32.xlu1 %v1133_v42, %s4250_s10  ;;  %v1143_v0 = vrot.slane %v1133_v42, %v4616_v62  ;;  %v1004_v1 = vrot.slane %v994_v47, %v4616_v62 }
 0x2ae   : > { %v783_v45 = vpop.f32.mrf.mxu0  ;;  %v887_v46 = vpop.f32.mrf.mxu1 }
 0x2af   : > { %v1144_v5 = vcombine.high %v1143_v0, %v4253_v3  ;;  %v1005_v6 = vcombine.high %v1004_v1, %v4253_v3  ;;  %v1151_v7 = vrot.slane %v1143_v0, %v4621_v2  ;;  %v4636_v16 = vrot.slane %v1004_v1, %v4621_v2 }
 0x2b0   : > { %v3546_v48 = vpop.f32.mrf.mxu0  ;;  %v3566_v49 = vpop.f32.mrf.mxu1 }
 0x2b1   : > { %996 = vrot.lane.b32.xlu1 %v994_v47, %s4250_s10  ;;  %v1158_v8 = vrot.slane %v1144_v5, %v4621_v2  ;;  %v4629_v11 = vrot.slane %v1005_v6, %v4621_v2  ;;  %v1159_v12 = vcombine.high %v1151_v7, %v4253_v3  ;;  %v1190_v18 = vshrl.u32 %v1151_v7, 16 }
 0x2b2   : > { %v1020_v45 = vcombine.high %v4636_v16, %v4253_v3  ;;  %v1051_v6 = vshrl.u32 %v4636_v16, 16 }
 0x2b3   : > { %v1160_v13 = vcombine.high %v1158_v8, %v4253_v3  ;;  %v1021_v22 = vcombine.high %v4629_v11, %v4253_v3  ;;  %v1198_v23 = vshrl.u32 %v1159_v12, 16  ;;  %v1206_v24 = vshrl.u32 %v1158_v8, 16 }
 0x2b4   : > { %v1059_v60 = vshrl.u32 %v1020_v45, 16  ;;  %v1067_v63 = vshrl.u32 %v4629_v11, 16 }
 0x2b5   : > { %v1214_v26 = vshrl.u32 %v1160_v13, 16 }
 0x2ca   : > { %v988_v50 = vpop.f32.mrf.mxu0 }
 0x2cb   : > { %v4609_v51 = vpack.c.bf16 %v988_v50, %v988_v50 }
 0x2cc   : > { %v3585_v52 = vpop.f32.mrf.mxu0 }
 0x2cd   : > { %1279 = vrot.lane.b32.xlu0 %v4609_v51, %s4250_s10  ;;  %v1075_v52 = vshrl.u32 %v1021_v22, 16 }
 0x2ce   : > { %v991_v53 = vpop.f32.mrf.mxu0 }
 0x2d0   : > { %v3586_v54 = vpop.f32.mrf.mxu0 }
 0x31f   : > { %v1136_v9 = vpop.permute.xlu1 %1135 }
 0x320   : > { %v1168_v10 = vrot.slane %v1136_v9, %v4616_v62 }
 0x322   : > { %v1169_v14 = vcombine.high %v1168_v10, %v4253_v3  ;;  %v1176_v15 = vrot.slane %v1168_v10, %v4621_v2 }
 0x323   : > { %v997_v17 = vpop.permute.xlu1 %996 }
 0x324   : > { %v1183_v19 = vrot.slane %v1169_v14, %v4621_v2  ;;  %v1184_v20 = vcombine.high %v1176_v15, %v4253_v3  ;;  %v1191_v21 = vshrl.u32 %v1176_v15, 16  ;;  %v1029_v25 = vrot.slane %v997_v17, %v4616_v62 }
 0x325   : > { %v1188_v28 = vpack.i.b16 %v1176_v15, %v1151_v7 }
 0x326   : > { %v1185_v27 = vcombine.high %v1183_v19, %v4253_v3  ;;  %v1199_v29 = vshrl.u32 %v1184_v20, 16  ;;  %v1204_v30 = vpack.i.b16 %v1183_v19, %v1158_v8  ;;  %v1207_v31 = vshrl.u32 %v1183_v19, 16 }
 0x327   : > { %v1030_v32 = vcombine.high %v1029_v25, %v4253_v3  ;;  %v1037_v33 = vrot.slane %v1029_v25, %v4621_v2  ;;  %v1192_v34 = vpack.i.b16 %v1191_v21, %v1190_v18  ;;  %v1196_v35 = vpack.i.b16 %v1184_v20, %v1159_v12 }
 0x328   : > { %v1212_v36 = vpack.i.b16 %v1185_v27, %v1160_v13  ;;  %v1215_v37 = vshrl.u32 %v1185_v27, 16  ;;  %v1208_v38 = vpack.i.b16 %v1207_v31, %v1206_v24  ;;  %v1218_v39 = vcombine.low %v1188_v28, %v1204_v30 }
 0x329   : > { %v1044_v40 = vrot.slane %v1030_v32, %v4621_v2  ;;  %v1045_v41 = vcombine.high %v1037_v33, %v4253_v3  ;;  %v1200_v42 = vpack.i.b16 %v1199_v29, %v1198_v23  ;;  %v1052_v61 = vshrl.u32 %v1037_v33, 16 }
 0x32a   : > { %v1216_v43 = vpack.i.b16 %v1215_v37, %v1214_v26  ;;  %v1226_v44 = vcombine.low %v1196_v35, %v1212_v36  ;;  %v1242_v46 = vcombine.low %v1192_v34, %v1208_v38  ;;  %v1225_v48 = vrot.slane %v1218_v39, %v4616_v62 }
 0x32b   : > { %v1046_v47 = vcombine.high %v1044_v40, %v4253_v3  ;;  %v1060_v54 = vshrl.u32 %v1045_v41, 16  ;;  %v1068_v57 = vshrl.u32 %v1044_v40, 16  ;;  %v1053_v12 = vpack.i.b16 %v1052_v61, %v1051_v6 }
 0x32c   : > { %v1233_v49 = vrot.slane %v1226_v44, %v4616_v62  ;;  %v1250_v50 = vcombine.low %v1200_v42, %v1216_v43  ;;  %v1249_v53 = vrot.slane %v1242_v46, %v4616_v62  ;;  %v1057_v13 = vpack.i.b16 %v1045_v41, %v1020_v45 }
 0x32d   : > { %v1076_v58 = vshrl.u32 %v1046_v47, 16  ;;  %v1061_v8 = vpack.i.b16 %v1060_v54, %v1059_v60  ;;  %v1069_v9 = vpack.i.b16 %v1068_v57, %v1067_v63  ;;  %v1073_v10 = vpack.i.b16 %v1046_v47, %v1021_v22 }
 0x32e   : > { %v1234_v55 = vcombine.low %v1225_v48, %v1233_v49  ;;  %v1257_v56 = vrot.slane %v1250_v50, %v4616_v62  ;;  %v1065_v14 = vpack.i.b16 %v1044_v40, %v4629_v11  ;;  %v1049_v21 = vpack.i.b16 %v1037_v33, %v4636_v16 }
 0x32f   : > { %v1077_v5 = vpack.i.b16 %v1076_v58, %v1075_v52  ;;  %v1087_v23 = vcombine.low %v1057_v13, %v1073_v10  ;;  %v1103_v24 = vcombine.low %v1053_v12, %v1069_v9  ;;  %v1287_v25 = vrot.slane %v4609_v51, %v4616_v62 }
 0x330   : > { %v1241_v0 = vrot.slane %v1234_v55, %v4621_v2  ;;  %v1258_v1 = vcombine.low %v1249_v53, %v1257_v56  ;;  %v1079_v22 = vcombine.low %v1049_v21, %v1065_v14 }
 0x331   : > { %v1111_v19 = vcombine.low %v1061_v8, %v1077_v5  ;;  %v1094_v11 = vrot.slane %v1087_v23, %v4616_v62  ;;  %v1110_v27 = vrot.slane %v1103_v24, %v4616_v62  ;;  %v1288_v28 = vcombine.high %v1287_v25, %v4253_v3 }
 0x332   : > { %v1265_v7 = vrot.slane %v1258_v1, %v4621_v2  ;;  %v1270_v17 = vshrl.u32 %v1241_v0, 16  ;;  %v1086_v29 = vrot.slane %v1079_v22, %v4616_v62  ;;  %v1295_v30 = vrot.slane %v1287_v25, %v4621_v2 }
 0x333   : > { %v1118_v26 = vrot.slane %v1111_v19, %v4616_v62  ;;  %v1302_v33 = vrot.slane %v1288_v28, %v4621_v2 }
 0x334   : > { %v1268_v15 = vpack.i.b16 %v1265_v7, %v1241_v0  ;;  %v1271_v18 = vshrl.u32 %v1265_v7, 16  ;;  %v1095_v32 = vcombine.low %v1086_v29, %v1094_v11  ;;  %v1303_v37 = vcombine.high %v1295_v30, %v4253_v3 }
 0x335   : > { %v1119_v16 = vcombine.low %v1110_v27, %v1118_v26  ;;  %v1304_v41 = vcombine.high %v1302_v33, %v4253_v3  ;;  %v1334_v46 = vshrl.u32 %v1295_v30, 16  ;;  %v1350_v49 = vshrl.u32 %v1302_v33, 16 }
 0x336   : > { %v1272_v20 = vpack.i.b16 %v1271_v18, %v1270_v17  ;;  %1275 = vst.msk [vmem:[#allocation2] sm:$0xf] %vm1274_vm1, %v1268_v15  ;;  %v1102_v40 = vrot.slane %v1095_v32, %v4621_v2  ;;  %v1342_v47 = vshrl.u32 %v1303_v37, 16 }
 0x337   : > { %v1126_v36 = vrot.slane %v1119_v16, %v4621_v2  ;;  %v1358_v54 = vshrl.u32 %v1304_v41, 16 }
 0x338   : > { %1276 = vst.msk [vmem:[#allocation2 + $0x4] sm:$0xf] %vm1274_vm1, %v1272_v20  ;;  %v1130_v9 = vshrl.u32 %v1102_v40, 16 }
 0x339   : > { %v1129_v45 = vpack.i.b16 %v1126_v36, %v1102_v40  ;;  %v1131_v63 = vshrl.u32 %v1126_v36, 16 }
 0x33b   : > { %v1132_v15 = vpack.i.b16 %v1131_v63, %v1130_v9 }
 0x33d   : > { %v1420_v31 = vld [vmem:[#allocation2] sm:$0xf] }
 0x33e   : > { %v1429_v51 = vsel %vm1424_vm2, %v1420_v31, 0 }
 0x33f   : > { %v1280_v34 = vpop.permute.xlu0 %1279  ;;  %3588 = vmatpush3.bf16.xpose.msra.mxu1 %v1429_v51  ;;  %v1421_v42 = vld [vmem:[#allocation2 + $0x4] sm:$0xf] }
 0x340   : > { %v1312_v35 = vrot.slane %v1280_v34, %v4616_v62  ;;  %3593 = vmatprep.subr.bf16.mxu1 %v4248_v4  ;;  %v1475_v53 = vsel %vm1424_vm2, %v1421_v42, 0 }
 0x342   : > { %v1313_v38 = vcombine.high %v1312_v35, %v4253_v3  ;;  %v1320_v39 = vrot.slane %v1312_v35, %v4621_v2 }
 0x344   : > { %v1327_v43 = vrot.slane %v1313_v38, %v4621_v2  ;;  %v1328_v44 = vcombine.high %v1320_v39, %v4253_v3  ;;  %v1335_v48 = vshrl.u32 %v1320_v39, 16  ;;  %v1332_v55 = vpack.i.b16 %v1320_v39, %v1295_v30 }
 0x346   : > { %v1329_v50 = vcombine.high %v1327_v43, %v4253_v3  ;;  %v1343_v52 = vshrl.u32 %v1328_v44, 16  ;;  %3590 = vmatmul.mubr.msk.bf16.vlgmr.msra.gmra.mxu1 %vm1424_vm2, %v1129_v45  ;;  %v1348_v56 = vpack.i.b16 %v1327_v43, %v1302_v33  ;;  %v1351_v57 = vshrl.u32 %v1327_v43, 16 }
 0x347   : > { %3594 = vmatpush3.bf16.xpose.msra.mxu1 %v1475_v53  ;;  %3595 = vmatprep.mubr.msk.bf16.mxu1 %vm4249_vm0, %v4248_v4  ;;  %v1340_v58 = vpack.i.b16 %v1328_v44, %v1303_v37  ;;  %v1336_v0 = vpack.i.b16 %v1335_v48, %v1334_v46  ;;  %v3790_v53 = vld [vmem:[#allocation13 + $0x38] sm:$0xff]  }
 0x348   : > { %v1356_v60 = vpack.i.b16 %v1329_v50, %v1304_v41  ;;  %v1359_v61 = vshrl.u32 %v1329_v50, 16  ;;  %3599 = vmatprep.subr.bf16.mxu1 %v4248_v4  ;;  %v1352_v1 = vpack.i.b16 %v1351_v57, %v1350_v49  ;;  %v1362_v5 = vcombine.low %v1332_v55, %v1348_v56  ;;  %3612 = vmatpush3.bf16.msra.mxu0 %v3790_v53  ;;  %v3792_v55 = vld [vmem:[#allocation13 + $0x28] sm:$0xff]   ;;  %v3793_v56 = vld [vmem:[#allocation13 + $0x20] sm:$0xff]   ;;  %v3794_v57 = vld [vmem:[#allocation13 + $0x18] sm:$0xff]  }
 0x349   : > { %v1344_v6 = vpack.i.b16 %v1343_v52, %v1342_v47  ;;  %3613 = vmatprep.subr.bf16.mxu0 %v4248_v4 }
 0x34a   : > { %v1360_v7 = vpack.i.b16 %v1359_v61, %v1358_v54  ;;  %v1370_v8 = vcombine.low %v1340_v58, %v1356_v60  ;;  %v1386_v10 = vcombine.low %v1336_v0, %v1352_v1  ;;  %v1369_v12 = vrot.slane %v1362_v5, %v4616_v62  ;;  %v3791_v54 = vld [vmem:[#allocation13 + $0x30] sm:$0xff]   ;;  %v3796_v60 = vld [vmem:[#allocation13 + $0x8] sm:$0xff]   ;;  %v3797_v61 = vld [vmem:[#allocation13] sm:$0xff]  }
 0x34b   : > { %v3795_v58 = vld [vmem:[#allocation13 + $0x10] sm:$0xff]  }
 0x34c   : > { %v1377_v13 = vrot.slane %v1370_v8, %v4616_v62  ;;  %v1394_v14 = vcombine.low %v1344_v6, %v1360_v7  ;;  %v1393_v18 = vrot.slane %v1386_v10, %v4616_v62  ;;  %3614 = vmatpush3.bf16.msra.mxu0 %v3791_v54 }
 0x34d   : > { %3615 = vmatprep.subr.bf16.mxu0 %v4248_v4 }
 0x34e   : > { %v1378_v17 = vcombine.low %v1369_v12, %v1377_v13  ;;  %v1401_v19 = vrot.slane %v1394_v14, %v4616_v62  ;;  %3596 = vmatmul.mubr.msk.bf16.vlgmr.msra.gmra.mxu1 %vm1424_vm2, %v1132_v15 }
 0x34f   : > { %3601 = vmatprep.mubr.msk.bf16.mxu1 %vm4249_vm0, %v4248_v4 }
 0x350   : > { %v1385_v20 = vrot.slane %v1378_v17, %v4621_v2  ;;  %v1402_v21 = vcombine.low %v1393_v18, %v1401_v19  ;;  %3616 = vmatpush3.bf16.msra.mxu0 %v3792_v55 }
 0x351   : > { %3617 = vmatprep.subr.bf16.mxu0 %v4248_v4 }
 0x352   : > { %v1409_v23 = vrot.slane %v1402_v21, %v4621_v2  ;;  %v1414_v25 = vshrl.u32 %v1385_v20, 16 }
 0x354   : > { %v1412_v24 = vpack.i.b16 %v1409_v23, %v1385_v20  ;;  %v1415_v22 = vshrl.u32 %v1409_v23, 16  ;;  %3618 = vmatpush3.bf16.msra.mxu0 %v3793_v56 }
 0x355   : > { %3619 = vmatprep.subr.bf16.mxu0 %v4248_v4 }
 0x356   : > { %v1416_v26 = vpack.i.b16 %v1415_v22, %v1414_v25  ;;  %1418 = vst.msk [vmem:[#allocation3] sm:$0xf] %vm1274_vm1, %v1412_v24 }
 0x358   : > { %1419 = vst.msk [vmem:[#allocation3 + $0x4] sm:$0xf] %vm1274_vm1, %v1416_v26  ;;  %3620 = vmatpush3.bf16.msra.mxu0 %v3794_v57 }
 0x359   : > { %3621 = vmatprep.subr.bf16.mxu0 %v4248_v4 }
 0x35c   : > { %3622 = vmatpush3.bf16.msra.mxu0 %v3795_v58 }
 0x35d   : > { %v1422_v11 = vld [vmem:[#allocation3] sm:$0xf]  ;;  %3623 = vmatprep.subr.bf16.mxu0 %v4248_v4 }
 0x35e   : > { %v1555_v27 = vsel %vm1553_vm3, %v1422_v11, 0 }
 0x35f   : > { %3600 = vmatpush3.bf16.msra.mxu1 %v1555_v27  ;;  %v1423_v45 = vld [vmem:[#allocation3 + $0x4] sm:$0xf] }
 0x360   : > { %3605 = vmatprep.subr.bf16.mxu1 %v4248_v4  ;;  %v1601_v48 = vsel %vm1553_vm3, %v1423_v45, 0  ;;  %3624 = vmatpush3.bf16.msra.mxu0 %v3796_v60 }
 0x361   : > { %3625 = vmatprep.subr.bf16.mxu0 %v4248_v4 }
 0x364   : > { %3626 = vmatpush3.bf16.msra.mxu0 %v3797_v61 }
 0x406   : > { %v1465_v28 = vpop.f32.mrf.mxu1 }
 0x407   : > { %v1518_v29 = vsel %vm1517_vm4, %v1465_v28, -inf }
 0x408   : > { %1519 = vmax.xlane.f32.xlu1 %v1518_v29  ;;  %v3591_v16 = vpop.f32.mrf.mxu1 }
 0x40a   : > { %v1468_v30 = vpop.f32.mrf.mxu1 }
 0x40c   : > { %v3592_v31 = vpop.f32.mrf.mxu1 }
 0x40e   : > { %v1511_v32 = vpop.f32.mrf.mxu1 }
 0x40f   : > { %v1521_v51 = vsel %vm1517_vm4, %v1511_v32, -inf }
 0x410   : > { %v3597_v33 = vpop.f32.mrf.mxu1  ;;  %1522 = vmax.xlane.f32.xlu0 %v1521_v51 }
 0x412   : > { %v1514_v34 = vpop.f32.mrf.mxu1 }
 0x414   : > { %v3598_v35 = vpop.f32.mrf.mxu1 }
 0x491   : > { %v1520_v36 = vpop.xlane.xlu1 %1519 }
 0x492   : > { %v1524_v37 = vmax.f32 %v1520_v36, -3.4028235e+38 }
 0x494   : > { %v1532_v38 = vsub.f32 %v1465_v28, %v1524_v37  ;;  %v1526_v63 = vsub.f32 -3.4028235e+38, %v1524_v37 }
 0x496   : > { %v1534_v39 = vmul.f32 1.442695, %v1532_v38  ;;  %v1528_v0 = vmul.f32 1.442695, %v1526_v63 }
 0x498   : > { %3896 = vpow2.f32 %v1534_v39 }
 0x499   : > { %v1523_v40 = vpop.xlane.xlu0 %1522 }
 0x49a   : > { %v1525_v41 = vmax.f32 %v1523_v40, -3.4028235e+38 }
 0x49c   : > { %v1533_v42 = vsub.f32 %v1511_v32, %v1525_v41  ;;  %v1527_v1 = vsub.f32 -3.4028235e+38, %v1525_v41 }
 0x49e   : > { %v1536_v43 = vmul.f32 1.442695, %v1533_v42  ;;  %v1530_v5 = vmul.f32 1.442695, %v1527_v1 }
 0x4a0   : > { %3898 = vpow2.f32 %v1536_v43 }
 0x4a1   : > { %3900 = vpow2.f32 %v1528_v0 }
 0x4a2   : > { %3902 = vpow2.f32 %v1530_v5 }
 0x4a5   : > { %v3897_v44 = vpop.eup %3896 }
 0x4a6   : > { %v1540_v46 = vsel %vm1517_vm4, %v3897_v44, 0.0  ;;  %v1548_v47 = vpack.c.bf16 %v3897_v44, %v3897_v44 }
 0x4a7   : > { %1541 = vadd.xlane.f32.xlu1 %v1540_v46 }
 0x4a8   : > { %3602 = vmatmul.mubr.msk.bf16.vlgmr.msra.gmra.mxu1 %vm1517_vm4, %v1548_v47 }
 0x4a9   : > { %3606 = vmatpush3.bf16.msra.mxu1 %v1601_v48  ;;  %3607 = vmatprep.mubr.msk.bf16.mxu1 %vm4249_vm0, %v4248_v4 }
 0x4ad   : > { %v3899_v49 = vpop.eup %3898 }
 0x4ae   : > { %v1543_v50 = vsel %vm1517_vm4, %v3899_v49, 0.0  ;;  %v1549_v52 = vpack.c.bf16 %v3899_v49, %v3899_v49  ;;  %v3901_v6 = vpop.eup %3900 }
 0x4af   : > { %1544 = vadd.xlane.f32.xlu1 %v1543_v50  ;;  %v1538_v8 = vmul.f32 0.0, %v3901_v6  ;;  %v3903_v10 = vpop.eup %3902 }
 0x4b0   : > { %3608 = vmatmul.mubr.msk.bf16.vlgmr.msra.gmra.mxu1 %vm1517_vm4, %v1549_v52  ;;  %v1539_v13 = vmul.f32 0.0, %v3903_v10 }
 0x530   : > { %v1542_v7 = vpop.xlane.xlu1 %1541 }
 0x531   : > { %v1546_v9 = vadd.f32 %v1542_v7, %v1538_v8 }
 0x533   : > { %3904 = vrcp.f32 %v1546_v9 }
 0x538   : > { %v1545_v12 = vpop.xlane.xlu1 %1544 }
 0x539   : > { %v1547_v14 = vadd.f32 %v1545_v12, %v1539_v13 }
 0x53b   : > { %3906 = vrcp.f32 %v1547_v14 }
 0x540   : > { %v3905_v4 = vpop.eup %3904 }
 0x548   : > { %v3907_v26 = vpop.eup %3906 }
 0x568   : > { %v1591_v15 = vpop.f32.mrf.mxu1 }
 0x569   : > { %v1643_v17 = vadd.f32 %v1591_v15, %v1538_v8 }
 0x56a   : > { %v3603_v18 = vpop.f32.mrf.mxu1 }
 0x56b   : > { %v1647_v19 = vmul.f32 %v3905_v4, %v1643_v17 }
 0x56c   : > { %v1594_v20 = vpop.f32.mrf.mxu1 }
 0x56d   : > { %v1649_v21 = vpack.c.bf16 %v1647_v19, %v1647_v19  ;;  %v3918_v19 = vld [vmem:[%s4545_s6] sm:$0xff] }
 0x56e   : > { %v3604_v23 = vpop.f32.mrf.mxu1 }
 0x56f   : > { %v1656_v24 = vrot.slane %v1649_v21, %v4616_v62  ;;  %v3798_v23 = vld [vmem:[#allocation15 + $0x78] sm:$0xff]  }
 0x570   : > { %v1637_v25 = vpop.f32.mrf.mxu1  ;;  %3411 = vmatprep.subr.bf16.mxu1 %v3798_v23  ;;  %v3846_v23 = vld [vmem:[#allocation16 + $0x58] sm:$0xff]  }
 0x571   : > { %v1644_v22 = vadd.f32 %v1637_v25, %v1539_v13  ;;  %v1657_v11 = vcombine.high %v1656_v24, %v4253_v3  ;;  %v1664_v29 = vrot.slane %v1656_v24, %v4621_v2  ;;  %v3799_v24 = vld [vmem:[#allocation15 + $0xf8] sm:$0xff]  }
 0x572   : > { %v3609_v27 = vpop.f32.mrf.mxu1  ;;  %v3800_v25 = vld [vmem:[#allocation15 + $0x38] sm:$0xff]   ;;  %3429 = vmatprep.subr.bf16.mxu0 %v3799_v24 }
 0x573   : > { %v1648_v28 = vmul.f32 %v3907_v26, %v1644_v22  ;;  %v1671_v31 = vrot.slane %v1657_v11, %v4621_v2  ;;  %v1672_v33 = vcombine.high %v1664_v29, %v4253_v3  ;;  %v1703_v37 = vshrl.u32 %v1664_v29, 16  ;;  %v3801_v22 = vld [vmem:[#allocation15 + $0xb8] sm:$0xff]   ;;  %v3802_v26 = vld [vmem:[#allocation15 + $0x70] sm:$0xff]   ;;  %3412 = vmatpush3.bf16.xpose.msra.mxu1 %v3800_v25 }
 0x574   : > { %v1640_v16 = vpop.f32.mrf.mxu1  ;;  %v3803_v11 = vld [vmem:[#allocation15 + $0xf0] sm:$0xff]   ;;  %3413 = vmatprep.subr.bf16.mxu1 %v3802_v26  ;;  %v3847_v24 = vld [vmem:[#allocation16 + $0xd8] sm:$0xff]  }
 0x575   : > { %v1674_v30 = vpack.c.bf16 %v1648_v28, %v1648_v28  ;;  %v1673_v36 = vcombine.high %v1671_v31, %v4253_v3  ;;  %v1711_v42 = vshrl.u32 %v1672_v33, 16  ;;  %v1719_v47 = vshrl.u32 %v1671_v31, 16  ;;  %v3804_v27 = vld [vmem:[#allocation15 + $0x30] sm:$0xff]   ;;  %v3807_v16 = vld [vmem:[#allocation15 + $0xe8] sm:$0xff]   ;;  %v3848_v25 = vld [vmem:[#allocation16 + $0x18] sm:$0xff]  }
 0x576   : > { %v3610_v32 = vpop.f32.mrf.mxu1  ;;  %v3805_v28 = vld [vmem:[#allocation15 + $0xb0] sm:$0xff]  }
 0x577   : > { %v1681_v51 = vrot.slane %v1674_v30, %v4616_v62  ;;  %v1727_v50 = vshrl.u32 %v1673_v36, 16  ;;  %v3808_v30 = vld [vmem:[#allocation15 + $0x28] sm:$0xff]   ;;  %v3810_v32 = vld [vmem:[#allocation15 + $0x60] sm:$0xff]   ;;  %v3850_v26 = vld [vmem:[#allocation16 + $0x50] sm:$0xff]  }
 0x579   : > { %v1682_v34 = vcombine.high %v1681_v51, %v4253_v3  ;;  %v1689_v35 = vrot.slane %v1681_v51, %v4621_v2  ;;  %v3811_v51 = vld [vmem:[#allocation15 + $0xe0] sm:$0xff]  }
 0x57b   : > { %v1696_v38 = vrot.slane %v1682_v34, %v4621_v2  ;;  %v1697_v39 = vcombine.high %v1689_v35, %v4253_v3  ;;  %v1701_v40 = vpack.i.b16 %v1689_v35, %v1664_v29  ;;  %v1704_v41 = vshrl.u32 %v1689_v35, 16  ;;  %v3806_v29 = vld [vmem:[#allocation15 + $0x68] sm:$0xff]   ;;  %3414 = vmatpush3.bf16.xpose.msra.mxu1 %v3804_v27  ;;  %v3813_v34 = vld [vmem:[#allocation15 + $0xa0] sm:$0xff]   ;;  %v3814_v35 = vld [vmem:[#allocation15 + $0x58] sm:$0xff]  }
 0x57c   : > { %3415 = vmatprep.subr.bf16.mxu1 %v3806_v29  ;;  %v3852_v27 = vld [vmem:[#allocation16 + $0x10] sm:$0xff]   ;;  %v3854_v29 = vld [vmem:[#allocation16 + $0x48] sm:$0xff]  }
 0x57d   : > { %v1698_v43 = vcombine.high %v1696_v38, %v4253_v3  ;;  %v1705_v44 = vpack.i.b16 %v1704_v41, %v1703_v37  ;;  %v1709_v45 = vpack.i.b16 %v1697_v39, %v1672_v33  ;;  %v1712_v46 = vshrl.u32 %v1697_v39, 16  ;;  %v3812_v33 = vld [vmem:[#allocation15 + $0x20] sm:$0xff]   ;;  %v3816_v37 = vld [vmem:[#allocation15 + $0x18] sm:$0xff]  }
 0x57e   : > { %v1717_v48 = vpack.i.b16 %v1696_v38, %v1671_v31  ;;  %v1720_v49 = vshrl.u32 %v1696_v38, 16  ;;  %v3809_v31 = vld [vmem:[#allocation15 + $0xa8] sm:$0xff]   ;;  %v3817_v38 = vld [vmem:[#allocation15 + $0x98] sm:$0xff]  }
 0x57f   : > { %v1713_v52 = vpack.i.b16 %v1712_v46, %v1711_v42  ;;  %v1725_v53 = vpack.i.b16 %v1698_v43, %v1673_v36  ;;  %v1728_v54 = vshrl.u32 %v1698_v43, 16  ;;  %v3815_v36 = vld [vmem:[#allocation15 + $0xd8] sm:$0xff]   ;;  %v3818_v43 = vld [vmem:[#allocation15 + $0x50] sm:$0xff]  }
 0x580   : > { %v1721_v55 = vpack.i.b16 %v1720_v49, %v1719_v47  ;;  %v1731_v56 = vcombine.low %v1701_v40, %v1717_v48  ;;  %v3821_v46 = vld [vmem:[#allocation15 + $0x90] sm:$0xff]   ;;  %v3822_v47 = vld [vmem:[#allocation15 + $0x48] sm:$0xff]  }
 0x581   : > { %v1729_v57 = vpack.i.b16 %v1728_v54, %v1727_v50  ;;  %v1739_v58 = vcombine.low %v1709_v45, %v1725_v53  ;;  %v3820_v45 = vld [vmem:[#allocation15 + $0x10] sm:$0xff]   ;;  %v3823_v48 = vld [vmem:[#allocation15 + $0xc8] sm:$0xff]   ;;  %v3827_v53 = vld [vmem:[#allocation15 + $0xc0] sm:$0xff]  }
 0x582   : > { %v1755_v60 = vcombine.low %v1705_v44, %v1721_v55  ;;  %v1738_v61 = vrot.slane %v1731_v56, %v4616_v62  ;;  %v3819_v44 = vld [vmem:[#allocation15 + $0xd0] sm:$0xff]   ;;  %v3824_v49 = vld [vmem:[#allocation15 + $0x8] sm:$0xff]   ;;  %v3828_v54 = vld [vmem:[#allocation15] sm:$0xff]  }
 0x583   : > { %v1746_v63 = vrot.slane %v1739_v58, %v4616_v62  ;;  %v1763_v3 = vcombine.low %v1713_v52, %v1729_v57  ;;  %3416 = vmatpush3.bf16.xpose.msra.mxu1 %v3808_v30  ;;  %v3825_v50 = vld [vmem:[#allocation15 + $0x88] sm:$0xff]   ;;  %v3826_v52 = vld [vmem:[#allocation15 + $0x40] sm:$0xff]   ;;  %v3830_v56 = vld [vmem:[#allocation16 + $0x78] sm:$0xff]  }
 0x584   : > { %v1762_v1 = vrot.slane %v1755_v60, %v4616_v62  ;;  %3417 = vmatprep.subr.bf16.mxu1 %v3810_v32  ;;  %v3829_v55 = vld [vmem:[#allocation15 + $0x80] sm:$0xff]   ;;  %v3831_v57 = vld [vmem:[#allocation16 + $0xf8] sm:$0xff]   ;;  %v3856_v30 = vld [vmem:[#allocation16 + $0x8] sm:$0xff]  }
 0x585   : > { %v1747_v0 = vcombine.low %v1738_v61, %v1746_v63  ;;  %v1770_v5 = vrot.slane %v1763_v3, %v4616_v62  ;;  %v3255_v62 = vld [vmem:[%s4831_s7] ss:$0 sm:$0xff]  ;;  %v3858_v32 = vld [vmem:[#allocation16 + $0x40] sm:$0xff]  }
 0x586   : > { %v3264_v3 = vld [vmem:[%s4832_s8] ss:$0 sm:$0xff] }
 0x587   : > { %v1754_v6 = vrot.slane %v1747_v0, %v4621_v2  ;;  %v1771_v7 = vcombine.low %v1762_v1, %v1770_v5  ;;  %v3265_v1 = vld [vmem:[%s4833_s9] ss:$0 sm:$0xff] }
 0x589   : > { %v1778_v8 = vrot.slane %v1771_v7, %v4621_v2  ;;  %v1782_v9 = vshrl.u32 %v1754_v6, 16 }
 0x58b   : > { %v1783_v10 = vshrl.u32 %v1778_v8, 16  ;;  %v1781_v12 = vpack.i.b16 %v1778_v8, %v1754_v6  ;;  %3418 = vmatpush3.bf16.xpose.msra.mxu1 %v3812_v33  ;;  %v3832_v8 = vld [vmem:[#allocation16 + $0x38] sm:$0xff]   ;;  %v3860_v33 = vld [vmem:[#allocation16] sm:$0xff]  }
 0x58c   : > { %3419 = vmatprep.subr.bf16.mxu1 %v3814_v35  ;;  %v3862_v35 = vld [vmem:[#allocation18 + $0x78] sm:$0xff]  }
 0x58d   : > { %v1784_v13 = vpack.i.b16 %v1783_v10, %v1782_v9  ;;  %v3833_v9 = vld [vmem:[#allocation16 + $0xb8] sm:$0xff]   ;;  %v3834_v10 = vld [vmem:[#allocation16 + $0x70] sm:$0xff]  }
 0x58f   : > { %1785 = vrot.lane.b32.xlu1 %v1784_v13, %s4250_s10  ;;  %v3836_v13 = vld [vmem:[#allocation16 + $0x30] sm:$0xff]   ;;  %s650_s10 = scalar_lea.vmem [#allocation19], %s3224_s3 }
 0x590   : > { %s3055_s11 = sshll.u32 %s650_s10, 4  ;;  %s3056_s11 = int_to_ptr.vmem [resolvable:$true] %s3055_s11 }
 0x591   : > { %s4155_s0 = scalar_lea.vmem %s3056_s11, 64  ;;  %p4162_p13 = scmp.lt.s32.totalorder %s3056_s11, %s4160_s25 }
 0x592   : > { %p4156_p0 = scmp.ne.s32.totalorder %s3056_s11, %s4155_s0  ;;  %p4163_p1 = scmp.lt.s32.totalorder %s4161_s27, %s4155_s0 }
 0x593   : > { %3420 = vmatpush3.bf16.xpose.msra.mxu1 %v3816_v37  ;;  %v3864_v37 = vld [vmem:[#allocation18 + $0x38] sm:$0xff]  }
 0x594   : > { %3421 = vmatprep.subr.bf16.mxu1 %v3818_v43  ;;  %v3870_v43 = vld [vmem:[#allocation18 + $0x68] sm:$0xff]   ;;  %p4157_p9 = pnand %p4156_p0, %p4888_p5  ;;  %p4164_p3 = por %p4163_p1, %p4162_p13 }
 0x596   : > { %p4158_p12 = pneg %p4157_p9 }
 0x598   : > { %p4165_p4 = pnand %p4164_p3, %p4158_p12 }
 0x59b   : > { %3422 = vmatpush3.bf16.xpose.msra.mxu1 %v3820_v45  ;;  %v3872_v45 = vld [vmem:[#allocation18 + $0x28] sm:$0xff]  }
 0x59c   : > { %3423 = vmatprep.subr.bf16.mxu1 %v3822_v47  ;;  %v3874_v47 = vld [vmem:[#allocation18 + $0x60] sm:$0xff]  }
 0x5a3   : > { %3424 = vmatpush3.bf16.xpose.msra.mxu1 %v3824_v49  ;;  %v3876_v49 = vld [vmem:[#allocation18 + $0x20] sm:$0xff]  }
 0x5a4   : > { %3425 = vmatprep.subr.bf16.mxu1 %v3826_v52  ;;  %v3878_v52 = vld [vmem:[#allocation18 + $0x58] sm:$0xff]  }
 0x5ab   : > { %3426 = vmatpush3.bf16.xpose.msra.mxu1 %v3828_v54  ;;  %v3880_v54 = vld [vmem:[#allocation18 + $0x18] sm:$0xff]  }
 0x5ac   : > { %3447 = vmatprep.subr.bf16.mxu1 %v3830_v56  ;;  %v3882_v56 = vld [vmem:[#allocation18 + $0x50] sm:$0xff]  }
 0x601   : > { %v1786_v14 = vpop.permute.xlu1 %1785 }
 0x602   : > { %v1789_v15 = vsel %vm1424_vm2, %v1781_v12, %v1786_v14  ;;  %v3835_v12 = vld [vmem:[#allocation16 + $0xf0] sm:$0xff]  }
 0x603   : > { %3628 = vmatmul.mubr.bf16.vlgmr.msra.gmra.mxu0 %v1789_v15  ;;  %v3837_v14 = vld [vmem:[#allocation16 + $0xb0] sm:$0xff]   ;;  %v3838_v15 = vld [vmem:[#allocation16 + $0x68] sm:$0xff]  }
 0x604   : > { %3430 = vmatpush3.bf16.xpose.msra.mxu0 %v3801_v22  ;;  %v3849_v22 = vld [vmem:[#allocation16 + $0x98] sm:$0xff]  }
 0x605   : > { %3431 = vmatprep.subr.bf16.mxu0 %v3803_v11  ;;  %v3851_v11 = vld [vmem:[#allocation16 + $0xd0] sm:$0xff]  }
 0x60c   : > { %3432 = vmatpush3.bf16.xpose.msra.mxu0 %v3805_v28  ;;  %v3853_v28 = vld [vmem:[#allocation16 + $0x90] sm:$0xff]  }
 0x60d   : > { %3433 = vmatprep.subr.bf16.mxu0 %v3807_v16  ;;  %v3855_v16 = vld [vmem:[#allocation16 + $0xc8] sm:$0xff]  }
 0x614   : > { %3434 = vmatpush3.bf16.xpose.msra.mxu0 %v3809_v31  ;;  %v3857_v31 = vld [vmem:[#allocation16 + $0x88] sm:$0xff]  }
 0x615   : > { %3435 = vmatprep.subr.bf16.mxu0 %v3811_v51  ;;  %v3859_v51 = vld [vmem:[#allocation16 + $0xc0] sm:$0xff]  }
 0x61c   : > { %3436 = vmatpush3.bf16.xpose.msra.mxu0 %v3813_v34  ;;  %v3861_v34 = vld [vmem:[#allocation16 + $0x80] sm:$0xff]  }
 0x61d   : > { %3437 = vmatprep.subr.bf16.mxu0 %v3815_v36  ;;  %v3863_v36 = vld [vmem:[#allocation18 + $0xf8] sm:$0xff]  }
 0x624   : > { %3438 = vmatpush3.bf16.xpose.msra.mxu0 %v3817_v38  ;;  %v3865_v38 = vld [vmem:[#allocation18 + $0xb8] sm:$0xff]  }
 0x625   : > { %3439 = vmatprep.subr.bf16.mxu0 %v3819_v44  ;;  %v3871_v44 = vld [vmem:[#allocation18 + $0xe8] sm:$0xff]  }
 0x62c   : > { %3440 = vmatpush3.bf16.xpose.msra.mxu0 %v3821_v46  ;;  %v3873_v46 = vld [vmem:[#allocation18 + $0xa8] sm:$0xff]  }
 0x62d   : > { %3441 = vmatprep.subr.bf16.mxu0 %v3823_v48  ;;  %v3875_v48 = vld [vmem:[#allocation18 + $0xe0] sm:$0xff]  }
 0x634   : > { %3442 = vmatpush3.bf16.xpose.msra.mxu0 %v3825_v50  ;;  %v3877_v50 = vld [vmem:[#allocation18 + $0xa0] sm:$0xff]  }
 0x635   : > { %3443 = vmatprep.subr.bf16.mxu0 %v3827_v53  ;;  %v3879_v53 = vld [vmem:[#allocation18 + $0xd8] sm:$0xff]  }
 0x63c   : > { %3444 = vmatpush3.bf16.xpose.msra.mxu0 %v3829_v55  ;;  %v3881_v55 = vld [vmem:[#allocation18 + $0x98] sm:$0xff]  }
 0x63d   : > { %3465 = vmatprep.subr.bf16.mxu0 %v3831_v57  ;;  %v3883_v57 = vld [vmem:[#allocation18 + $0xd0] sm:$0xff]  }
 0x6c3   : > { %v1896_v17 = vpop.f32.mrf.mxu0 }
 0x6c4   : > { %v1897_v4 = vadd.f32 %v3255_v62, %v1896_v17  ;;  %v3839_v62 = vld [vmem:[#allocation16 + $0xe8] sm:$0xff]  }
 0x6c5   : > { %v3629_v18 = vpop.f32.mrf.mxu0  ;;  %v3840_v17 = vld [vmem:[#allocation16 + $0x28] sm:$0xff]  }
 0x6c6   : > { %v4742_v20 = vadd.f32 %v3918_v19, %v1897_v4  ;;  %v3841_v4 = vld [vmem:[#allocation16 + $0xa8] sm:$0xff]   ;;  %v3842_v18 = vld [vmem:[#allocation16 + $0x60] sm:$0xff]  }
 0x6c7   : > { %v1899_v2 = vpop.f32.mrf.mxu0  ;;  %v3843_v19 = vld [vmem:[#allocation16 + $0xe0] sm:$0xff]  }
 0x6c8   : > { %1905 = vadd.xlane.f32.xlu0 %v4742_v20  ;;  %v3844_v2 = vld [vmem:[#allocation16 + $0x20] sm:$0xff]  }
 0x6c9   : > { %v3630_v21 = vpop.f32.mrf.mxu0 }
 0x6ca   : > { %v3845_v21 = vld [vmem:[#allocation16 + $0xa0] sm:$0xff]  }
 0x751   : > { %v1906_v39 = vpop.xlane.xlu0 %1905 }
 0x752   : > { %v1907_v40 = vmul.f32 0.0078125, %v1906_v39  ;;  %v3866_v39 = vld [vmem:[#allocation18 + $0x70] sm:$0xff]  }
 0x754   : > { %v1908_v41 = vsub.f32 %v4742_v20, %v1907_v40  ;;  %v3867_v40 = vld [vmem:[#allocation18 + $0xf0] sm:$0xff]  }
 0x756   : > { %v1909_v42 = vmul.f32 %v1908_v41, %v1908_v41 }
 0x758   : > { %1910 = vadd.xlane.f32.xlu0 %v1909_v42  ;;  %v3869_v42 = vld [vmem:[#allocation18 + $0xb0] sm:$0xff]  }
 0x7e1   : > { %v1911_v58 = vpop.xlane.xlu0 %1910 }
 0x7e2   : > { %v1912_v60 = vmul.f32 0.0078125, %v1911_v58  ;;  %v3884_v58 = vld [vmem:[#allocation18 + $0x10] sm:$0xff]  }
 0x7e4   : > { %v1913_v61 = vadd.f32 1e-05, %v1912_v60  ;;  %v3885_v60 = vld [vmem:[#allocation18 + $0x90] sm:$0xff]  }
 0x7e6   : > { %3908 = vrsqrt.f32 %v1913_v61  ;;  %v3886_v61 = vld [vmem:[#allocation18 + $0x48] sm:$0xff]  }
 0x7f3   : > { %v3909_v63 = vpop.eup %3908 }
 0x7f4   : > { %v1915_v0 = vmul.f32 %v3909_v63, %v1908_v41  ;;  %v3868_v41 = vld [vmem:[#allocation18 + $0x30] sm:$0xff]   ;;  %v3887_v63 = vld [vmem:[#allocation18 + $0xc8] sm:$0xff]  }
 0x7f6   : > { %v1922_v5 = vmul.f32 %v3264_v3, %v1915_v0  ;;  %v3888_v3 = vld [vmem:[#allocation18 + $0x8] sm:$0xff]  }
 0x7f7   : > { %v3889_v0 = vld [vmem:[#allocation18 + $0x88] sm:$0xff]  }
 0x7f8   : > { %v1929_v6 = vadd.f32 %v3265_v1, %v1922_v5  ;;  %v3890_v1 = vld [vmem:[#allocation18 + $0x40] sm:$0xff]  }
 0x7f9   : > { %v3891_v5 = vld [vmem:[#allocation18 + $0xc0] sm:$0xff]  }
 0x7fa   : > { %v4752_v7 = vpack.c.bf16 %v1929_v6, %v1929_v6  ;;  %v3892_v6 = vld [vmem:[#allocation18] sm:$0xff]  }
 0x7fc   : > { %3427 = vmatprep.mubr.bf16.mxu1 %v4752_v7  ;;  %3445 = vmatprep.mubr.bf16.mxu0 %v4752_v7 }
 0x7fd   : > { %3428 = vmatmul.mubr.bf16.vlgmr.msra.gmra.mxu1 %v4752_v7  ;;  %3446 = vmatmul.mubr.bf16.vlgmr.msra.gmra.mxu0 %v4752_v7 }
 0x7fe   : > { %3448 = vmatpush3.bf16.xpose.msra.mxu1 %v3832_v8  ;;  %3466 = vmatpush3.bf16.xpose.msra.mxu0 %v3833_v9 }
 0x7ff   : > { %3463 = vmatprep.mubr.bf16.mxu1 %v4752_v7  ;;  %3481 = vmatprep.mubr.bf16.mxu0 %v4752_v7 }
 0x800   : > { %3449 = vmatprep.subr.bf16.mxu1 %v3834_v10  ;;  %3467 = vmatprep.subr.bf16.mxu0 %v3835_v12 }
 0x806   : > { %3450 = vmatpush3.bf16.xpose.msra.mxu1 %v3836_v13  ;;  %3468 = vmatpush3.bf16.xpose.msra.mxu0 %v3837_v14 }
 0x807   : > { %3451 = vmatprep.subr.bf16.mxu1 %v3838_v15  ;;  %3469 = vmatprep.subr.bf16.mxu0 %v3839_v62 }
 0x80e   : > { %3452 = vmatpush3.bf16.xpose.msra.mxu1 %v3840_v17  ;;  %3470 = vmatpush3.bf16.xpose.msra.mxu0 %v3841_v4  ;;  %v2355_v17 = vld [vmem:[%s4837_s13] sm:$0xf]  ;;  %v2063_v4 = vsub.s32 0, %v4613_v59 }
 0x80f   : > { %3453 = vmatprep.subr.bf16.mxu1 %v3842_v18  ;;  %3471 = vmatprep.subr.bf16.mxu0 %v3843_v19  ;;  %v2071_v18 = vsub.s32 2, %v4613_v59  ;;  %v2067_v19 = vsub.s32 1, %v4613_v59 }
 0x816   : > { %3454 = vmatpush3.bf16.xpose.msra.mxu1 %v3844_v2  ;;  %3472 = vmatpush3.bf16.xpose.msra.mxu0 %v3845_v21  ;;  %v2075_v2 = vsub.s32 3, %v4613_v59  ;;  %v2360_v21 = vrot.slane %v2355_v17, %v2063_v4 }
 0x817   : > { %3455 = vmatprep.subr.bf16.mxu1 %v3846_v23  ;;  %3473 = vmatprep.subr.bf16.mxu0 %v3847_v24  ;;  %v2368_v23 = vrot.slane %v2355_v17, %v2071_v18  ;;  %v2364_v24 = vrot.slane %v2355_v17, %v2067_v19 }
 0x81e   : > { %3456 = vmatpush3.bf16.xpose.msra.mxu1 %v3848_v25  ;;  %3474 = vmatpush3.bf16.xpose.msra.mxu0 %v3849_v22  ;;  %v2372_v25 = vrot.slane %v2355_v17, %v2075_v2 }
 0x81f   : > { %3457 = vmatprep.subr.bf16.mxu1 %v3850_v26  ;;  %3475 = vmatprep.subr.bf16.mxu0 %v3851_v11 }
 0x826   : > { %3458 = vmatpush3.bf16.xpose.msra.mxu1 %v3852_v27  ;;  %3476 = vmatpush3.bf16.xpose.msra.mxu0 %v3853_v28 }
 0x827   : > { %3459 = vmatprep.subr.bf16.mxu1 %v3854_v29  ;;  %3477 = vmatprep.subr.bf16.mxu0 %v3855_v16 }
 0x82e   : > { %3460 = vmatpush3.bf16.xpose.msra.mxu1 %v3856_v30  ;;  %3478 = vmatpush3.bf16.xpose.msra.mxu0 %v3857_v31 }
 0x82f   : > { %3461 = vmatprep.subr.bf16.mxu1 %v3858_v32  ;;  %3479 = vmatprep.subr.bf16.mxu0 %v3859_v51 }
 0x836   : > { %3462 = vmatpush3.bf16.xpose.msra.mxu1 %v3860_v33  ;;  %3480 = vmatpush3.bf16.xpose.msra.mxu0 %v3861_v34 }
 0x837   : > { %3483 = vmatprep.subr.bf16.mxu1 %v3862_v35  ;;  %3505 = vmatprep.subr.bf16.mxu0 %v3863_v36 }
 0x83d   : > { %3464 = vmatmul.mubr.bf16.vlgmr.msra.gmra.mxu1 %v4752_v7  ;;  %3482 = vmatmul.mubr.bf16.vlgmr.msra.gmra.mxu0 %v4752_v7  ;;  %v3893_v7 = vld [vmem:[#allocation18 + $0x80] sm:$0xff]  }
 0x83e   : > { %3484 = vmatpush3.bf16.msra.mxu1 %v3864_v37  ;;  %3506 = vmatpush3.bf16.msra.mxu0 %v3865_v38 }
 0x83f   : > { %3485 = vmatprep.subr.bf16.mxu1 %v3866_v39  ;;  %3507 = vmatprep.subr.bf16.mxu0 %v3867_v40 }
 0x842   : > { %3486 = vmatpush3.bf16.msra.mxu1 %v3868_v41  ;;  %3508 = vmatpush3.bf16.msra.mxu0 %v3869_v42 }
 0x843   : > { %3487 = vmatprep.subr.bf16.mxu1 %v3870_v43  ;;  %3509 = vmatprep.subr.bf16.mxu0 %v3871_v44 }
 0x846   : > { %3488 = vmatpush3.bf16.msra.mxu1 %v3872_v45  ;;  %3510 = vmatpush3.bf16.msra.mxu0 %v3873_v46 }
 0x847   : > { %3489 = vmatprep.subr.bf16.mxu1 %v3874_v47  ;;  %3511 = vmatprep.subr.bf16.mxu0 %v3875_v48 }
 0x84a   : > { %3490 = vmatpush3.bf16.msra.mxu1 %v3876_v49  ;;  %3512 = vmatpush3.bf16.msra.mxu0 %v3877_v50 }
 0x84b   : > { %3491 = vmatprep.subr.bf16.mxu1 %v3878_v52  ;;  %3513 = vmatprep.subr.bf16.mxu0 %v3879_v53 }
 0x84e   : > { %3492 = vmatpush3.bf16.msra.mxu1 %v3880_v54  ;;  %3514 = vmatpush3.bf16.msra.mxu0 %v3881_v55  ;;  %v2059_v54 = vld [vmem:[%s4836_s12] sm:$0xf] }
 0x84f   : > { %3493 = vmatprep.subr.bf16.mxu1 %v3882_v56  ;;  %3515 = vmatprep.subr.bf16.mxu0 %v3883_v57 }
 0x852   : > { %3494 = vmatpush3.bf16.msra.mxu1 %v3884_v58  ;;  %3516 = vmatpush3.bf16.msra.mxu0 %v3885_v60  ;;  %v2064_v60 = vrot.slane %v2059_v54, %v2063_v4 }
 0x853   : > { %3495 = vmatprep.subr.bf16.mxu1 %v3886_v61  ;;  %3517 = vmatprep.subr.bf16.mxu0 %v3887_v63 }
 0x856   : > { %3496 = vmatpush3.bf16.msra.mxu1 %v3888_v3  ;;  %3518 = vmatpush3.bf16.msra.mxu0 %v3889_v0  ;;  %v2072_v3 = vrot.slane %v2059_v54, %v2071_v18  ;;  %v2068_v0 = vrot.slane %v2059_v54, %v2067_v19 }
 0x857   : > { %3497 = vmatprep.subr.bf16.mxu1 %v3890_v1  ;;  %3519 = vmatprep.subr.bf16.mxu0 %v3891_v5 }
 0x85a   : > { %3498 = vmatpush3.bf16.msra.mxu1 %v3892_v6  ;;  %3520 = vmatpush3.bf16.msra.mxu0 %v3893_v7  ;;  %v2076_v6 = vrot.slane %v2059_v54, %v2075_v2 }
 0x8bd   : > { %v4762_v8 = vpop.f32.mrf.mxu1  ;;  %v4764_v9 = vpop.f32.mrf.mxu0 }
 0x8bf   : > { %v4766_v10 = vpop.f32.mrf.mxu1  ;;  %v4768_v12 = vpop.f32.mrf.mxu0 }
 0x8c1   : > { %v2311_v13 = vpop.f32.mrf.mxu1  ;;  %v2352_v14 = vpop.f32.mrf.mxu0 }
 0x8c3   : > { %v2312_v15 = vpop.f32.mrf.mxu1  ;;  %v2353_v62 = vpop.f32.mrf.mxu0 }
 0x8c4   : > { %v2308_v62 = vadd.f32 %v4762_v8, %v2064_v60 }
 0x8fd   : > { %v2603_v22 = vpop.f32.mrf.mxu1  ;;  %v2644_v26 = vpop.f32.mrf.mxu0 }
 0x8fe   : > { %v2604_v11 = vadd.f32 %v2603_v22, %v2360_v21  ;;  %v2645_v27 = vadd.f32 %v2644_v26, %v2368_v23  ;;  %v2349_v23 = vadd.f32 %v4764_v9, %v2072_v3 }
 0x8ff   : > { %v2605_v28 = vpop.f32.mrf.mxu1  ;;  %v2646_v29 = vpop.f32.mrf.mxu0 }
 0x900   : > { %v2651_v16 = vmul.f32 %v2604_v11, %v2604_v11  ;;  %v2653_v30 = vmul.f32 %v2645_v27, %v2645_v27  ;;  %v2606_v31 = vadd.f32 %v2605_v28, %v2364_v24  ;;  %v2647_v32 = vadd.f32 %v2646_v29, %v2372_v25 }
 0x901   : > { %v2607_v51 = vpop.f32.mrf.mxu1  ;;  %v2648_v33 = vpop.f32.mrf.mxu0  ;;  %v2310_v24 = vadd.f32 %v4766_v10, %v2068_v0  ;;  %v2351_v25 = vadd.f32 %v4768_v12, %v2076_v6  ;;  %v3330_v12 = vld [vmem:[%s4839_s15] ss:$0 sm:$0xff] }
 0x902   : > { %v2655_v34 = vmul.f32 %v2651_v16, %v2604_v11  ;;  %v2657_v35 = vmul.f32 %v2653_v30, %v2645_v27  ;;  %v2652_v36 = vmul.f32 %v2606_v31, %v2606_v31  ;;  %v2654_v59 = vmul.f32 %v2647_v32, %v2647_v32 }
 0x903   : > { %v2608_v37 = vpop.f32.mrf.mxu1  ;;  %v2649_v38 = vpop.f32.mrf.mxu0 }
 0x904   : > { %v2659_v39 = vmul.f32 0.044715, %v2655_v34  ;;  %v2661_v40 = vmul.f32 0.044715, %v2657_v35  ;;  %v2656_v41 = vmul.f32 %v2652_v36, %v2606_v31  ;;  %v2658_v42 = vmul.f32 %v2654_v59, %v2647_v32 }
 0x906   : > { %v2663_v43 = vadd.f32 %v2659_v39, %v2604_v11  ;;  %v2665_v44 = vadd.f32 %v2661_v40, %v2645_v27  ;;  %v2660_v45 = vmul.f32 0.044715, %v2656_v41  ;;  %v2662_v46 = vmul.f32 0.044715, %v2658_v42 }
 0x908   : > { %v2667_v47 = vmul.f32 0.7978846, %v2663_v43  ;;  %v2669_v48 = vmul.f32 0.7978846, %v2665_v44  ;;  %v2664_v49 = vadd.f32 %v2660_v45, %v2606_v31  ;;  %v2666_v50 = vadd.f32 %v2662_v46, %v2647_v32 }
 0x90a   : > { %3910 = vtanh.f32 %v2667_v47  ;;  %v2668_v52 = vmul.f32 0.7978846, %v2664_v49  ;;  %v2670_v53 = vmul.f32 0.7978846, %v2666_v50 }
 0x90b   : > { %3912 = vtanh.f32 %v2669_v48 }
 0x90c   : > { %3914 = vtanh.f32 %v2668_v52 }
 0x90d   : > { %3916 = vtanh.f32 %v2670_v53 }
 0x917   : > { %v3911_v55 = vpop.eup %3910 }
 0x918   : > { %v3913_v56 = vpop.eup %3912  ;;  %v2675_v57 = vadd.f32 1.0, %v3911_v55 }
 0x919   : > { %v3915_v58 = vpop.eup %3914  ;;  %v2677_v61 = vadd.f32 1.0, %v3913_v56 }
 0x91a   : > { %v3917_v63 = vpop.eup %3916  ;;  %v2679_v1 = vmul.f32 0.5, %v2675_v57  ;;  %v2676_v5 = vadd.f32 1.0, %v3915_v58 }
 0x91b   : > { %v2681_v7 = vmul.f32 0.5, %v2677_v61  ;;  %v2678_v13 = vadd.f32 1.0, %v3917_v63 }
 0x91c   : > { %v2683_v14 = vmul.f32 %v2679_v1, %v2604_v11  ;;  %v2680_v15 = vmul.f32 0.5, %v2676_v5 }
 0x91d   : > { %v2685_v17 = vmul.f32 %v2681_v7, %v2645_v27  ;;  %v2682_v21 = vmul.f32 0.5, %v2678_v13 }
 0x91e   : > { %v2684_v4 = vmul.f32 %v2680_v15, %v2606_v31  ;;  %v2687_v19 = vmul.f32 %v2683_v14, %v2308_v62 }
 0x91f   : > { %v2686_v18 = vmul.f32 %v2682_v21, %v2647_v32  ;;  %v2689_v2 = vmul.f32 %v2685_v17, %v2349_v23 }
 0x920   : > { %v2688_v22 = vmul.f32 %v2684_v4, %v2310_v24  ;;  %v2691_v29 = vpack.c.bf16 %v2687_v19, %v2687_v19 }
 0x921   : > { %v2690_v26 = vmul.f32 %v2686_v18, %v2351_v25  ;;  %v2693_v8 = vpack.c.bf16 %v2689_v2, %v2689_v2 }
 0x922   : > { %v2692_v28 = vpack.c.bf16 %v2688_v22, %v2688_v22 }
 0x923   : > { %v2694_v11 = vpack.c.bf16 %v2690_v26, %v2690_v26 }
 0x924   : > { %2990 = vmatprep.mubr.bf16.mxu1 %v2692_v28 }
 0x925   : > { %3030 = vmatprep.mubr.bf16.mxu0 %v2694_v11  ;;  %2991 = vmatmul.mubr.bf16.vlgmr.msra.gmra.mxu1 %v2691_v29 }
 0x926   : > { %3031 = vmatmul.mubr.bf16.vlgmr.msra.gmra.mxu0 %v2693_v8 }
 0x9e5   : > { %v3499_v9 = vpop.f32.mrf.mxu1 }
 0x9e6   : > { %v3521_v10 = vpop.f32.mrf.mxu0 }
 0x9e7   : > { %v3500_v27 = vpop.f32.mrf.mxu1 }
 0x9e8   : > { %v3501_v16 = vadd.f32 %v3500_v27, %v3499_v9  ;;  %v3522_v30 = vpop.f32.mrf.mxu0 }
 0x9e9   : > { %v3502_v31 = vpop.f32.mrf.mxu1  ;;  %v3523_v51 = vadd.f32 %v3522_v30, %v3521_v10 }
 0x9ea   : > { %v2993_v32 = vadd.f32 %v3501_v16, %v3330_v12  ;;  %v3524_v33 = vpop.f32.mrf.mxu0 }
 0x9eb   : > { %v3503_v34 = vpop.f32.mrf.mxu1 }
 0x9ec   : > { %v3033_v35 = vadd.f32 %v3523_v51, %v2993_v32  ;;  %v3525_v36 = vpop.f32.mrf.mxu0 }
 0x9ee   : > { %v3038_v59 = vadd.f32 %v3033_v35, %v4742_v20 }
 0x9f0   : > { %v3039_v37 = vpack.c.bf16 %v3038_v59, %v3038_v59 }
 0x9f2   : > { %3040 = vst [vmem:[%s650_s10] sm:$0xf] %v3039_v37 }
 0x9f3   : > { %4168 = shalt.err (!%p4165_p4)
}
 0x9f4   : > { %s4169_s4 = scalar_lea.hbm %s3053_s2, 64  ;;  %s4173_s6 = scalar_lea.hbm %s4887_s20, 128 }
 0x9f5   : > { %p4170_p6 = scmp.ne.s32.totalorder %s3053_s2, %s4169_s4  ;;  %p4174_p7 = scmp.lt.s32.totalorder %s3053_s2, %s4887_s20 }
 0x9f6   : > { %p4175_p10 = scmp.lt.s32.totalorder %s4173_s6, %s4169_s4 }
 0x9f7   : > { %p4171_p8 = pnand %p4170_p6, %p4888_p5 }
 0x9f8   : > { %p4176_p2 = por %p4175_p10, %p4174_p7 }
 0x9f9   : > { %p4172_p11 = pneg %p4171_p8 }
 0x9fb   : > { %p4177_p0 = pnand %p4176_p2, %p4172_p11 }
 0x9fd   : > { %4180 = shalt.err (!%p4177_p0)
}
 0x9fe   : > { %3665 = dma.vmem_to_hbm [thread:$0]  (%p4888_p5), %s3056_s11, 64, %s3053_s2, %s3042_s18  }
 0x9ff PF: > { %s3067_s10 = sand.u32 1, %s4223_s21   ;;  %p4889_p9 = scmp.ne.s32.totalorder %s4874_s16, 0 }
 0xa00   : > { %p4890_p12 = scmp.ge.s32.totalorder %s4235_s24, 2  ;;  %s3068_s23 = scalar_lea.sflag [#allocation6], %s3067_s10 }
 0xa02   : > { %p3697_p13 = pnand %p4890_p12, %p4889_p9 }
 0xa04   : > { %p3698_p1 = pneg %p3697_p13 }
 0xa06   : > { %4218 = dma.done.wait (%p3698_p1), %s3068_s23, 64  }
 0xa07   : > { %4220 = vsyncadd (%p3698_p1), %s3068_s23, 4294967232  ;;  %s4891_s28 = sld [smem:[#allocation26_spill]]  ;;  %p33_p3 = scmp.ge.s32.totalorder %s4478_s19, 4  }
 0xa08   : > { %s4892_s23 = sld [smem:[#allocation27_spill]]  ;;  %s4893_s21 = smov %s4227_s22 }
 0xa09   : > { %s4895_s24 = smov %s4478_s19  ;;  %35 = sbr.rel (!%p33_p3) target bundleno = 20 (0x14), region = 161 }
 0xa0d   : > { %s4894_s22 = smov %s4891_s28 }
 0xa0e   :  { %3073 = vsyncpa [#allocation5], 1 }
 0xa0f   :  { %3075 = vsyncpa [#allocation5 + $0x1], 1 }
 0xa10   :  { %3076 = vsyncpa [#allocation8], 1 }
 0xa11   :  { %3077 = vsyncpa [#allocation11], 1 }
 0xa12   :  { %3078 = vsyncpa [#allocation14], 1 }
 0xa13   :  { %3079 = vsyncpa [#allocation17], 1 }
 0xa14   :  { %3080 = vsyncpa [#allocation6], 1 }
 0xa15   :  { %3082 = vsyncpa [#allocation6 + $0x1], 1 }

// kernel: tpu_custom_call.1
= control target key start
LH: loop header
LB: loop body
LE: loop exit
PB: predicated region body
PF: predicated region fallthrough
CT: control target
= control target key end

     0   :  { %s4824_s0 = inlined_call_operand.hbm [shape: f32[2,8,128], index: 0, kind: input, shape index: {}]   ;;  %s4825_s1 = inlined_call_operand.vmem [shape: f32[1,128], index: 1, kind: input, shape index: {}]   ;;  %s4826_s2 = inlined_call_operand.hbm [shape: f32[1,128], index: 2, kind: input, shape index: {}]   ;;  %s4827_s3 = inlined_call_operand.hbm [shape: bf16[128,128], index: 3, kind: input, shape index: {}]   ;;  %s4828_s4 = inlined_call_operand.hbm [shape: bf16[128,128], index: 4, kind: input, shape index: {}]   ;;  %s4829_s5 = inlined_call_operand.hbm [shape: bf16[128,128], index: 5, kind: input, shape index: {}]   ;;  %s4830_s6 = inlined_call_operand.hbm [shape: bf16[128,128], index: 6, kind: input, shape index: {}]   ;;  %s4831_s7 = inlined_call_operand.vmem [shape: f32[1,128], index: 7, kind: input, shape index: {}]   ;;  %s4832_s8 = inlined_call_operand.vmem [shape: f32[1,128], index: 8, kind: input, shape index: {}]   ;;  %s4833_s9 = inlined_call_operand.vmem [shape: f32[1,128], index: 9, kind: input, shape index: {}]   ;;  %s4834_s10 = inlined_call_operand.hbm [shape: bf16[512,128], index: 10, kind: input, shape index: {}]   ;;  %s4835_s11 = inlined_call_operand.hbm [shape: bf16[512,128], index: 11, kind: input, shape index: {}]   ;;  %s4836_s12 = inlined_call_operand.vmem [shape: f32[1,512], index: 12, kind: input, shape index: {}]   ;;  %s4837_s13 = inlined_call_operand.vmem [shape: f32[1,512], index: 13, kind: input, shape index: {}]   ;;  %s4838_s14 = inlined_call_operand.hbm [shape: bf16[512,128], index: 14, kind: input, shape index: {}]   ;;  %s4839_s15 = inlined_call_operand.vmem [shape: f32[1,128], index: 15, kind: input, shape index: {}]   ;;  %s4840_s16 = inlined_call_operand.hbm [shape: bf16[2,8,128], index: 16, kind: output, shape index: {}]  }
   0x1   :  { %4848 = sst [smem:[#allocation28_spill]] %s4824_s0 }
   0x2   :  { %4849 = sst [smem:[#allocation29_spill]] %s4826_s2 }
   0x3   :  { %4850 = sst [smem:[#allocation30_spill]] %s4827_s3 }
   0x4   :  { %4851 = sst [smem:[#allocation31_spill]] %s4828_s4 }
   0x5   :  { %4852 = sst [smem:[#allocation32_spill]] %s4829_s5 }
   0x6   :  { %4853 = sst [smem:[#allocation33_spill]] %s4830_s6 }
   0x7   :  { %4854 = sst [smem:[#allocation34_spill]] %s4834_s10 }
   0x8   :  { %4855 = sst [smem:[#allocation35_spill]] %s4835_s11 }
   0x9   :  { %4856 = sst [smem:[#allocation36_spill]] %s4838_s14 }
   0xa   :  { %4857 = sst [smem:[#allocation37_spill]] %s4840_s16 }
   0xb   :  { %21 = vsyncpa [#allocation5], 0 }
   0xc   :  { %23 = vsyncpa [#allocation5 + $0x1], 0 }
   0xd   :  { %24 = vsyncpa [#allocation8], 0 }
   0xe   :  { %25 = vsyncpa [#allocation11], 0 }
   0xf   :  { %26 = vsyncpa [#allocation14], 0 }
  0x10   :  { %27 = vsyncpa [#allocation17], 0 }
  0x11   :  { %28 = vsyncpa [#allocation6], 0 }
  0x12   :  { %30 = vsyncpa [#allocation6 + $0x1], 0  ;;  %s4340_s21 = smov 0   ;;  %s4342_s22 = smov 0  }
  0x13   :  { %s4344_s23 = smov 0   ;;  %s4346_s24 = smov 0  }
  0x14 LB: > { %4858 = sst [smem:[#allocation26_spill]] %s4231_s23  ;;  %s4237_s25 = smov [#allocation7]   ;;  %s4235_s24 = sphi %s4346_s24, %s4895_s24   ;;  %s4231_s23 = sphi %s4344_s23, %s4892_s23   ;;  %s4227_s22 = sphi %s4342_s22, %s4894_s22   ;;  %s4223_s21 = sphi %s4340_s21, %s4893_s21  }
  0x15   : > { %s424_s26 = sshll.u32 %s4237_s25, 4  ;;  %s4361_s27 = sadd.s32 4294967295, %s4235_s24   ;;  %s425_s26 = int_to_ptr.vmem [resolvable:$true] %s424_s26 }
  0x16   : > { %p3202_p0 = scmp.ge.s32.totalorder %s4235_s24, 1  ;;  %p4843_p1 = scmp.eq.s32.totalorder %s4361_s27, 0 }
  0x17   : > { %p408_p2 = scmp.lt.s32.totalorder %s4235_s24, 3  ;;  %s4238_s29 = smov [#allocation10]  }
  0x18   : > { %s447_s30 = sshll.u32 %s4238_s29, 4  ;;  %s4239_s17 = smov [#allocation13]   ;;  %s4379_s30 = int_to_ptr.vmem [resolvable:$true] %s447_s30 }
  0x19   : > { %p4366_p3 = pnand %p3202_p0, %p408_p2  ;;  %s473_s18 = sshll.u32 %s4239_s17, 4  ;;  %s4381_s18 = int_to_ptr.vmem [resolvable:$true] %s473_s18 }
  0x1a   : > { %s3930_s20 = scalar_lea.vmem %s425_s26, 16  ;;  %s3937_s25 = scalar_lea.vmem %s425_s26, 32 }
  0x1b   : > { %s4859_s28 = scalar_select %p4366_p3, 1, 0 }
  0x1c   : > { %p3667_p5 = pneg %p4366_p3  ;;  %p3931_p8 = scmp.ne.s32.totalorder %s425_s26, %s3930_s20 }
  0x1d   : > { %p3938_p11 = scmp.lt.s32.totalorder %s425_s26, %s425_s26  ;;  %p3939_p12 = scmp.lt.s32.totalorder %s3937_s25, %s3930_s20 }
  0x1e   : > { %p4375_p6 = pnand %p3667_p5, %p4843_p1 }
  0x1f   : > { %p3940_p13 = por %p3939_p12, %p3938_p11 }
  0x20   : > { %p4385_p7 = pneg %p4375_p6 }
  0x22   : > { %p3933_p9 = pnand %p3931_p8, %p4385_p7 }
  0x24   : > { %p3934_p10 = pneg %p3933_p9 }
  0x26   : > { %p3941_p0 = pnand %p3940_p13, %p3934_p10 }
  0x28   : > { %3944 = shalt.err (!%p3941_p0)
}
  0x29   : > { %s4862_s2 = sld [smem:[#allocation29_spill]]  ;;  %s3956_s16 = scalar_lea.vmem %s4379_s30, 1024 }
  0x2a   : > { %p3957_p2 = scmp.ne.s32.totalorder %s4379_s30, %s3956_s16  ;;  %p3964_p9 = scmp.lt.s32.totalorder %s4379_s30, %s4379_s30 }
  0x2b   : > { %p3965_p11 = scmp.lt.s32.totalorder %s3956_s16, %s3956_s16 }
  0x2c   : > { %p3959_p5 = pnand %p3957_p2, %p4385_p7 }
  0x2d   : > { %p3966_p10 = por %p3965_p11, %p3964_p9 }
  0x2e   : > { %p3960_p8 = pneg %p3959_p5 }
  0x2f   : > { %3670 = dma.hbm_to_vmem [thread:$0]  (!%p4375_p6), %s4862_s2, 16, %s425_s26, [#allocation8]  }
  0x30   : > { %p3967_p12 = pnand %p3966_p10, %p3960_p8 }
  0x32   : > { %3970 = shalt.err (!%p3967_p12)
}
  0x33   : > { %s4240_s20 = smov 64   ;;  %s4241_s25 = smov 4  }
  0x34   : > { %s4863_s4 = sld [smem:[#allocation31_spill]]  ;;  %s3982_s16 = scalar_lea.vmem %s4381_s18, 1024 }
  0x35   : > { %p3983_p13 = scmp.ne.s32.totalorder %s4381_s18, %s3982_s16  ;;  %p3990_p5 = scmp.lt.s32.totalorder %s4381_s18, %s4381_s18 }
  0x36   : > { %p3991_p8 = scmp.lt.s32.totalorder %s3982_s16, %s3982_s16 }
  0x37   : > { %p3985_p0 = pnand %p3983_p13, %p4385_p7 }
  0x38   : > { %p3992_p9 = por %p3991_p8, %p3990_p5 }
  0x39   : > { %p3986_p2 = pneg %p3985_p0 }
  0x3a   : > { %3676 = dma.hbm_to_vmem [thread:$0]  (!%p4375_p6), %s4863_s4, 1024, %s4379_s30, [#allocation11], %s4240_s20, %s4240_s20, %s4241_s25  }
  0x3b   : > { %p3993_p11 = pnand %p3992_p9, %p3986_p2 }
  0x3d   : > { %3996 = shalt.err (!%p3993_p11)
}
  0x3e   : > { %s4864_s6 = sld [smem:[#allocation33_spill]]  ;;  %s4242_s30 = smov [#allocation16]  }
  0x3f   : > { %s508_s29 = sshll.u32 %s4242_s30, 4  ;;  %s4243_s2 = smov [#allocation9]   ;;  %s509_s29 = int_to_ptr.vmem [resolvable:$true] %s508_s29 }
  0x40   : > { %s434_s4 = sshll.u32 %s4243_s2, 4  ;;  %s4008_s16 = scalar_lea.vmem %s509_s29, 4096  ;;  %s435_s4 = int_to_ptr.vmem [resolvable:$true] %s434_s4 }
  0x41   : > { %p4009_p10 = scmp.ne.s32.totalorder %s509_s29, %s4008_s16  ;;  %p4016_p0 = scmp.lt.s32.totalorder %s509_s29, %s509_s29 }
  0x42   : > { %p4017_p2 = scmp.lt.s32.totalorder %s4008_s16, %s4008_s16 }
  0x43   : > { %p4011_p12 = pnand %p4009_p10, %p4385_p7 }
  0x44   : > { %3682 = dma.hbm_to_vmem [thread:$0]  (!%p4375_p6), %s4864_s6, 1024, %s4381_s18, [#allocation14], %s4240_s20, %s4240_s20, %s4241_s25  }
  0x45   : > { %p4012_p13 = pneg %p4011_p12  ;;  %p4018_p5 = por %p4017_p2, %p4016_p0 }
  0x47   : > { %p4019_p8 = pnand %p4018_p5, %p4012_p13 }
  0x49   : > { %4022 = shalt.err (!%p4019_p8)
}
  0x4a   : > { %s4865_s11 = sld [smem:[#allocation35_spill]]  ;;  %s4034_s2 = scalar_lea.vmem %s435_s4, 1024 }
  0x4b   : > { %p4035_p9 = scmp.ne.s32.totalorder %s435_s4, %s4034_s2  ;;  %p4042_p12 = scmp.lt.s32.totalorder %s435_s4, %s435_s4 }
  0x4c   : > { %p4043_p0 = scmp.lt.s32.totalorder %s4034_s2, %s4034_s2 }
  0x4d   : > { %p4037_p11 = pnand %p4035_p9, %p4385_p7 }
  0x4e   : > { %p4044_p13 = por %p4043_p0, %p4042_p12 }
  0x4f   : > { %p4038_p10 = pneg %p4037_p11 }
  0x50   : > { %3688 = dma.hbm_to_vmem [thread:$0]  (!%p4375_p6), %s4865_s11, 4096, %s509_s29, [#allocation17], %s4240_s20, %s4240_s20, %s4241_s25  }
  0x51   : > { %p4045_p2 = pnand %p4044_p13, %p4038_p10 }
  0x53   : > { %4048 = shalt.err (!%p4045_p2)
}
  0x54   : > { %s4866_s3 = sld [smem:[#allocation30_spill]]  ;;  %s4244_s29 = smov [#allocation12]  }
  0x55   : > { %s460_s16 = sshll.u32 %s4244_s29, 4  ;;  %s4245_s18 = smov [#allocation15]   ;;  %s461_s16 = int_to_ptr.vmem [resolvable:$true] %s460_s16 }
  0x56   : > { %s495_s17 = sshll.u32 %s4245_s18, 4  ;;  %s4060_s6 = scalar_lea.vmem %s461_s16, 1024  ;;  %s496_s17 = int_to_ptr.vmem [resolvable:$true] %s495_s17 }
  0x57   : > { %p4061_p5 = scmp.ne.s32.totalorder %s461_s16, %s4060_s6  ;;  %p4068_p11 = scmp.lt.s32.totalorder %s461_s16, %s461_s16 }
  0x58   : > { %p4069_p10 = scmp.lt.s32.totalorder %s4060_s6, %s4060_s6 }
  0x59   : > { %p4063_p8 = pnand %p4061_p5, %p4385_p7 }
  0x5a   : > { %3673 = dma.hbm_to_vmem [thread:$0]  (!%p4375_p6), %s4866_s3, 1024, %s435_s4, [#allocation8], %s4240_s20, %s4240_s20, %s4241_s25  }
  0x5b   : > { %p4064_p9 = pneg %p4063_p8  ;;  %p4070_p12 = por %p4069_p10, %p4068_p11 }
  0x5d   : > { %p4071_p0 = pnand %p4070_p12, %p4064_p9 }
  0x5f   : > { %4074 = shalt.err (!%p4071_p0)
}
  0x60   : > { %s4867_s5 = sld [smem:[#allocation32_spill]]  ;;  %s4086_s26 = scalar_lea.vmem %s496_s17, 4096 }
  0x61   : > { %p4087_p13 = scmp.ne.s32.totalorder %s496_s17, %s4086_s26  ;;  %p4094_p8 = scmp.lt.s32.totalorder %s496_s17, %s496_s17 }
  0x62   : > { %p4095_p11 = scmp.lt.s32.totalorder %s4086_s26, %s4086_s26 }
  0x63   : > { %p4089_p2 = pnand %p4087_p13, %p4385_p7 }
  0x64   : > { %p4096_p9 = por %p4095_p11, %p4094_p8 }
  0x65   : > { %p4090_p5 = pneg %p4089_p2 }
  0x66   : > { %3679 = dma.hbm_to_vmem [thread:$0]  (!%p4375_p6), %s4867_s5, 1024, %s461_s16, [#allocation11], %s4240_s20, %s4240_s20, %s4241_s25  }
  0x67   : > { %p4097_p10 = pnand %p4096_p9, %p4090_p5 }
  0x69   : > { %4100 = shalt.err (!%p4097_p10)
}
  0x6a   : > { %s4868_s10 = sld [smem:[#allocation34_spill]]  ;;  %s4246_s29 = smov [#allocation18]  }
  0x6b   : > { %s527_s16 = sshll.u32 %s4246_s29, 4  ;;  %s528_s16 = int_to_ptr.vmem [resolvable:$true] %s527_s16 }
  0x6c   : > { %s4112_s18 = scalar_lea.vmem %s528_s16, 4096  ;;  %p4120_p2 = scmp.lt.s32.totalorder %s528_s16, %s528_s16 }
  0x6d   : > { %p4113_p12 = scmp.ne.s32.totalorder %s528_s16, %s4112_s18  ;;  %p4121_p5 = scmp.lt.s32.totalorder %s4112_s18, %s4112_s18 }
  0x6f   : > { %p4115_p0 = pnand %p4113_p12, %p4385_p7  ;;  %p4122_p8 = por %p4121_p5, %p4120_p2 }
  0x70   : > { %3685 = dma.hbm_to_vmem [thread:$0]  (!%p4375_p6), %s4868_s10, 4096, %s496_s17, [#allocation14], %s4240_s20, %s4240_s20, %s4241_s25  }
  0x71   : > { %p4116_p13 = pneg %p4115_p0 }
  0x73   : > { %p4123_p11 = pnand %p4122_p8, %p4116_p13 }
  0x75   : > { %4126 = shalt.err (!%p4123_p11)
}
  0x76   : > { %s4869_s14 = sld [smem:[#allocation36_spill]]  ;;  %s3201_s0 = sadd.s32 4294967294, %s4235_s24  }
  0x77   : > { %s4478_s19 = sadd.s32 1, %s4235_s24   ;;  %s43_s26 = sadd.s32 1, %s4231_s23 }
  0x78   : > { %s40_s2 = ssub.s32 %s4235_s24, %s4478_s19  ;;  %p50_p9 = scmp.ne.s32.totalorder %s4231_s23, %s4227_s22 }
  0x79   : > { %p41_p7 = scmp.eq.s32.totalorder %s40_s2, 0  ;;  %p51_p10 = scmp.eq.s32.totalorder %s4235_s24, 0 }
  0x7a   : > { %p56_p12 = scmp.ne.s32.totalorder %s4227_s22, %s4223_s21  ;;  %p395_p13 = scmp.eq.s32.totalorder %s4361_s27, 1 }
  0x7b   : > { %s4489_s6 = scalar_select %p41_p7, %s4231_s23, %s43_s26  }
  0x7c   : > { %3691 = dma.hbm_to_vmem [thread:$0]  (!%p4375_p6), %s4869_s14, 4096, %s528_s16, [#allocation17], %s4240_s20, %s4240_s20, %s4241_s25  }
  0x7d   : > { %4870 = sst [smem:[#allocation27_spill]] %s4489_s6  ;;  %p4491_p0 = por %p51_p10, %p50_p9 }
  0x7e   : > { %p4497_p6 = por %p4843_p1, %p56_p12  ;;  %p401_p2 = scmp.eq.s32.totalorder %s3201_s0, 1 }
  0x7f   : > { %p3708_p5 = scmp.lt.s32.totalorder %s4235_s24, 2  ;;  %s544_s25 = sand.u32 1, %s4231_s23  }
  0x80   : > { %s4872_s20 = scalar_select %p4497_p6, 1, 0 }
  0x81   : > { %p4504_p8 = por %p395_p13, %p50_p9  ;;  %p4508_p11 = por %p401_p2, %p56_p12 }
  0x82   : > { %s3212_s18 = sshll.u32 %s544_s25, 3  ;;  %s3213_s4 = sshll.u32 %s4235_s24, 7 }
  0x83   : > { %s4873_s29 = scalar_select %p4504_p8, 1, 0 }
  0x84   : > { %s4874_s16 = scalar_select %p4508_p11, 1, 0 }
  0x85   : > { %s4875_s26 = sld [smem:[#allocation28_spill]]  ;;  %s548_s0 = scalar_lea.vmem [#allocation4], %s3212_s18 }
  0x86   : > { %s555_s5 = sshll.u32 %s548_s0, 4  ;;  %p4520_p7 = pnand %p3708_p5, %p4491_p0  ;;  %s556_s5 = int_to_ptr.vmem [resolvable:$true] %s555_s5 }
  0x87   : > { %s545_s11 = scalar_lea.sflag [#allocation5], %s544_s25 }
  0x88   : > { %p4129_p10 = pneg %p4520_p7 }
  0x8b   : > { %s4516_s3 = scalar_lea.hbm %s4875_s26, %s3213_s4  ;;  %s4132_s2 = scalar_lea.hbm %s4875_s26, 256 }
  0x8c   : > { %s4127_s14 = scalar_lea.hbm %s4516_s3, 128  ;;  %p4133_p2 = scmp.lt.s32.totalorder %s4516_s3, %s4875_s26 }
  0x8d   : > { %p4128_p9 = scmp.ne.s32.totalorder %s4516_s3, %s4127_s14  ;;  %p4134_p0 = scmp.lt.s32.totalorder %s4132_s2, %s4127_s14 }
  0x8f   : > { %p4130_p12 = pnand %p4129_p10, %p4128_p9  ;;  %p4135_p5 = por %p4134_p0, %p4133_p2 }
  0x91   : > { %p4131_p13 = pneg %p4130_p12 }
  0x93   : > { %p4136_p4 = pnand %p4135_p5, %p4131_p13 }
  0x95   : > { %4139 = shalt.err (!%p4136_p4)
}
  0x96   : > { %s4140_s30 = scalar_lea.vmem %s556_s5, 128  ;;  %s4247_s25 = smov [#allocation4]  }
  0x97   : > { %p4141_p1 = scmp.ne.s32.totalorder %s556_s5, %s4140_s30  ;;  %s4145_s6 = sshll.u32 %s4247_s25, 4  ;;  %s4146_s6 = int_to_ptr.vmem [resolvable:$false] %s4145_s6 }
  0x98   : > { %s4147_s23 = scalar_lea.vmem %s4146_s6, 256  ;;  %p4148_p9 = scmp.lt.s32.totalorder %s556_s5, %s4146_s6 }
  0x99   : > { %p4143_p11 = pnand %p4141_p1, %p4129_p10  ;;  %p4149_p12 = scmp.lt.s32.totalorder %s4147_s23, %s4140_s30 }
  0x9b   : > { %p4144_p8 = pneg %p4143_p11  ;;  %p4150_p6 = por %p4149_p12, %p4148_p9 }
  0x9d   : > { %p4151_p3 = pnand %p4150_p6, %p4144_p8 }
  0x9f   : > { %4154 = shalt.err (!%p4151_p3)
}
  0xa0   : > { %3695 = dma.hbm_to_vmem [thread:$0]  (!%p4520_p7), %s4516_s3, 128, %s556_s5, %s545_s11  }
  0xa1   : > { %p4877_p13 = scmp.ne.s32.totalorder %s4859_s28, 0 }
  0xa2   : > { %s4541_s14 = sand.u32 (!%p4877_p13), 1, %s4227_s22   ;;  %p4878_p1 = scmp.ne.s32.totalorder (!%p4877_p13), %s4872_s20, 0 }
  0xa3   : > { %564 = sbr.rel (%p4877_p13) target bundleno = 2559 (0x9ff), region = 84  ;;  %s3215_s4 = sshll.u32 (!%p4877_p13), %s4541_s14, 3 }
  0xa4   : > { %s567_s17 = scalar_lea.sflag (!%p4877_p13), [#allocation5], %s4541_s14  ;;  %s4545_s6 = scalar_lea.vmem (!%p4877_p13), [#allocation4], %s3215_s4 }
  0xa8   : > { %4198 = dma.done.wait (%p4878_p1), %s567_s17, 128  }
  0xa9   : > { %4200 = vsyncadd (%p4878_p1), %s567_s17, 4294967168  ;;  %p4879_p3 = scmp.eq.s32.totalorder %s4361_s27, 0 }
  0xab   : > { %4202 = dma.done.wait (%p4879_p3), [#allocation8], 1040   ;;  %p4880_p4 = pmov %p4879_p3 }
  0xac   : > { %p4881_p6 = pmov %p4879_p3 }
  0xad   : > { %4204 = vsyncadd (%p4880_p4), [#allocation8], 4294966256 }
  0xae   : > { %4206 = dma.done.wait (%p4881_p6), [#allocation11], 2048   ;;  %p4882_p8 = pmov %p4879_p3 }
  0xaf   : > { %p4883_p11 = pmov %p4879_p3 }
  0xb0   : > { %4208 = vsyncadd (%p4882_p8), [#allocation11], 4294965248 }
  0xb1   : > { %4210 = dma.done.wait (%p4883_p11), [#allocation14], 5120   ;;  %p4884_p7 = pmov %p4879_p3 }
  0xb2   : > { %p4885_p10 = pmov %p4879_p3 }
  0xb3   : > { %4212 = vsyncadd (%p4884_p7), [#allocation14], 4294962176 }
  0xb4   : > { %4214 = dma.done.wait (%p4885_p10), [#allocation17], 8192   ;;  %p4886_p2 = pmov %p4879_p3 }
  0xb5   : > { %v652_v0 = vld [vmem:[%s4545_s6] sm:$0xff]  ;;  %v4248_v4 = vmov 0.0   ;;  %v3772_v12 = vld [vmem:[#allocation9 + $0x20] sm:$0xff]   ;;  %vm4249_vm0 = vmmov 0   ;;  %v3225_v26 = vld [vmem:[%s4825_s1] ss:$0 sm:$0xff]  ;;  %v1001_v57 = vlaneseq }
  0xb6   : > { %4216 = vsyncadd (%p4886_p2), [#allocation17], 4294959104  ;;  %655 = vadd.xlane.f32.xlu0 %v652_v0  ;;  %v3766_v1 = vld [vmem:[#allocation9 + $0x38] sm:$0xff]   ;;  %v3768_v3 = vld [vmem:[#allocation9 + $0x30] sm:$0xff]   ;;  %3527 = vmatprep.subr.bf16.mxu0 %v4248_v4  ;;  %s4250_s10 = smov 64   ;;  %vm1274_vm1 = vcmask 519168  }
  0xb7   : > { %v3767_v2 = vld [vmem:[#allocation10 + $0x38] sm:$0xff]   ;;  %3547 = vmatprep.subr.bf16.mxu1 %v4248_v4  ;;  %v3769_v5 = vld [vmem:[#allocation10 + $0x30] sm:$0xff]   ;;  %3528 = vmatpush3.bf16.msra.mxu0 %v3766_v1  ;;  %v3770_v10 = vld [vmem:[#allocation9 + $0x28] sm:$0xff]   ;;  %v4251_v55 = vmov 1983009808   ;;  %v4613_v59 = vshrl.u32 %v1001_v57, 7 }
  0xb8   : > { %3548 = vmatpush3.bf16.msra.mxu1 %v3767_v2  ;;  %3529 = vmatprep.subr.bf16.mxu0 %v4248_v4  ;;  %v3771_v11 = vld [vmem:[#allocation10 + $0x28] sm:$0xff]   ;;  %v3773_v13 = vld [vmem:[#allocation10 + $0x20] sm:$0xff]   ;;  %v3774_v14 = vld [vmem:[#allocation9 + $0x18] sm:$0xff]   ;;  %v999_v56 = vunpack.c.l.s4 %v4251_v55  ;;  %v4252_v60 = vmov 1934713408   ;;  %vm1424_vm2 = vcmask 523264  }
  0xb9   : > { %3549 = vmatprep.subr.bf16.mxu1 %v4248_v4  ;;  %3543 = vmatprep.mubr.msk.bf16.mxu0 %vm4249_vm0, %v4248_v4  ;;  %v3775_v15 = vld [vmem:[#allocation10 + $0x18] sm:$0xff]   ;;  %v3776_v16 = vld [vmem:[#allocation9 + $0x10] sm:$0xff]   ;;  %v3778_v18 = vld [vmem:[#allocation9 + $0x8] sm:$0xff]   ;;  %v1007_v61 = vunpack.c.l.s4 %v4252_v60  ;;  %vm1553_vm3 = vcmask 1043456   ;;  %vm1517_vm4 = vcmask 64512   ;;  %s3224_s3 = sshll.u32 %s4541_s14, 2 }
  0xba   : > { %3563 = vmatprep.mubr.msk.bf16.mxu1 %vm4249_vm0, %v4248_v4  ;;  %v3777_v17 = vld [vmem:[#allocation10 + $0x10] sm:$0xff]   ;;  %v3779_v19 = vld [vmem:[#allocation10 + $0x8] sm:$0xff]   ;;  %v3780_v20 = vld [vmem:[#allocation9] sm:$0xff]   ;;  %v1000_v58 = vunpack.c.0.s8 %v999_v56  ;;  %s3364_s5 = sshll.u32 %s4361_s27, 6  ;;  %s4887_s20 = sld [smem:[#allocation37_spill]] }
  0xbb   : > { %3530 = vmatpush3.bf16.msra.mxu0 %v3768_v3  ;;  %v3781_v21 = vld [vmem:[#allocation10] sm:$0xff]   ;;  %v3226_v28 = vld [vmem:[#allocation7] ss:$0 sm:$0xff]  ;;  %v3783_v33 = vld [vmem:[#allocation12 + $0x30] sm:$0xff]   ;;  %v1008_v63 = vunpack.c.0.s8 %v1007_v61  ;;  %v4253_v3 = vmov 0   ;;  %s3042_s18 = scalar_lea.sflag [#allocation6], %s4541_s14 }
  0xbc   : > { %3550 = vmatpush3.bf16.msra.mxu1 %v3769_v5  ;;  %3531 = vmatprep.subr.bf16.mxu0 %v4248_v4  ;;  %v3782_v31 = vld [vmem:[#allocation12 + $0x38] sm:$0xff]   ;;  %v3784_v34 = vld [vmem:[#allocation12 + $0x28] sm:$0xff]   ;;  %v3785_v35 = vld [vmem:[#allocation12 + $0x20] sm:$0xff]   ;;  %v4616_v62 = vsub.s32 %v1000_v58, %v4613_v59  ;;  %p4888_p5 = scmp.ne.s32.totalorder %s4873_s29, 0  ;;  %s4254_s30 = smov [#allocation19]  }
  0xbd   : > { %3551 = vmatprep.subr.bf16.mxu1 %v4248_v4  ;;  %v3786_v36 = vld [vmem:[#allocation12 + $0x18] sm:$0xff]   ;;  %v3787_v37 = vld [vmem:[#allocation12 + $0x10] sm:$0xff]   ;;  %v3788_v38 = vld [vmem:[#allocation12 + $0x8] sm:$0xff]   ;;  %v4621_v2 = vsub.s32 %v1008_v63, %v4613_v59  ;;  %s4159_s25 = sshll.u32 %s4254_s30, 4  ;;  %s4160_s25 = int_to_ptr.vmem [resolvable:$false] %s4159_s25 }
  0xbe   : > { %v3789_v39 = vld [vmem:[#allocation12] sm:$0xff]   ;;  %s4161_s27 = scalar_lea.vmem %s4160_s25, 128 }
  0xbf   : > { %3532 = vmatpush3.bf16.msra.mxu0 %v3770_v10 }
  0xc0   : > { %3552 = vmatpush3.bf16.msra.mxu1 %v3771_v11  ;;  %3533 = vmatprep.subr.bf16.mxu0 %v4248_v4  ;;  %s3053_s2 = scalar_lea.hbm %s4887_s20, %s3364_s5 }
  0xc1   : > { %3553 = vmatprep.subr.bf16.mxu1 %v4248_v4 }
  0xc3   : > { %3534 = vmatpush3.bf16.msra.mxu0 %v3772_v12 }
  0xc4   : > { %3554 = vmatpush3.bf16.msra.mxu1 %v3773_v13  ;;  %3535 = vmatprep.subr.bf16.mxu0 %v4248_v4 }
  0xc5   : > { %3555 = vmatprep.subr.bf16.mxu1 %v4248_v4 }
  0xc7   : > { %3536 = vmatpush3.bf16.msra.mxu0 %v3774_v14 }
  0xc8   : > { %3556 = vmatpush3.bf16.msra.mxu1 %v3775_v15  ;;  %3537 = vmatprep.subr.bf16.mxu0 %v4248_v4 }
  0xc9   : > { %3557 = vmatprep.subr.bf16.mxu1 %v4248_v4 }
  0xcb   : > { %3538 = vmatpush3.bf16.msra.mxu0 %v3776_v16 }
  0xcc   : > { %3558 = vmatpush3.bf16.msra.mxu1 %v3777_v17  ;;  %3539 = vmatprep.subr.bf16.mxu0 %v4248_v4 }
  0xcd   : > { %3559 = vmatprep.subr.bf16.mxu1 %v4248_v4 }
  0xcf   : > { %3540 = vmatpush3.bf16.msra.mxu0 %v3778_v18 }
  0xd0   : > { %3560 = vmatpush3.bf16.msra.mxu1 %v3779_v19  ;;  %3541 = vmatprep.subr.bf16.mxu0 %v4248_v4 }
  0xd1   : > { %3561 = vmatprep.subr.bf16.mxu1 %v4248_v4 }
  0xd3   : > { %3542 = vmatpush3.bf16.msra.mxu0 %v3780_v20 }
  0xd4   : > { %3562 = vmatpush3.bf16.msra.mxu1 %v3781_v21  ;;  %3567 = vmatprep.subr.bf16.mxu0 %v4248_v4 }
  0xd5   : > { %3587 = vmatprep.subr.bf16.mxu1 %v4248_v4 }
 0x13f   : > { %v656_v6 = vpop.xlane.xlu0 %655 }
 0x140   : > { %v658_v7 = vmul.f32 0.0078125, %v656_v6 }
 0x142   : > { %v659_v8 = vsub.f32 %v652_v0, %v658_v7 }
 0x144   : > { %v660_v9 = vmul.f32 %v659_v8, %v659_v8 }
 0x146   : > { %661 = vadd.xlane.f32.xlu0 %v660_v9 }
 0x1cf   : > { %v662_v22 = vpop.xlane.xlu0 %661 }
 0x1d0   : > { %v663_v23 = vmul.f32 0.0078125, %v662_v22 }
 0x1d2   : > { %v664_v24 = vadd.f32 1e-05, %v663_v23 }
 0x1d4   : > { %3894 = vrsqrt.f32 %v664_v24 }
 0x1e1   : > { %v3895_v25 = vpop.eup %3894 }
 0x1e2   : > { %v666_v27 = vmul.f32 %v3895_v25, %v659_v8 }
 0x1e4   : > { %v673_v29 = vmul.f32 %v3225_v26, %v666_v27 }
 0x1e6   : > { %v680_v30 = vadd.f32 %v3226_v28, %v673_v29 }
 0x1e8   : > { %v681_v32 = vpack.c.bf16 %v680_v30, %v680_v30 }
 0x1ea   : > { %3544 = vmatmul.mubr.bf16.vlgmr.msra.gmra.mxu0 %v681_v32  ;;  %3564 = vmatmul.mubr.bf16.vlgmr.msra.gmra.mxu1 %v681_v32 }
 0x1eb   : > { %3568 = vmatpush3.bf16.msra.mxu0 %v3782_v31  ;;  %3583 = vmatprep.mubr.msk.bf16.mxu0 %vm4249_vm0, %v4248_v4 }
 0x1ec   : > { %3569 = vmatprep.subr.bf16.mxu0 %v4248_v4  ;;  %3589 = vmatprep.mubr.msk.bf16.mxu1 %vm4249_vm0, %v4248_v4 }
 0x1ef   : > { %3570 = vmatpush3.bf16.msra.mxu0 %v3783_v33 }
 0x1f0   : > { %3571 = vmatprep.subr.bf16.mxu0 %v4248_v4 }
 0x1f3   : > { %3572 = vmatpush3.bf16.msra.mxu0 %v3784_v34 }
 0x1f4   : > { %3573 = vmatprep.subr.bf16.mxu0 %v4248_v4 }
 0x1f7   : > { %3574 = vmatpush3.bf16.msra.mxu0 %v3785_v35 }
 0x1f8   : > { %3575 = vmatprep.subr.bf16.mxu0 %v4248_v4 }
 0x1fb   : > { %3576 = vmatpush3.bf16.msra.mxu0 %v3786_v36 }
 0x1fc   : > { %3577 = vmatprep.subr.bf16.mxu0 %v4248_v4 }
 0x1ff   : > { %3578 = vmatpush3.bf16.msra.mxu0 %v3787_v37 }
 0x200   : > { %3579 = vmatprep.subr.bf16.mxu0 %v4248_v4 }
 0x203   : > { %3580 = vmatpush3.bf16.msra.mxu0 %v3788_v38 }
 0x204   : > { %3581 = vmatprep.subr.bf16.mxu0 %v4248_v4 }
 0x207   : > { %3582 = vmatpush3.bf16.msra.mxu0 %v3789_v39 }
 0x208   : > { %3611 = vmatprep.subr.bf16.mxu0 %v4248_v4 }
 0x20a   : > { %3584 = vmatmul.mubr.bf16.vlgmr.msra.gmra.mxu0 %v681_v32 }
 0x20b   : > { %3627 = vmatprep.mubr.msk.bf16.mxu0 %vm4249_vm0, %v4248_v4 }
 0x2aa   : > { %v780_v40 = vpop.f32.mrf.mxu0  ;;  %v884_v41 = vpop.f32.mrf.mxu1 }
 0x2ab   : > { %v1133_v42 = vpack.c.bf16 %v884_v41, %v884_v41  ;;  %v994_v47 = vpack.c.bf16 %v780_v40, %v780_v40 }
 0x2ac   : > { %v3545_v43 = vpop.f32.mrf.mxu0  ;;  %v3565_v44 = vpop.f32.mrf.mxu1 }
 0x2ad   : > { %1135 = vrot.lane.b32.xlu1 %v1133_v42, %s4250_s10  ;;  %v1143_v0 = vrot.slane %v1133_v42, %v4616_v62  ;;  %v1004_v1 = vrot.slane %v994_v47, %v4616_v62 }
 0x2ae   : > { %v783_v45 = vpop.f32.mrf.mxu0  ;;  %v887_v46 = vpop.f32.mrf.mxu1 }
 0x2af   : > { %v1144_v5 = vcombine.high %v1143_v0, %v4253_v3  ;;  %v1005_v6 = vcombine.high %v1004_v1, %v4253_v3  ;;  %v1151_v7 = vrot.slane %v1143_v0, %v4621_v2  ;;  %v4636_v16 = vrot.slane %v1004_v1, %v4621_v2 }
 0x2b0   : > { %v3546_v48 = vpop.f32.mrf.mxu0  ;;  %v3566_v49 = vpop.f32.mrf.mxu1 }
 0x2b1   : > { %996 = vrot.lane.b32.xlu1 %v994_v47, %s4250_s10  ;;  %v1158_v8 = vrot.slane %v1144_v5, %v4621_v2  ;;  %v4629_v11 = vrot.slane %v1005_v6, %v4621_v2  ;;  %v1159_v12 = vcombine.high %v1151_v7, %v4253_v3  ;;  %v1190_v18 = vshrl.u32 %v1151_v7, 16 }
 0x2b2   : > { %v1020_v45 = vcombine.high %v4636_v16, %v4253_v3  ;;  %v1051_v6 = vshrl.u32 %v4636_v16, 16 }
 0x2b3   : > { %v1160_v13 = vcombine.high %v1158_v8, %v4253_v3  ;;  %v1021_v22 = vcombine.high %v4629_v11, %v4253_v3  ;;  %v1198_v23 = vshrl.u32 %v1159_v12, 16  ;;  %v1206_v24 = vshrl.u32 %v1158_v8, 16 }
 0x2b4   : > { %v1059_v60 = vshrl.u32 %v1020_v45, 16  ;;  %v1067_v63 = vshrl.u32 %v4629_v11, 16 }
 0x2b5   : > { %v1214_v26 = vshrl.u32 %v1160_v13, 16 }
 0x2ca   : > { %v988_v50 = vpop.f32.mrf.mxu0 }
 0x2cb   : > { %v4609_v51 = vpack.c.bf16 %v988_v50, %v988_v50 }
 0x2cc   : > { %v3585_v52 = vpop.f32.mrf.mxu0 }
 0x2cd   : > { %1279 = vrot.lane.b32.xlu0 %v4609_v51, %s4250_s10  ;;  %v1075_v52 = vshrl.u32 %v1021_v22, 16 }
 0x2ce   : > { %v991_v53 = vpop.f32.mrf.mxu0 }
 0x2d0   : > { %v3586_v54 = vpop.f32.mrf.mxu0 }
 0x31f   : > { %v1136_v9 = vpop.permute.xlu1 %1135 }
 0x320   : > { %v1168_v10 = vrot.slane %v1136_v9, %v4616_v62 }
 0x322   : > { %v1169_v14 = vcombine.high %v1168_v10, %v4253_v3  ;;  %v1176_v15 = vrot.slane %v1168_v10, %v4621_v2 }
 0x323   : > { %v997_v17 = vpop.permute.xlu1 %996 }
 0x324   : > { %v1183_v19 = vrot.slane %v1169_v14, %v4621_v2  ;;  %v1184_v20 = vcombine.high %v1176_v15, %v4253_v3  ;;  %v1191_v21 = vshrl.u32 %v1176_v15, 16  ;;  %v1029_v25 = vrot.slane %v997_v17, %v4616_v62 }
 0x325   : > { %v1188_v28 = vpack.i.b16 %v1176_v15, %v1151_v7 }
 0x326   : > { %v1185_v27 = vcombine.high %v1183_v19, %v4253_v3  ;;  %v1199_v29 = vshrl.u32 %v1184_v20, 16  ;;  %v1204_v30 = vpack.i.b16 %v1183_v19, %v1158_v8  ;;  %v1207_v31 = vshrl.u32 %v1183_v19, 16 }
 0x327   : > { %v1030_v32 = vcombine.high %v1029_v25, %v4253_v3  ;;  %v1037_v33 = vrot.slane %v1029_v25, %v4621_v2  ;;  %v1192_v34 = vpack.i.b16 %v1191_v21, %v1190_v18  ;;  %v1196_v35 = vpack.i.b16 %v1184_v20, %v1159_v12 }
 0x328   : > { %v1212_v36 = vpack.i.b16 %v1185_v27, %v1160_v13  ;;  %v1215_v37 = vshrl.u32 %v1185_v27, 16  ;;  %v1208_v38 = vpack.i.b16 %v1207_v31, %v1206_v24  ;;  %v1218_v39 = vcombine.low %v1188_v28, %v1204_v30 }
 0x329   : > { %v1044_v40 = vrot.slane %v1030_v32, %v4621_v2  ;;  %v1045_v41 = vcombine.high %v1037_v33, %v4253_v3  ;;  %v1200_v42 = vpack.i.b16 %v1199_v29, %v1198_v23  ;;  %v1052_v61 = vshrl.u32 %v1037_v33, 16 }
 0x32a   : > { %v1216_v43 = vpack.i.b16 %v1215_v37, %v1214_v26  ;;  %v1226_v44 = vcombine.low %v1196_v35, %v1212_v36  ;;  %v1242_v46 = vcombine.low %v1192_v34, %v1208_v38  ;;  %v1225_v48 = vrot.slane %v1218_v39, %v4616_v62 }
 0x32b   : > { %v1046_v47 = vcombine.high %v1044_v40, %v4253_v3  ;;  %v1060_v54 = vshrl.u32 %v1045_v41, 16  ;;  %v1068_v57 = vshrl.u32 %v1044_v40, 16  ;;  %v1053_v12 = vpack.i.b16 %v1052_v61, %v1051_v6 }
 0x32c   : > { %v1233_v49 = vrot.slane %v1226_v44, %v4616_v62  ;;  %v1250_v50 = vcombine.low %v1200_v42, %v1216_v43  ;;  %v1249_v53 = vrot.slane %v1242_v46, %v4616_v62  ;;  %v1057_v13 = vpack.i.b16 %v1045_v41, %v1020_v45 }
 0x32d   : > { %v1076_v58 = vshrl.u32 %v1046_v47, 16  ;;  %v1061_v8 = vpack.i.b16 %v1060_v54, %v1059_v60  ;;  %v1069_v9 = vpack.i.b16 %v1068_v57, %v1067_v63  ;;  %v1073_v10 = vpack.i.b16 %v1046_v47, %v1021_v22 }
 0x32e   : > { %v1234_v55 = vcombine.low %v1225_v48, %v1233_v49  ;;  %v1257_v56 = vrot.slane %v1250_v50, %v4616_v62  ;;  %v1065_v14 = vpack.i.b16 %v1044_v40, %v4629_v11  ;;  %v1049_v21 = vpack.i.b16 %v1037_v33, %v4636_v16 }
 0x32f   : > { %v1077_v5 = vpack.i.b16 %v1076_v58, %v1075_v52  ;;  %v1087_v23 = vcombine.low %v1057_v13, %v1073_v10  ;;  %v1103_v24 = vcombine.low %v1053_v12, %v1069_v9  ;;  %v1287_v25 = vrot.slane %v4609_v51, %v4616_v62 }
 0x330   : > { %v1241_v0 = vrot.slane %v1234_v55, %v4621_v2  ;;  %v1258_v1 = vcombine.low %v1249_v53, %v1257_v56  ;;  %v1079_v22 = vcombine.low %v1049_v21, %v1065_v14 }
 0x331   : > { %v1111_v19 = vcombine.low %v1061_v8, %v1077_v5  ;;  %v1094_v11 = vrot.slane %v1087_v23, %v4616_v62  ;;  %v1110_v27 = vrot.slane %v1103_v24, %v4616_v62  ;;  %v1288_v28 = vcombine.high %v1287_v25, %v4253_v3 }
 0x332   : > { %v1265_v7 = vrot.slane %v1258_v1, %v4621_v2  ;;  %v1270_v17 = vshrl.u32 %v1241_v0, 16  ;;  %v1086_v29 = vrot.slane %v1079_v22, %v4616_v62  ;;  %v1295_v30 = vrot.slane %v1287_v25, %v4621_v2 }
 0x333   : > { %v1118_v26 = vrot.slane %v1111_v19, %v4616_v62  ;;  %v1302_v33 = vrot.slane %v1288_v28, %v4621_v2 }
 0x334   : > { %v1268_v15 = vpack.i.b16 %v1265_v7, %v1241_v0  ;;  %v1271_v18 = vshrl.u32 %v1265_v7, 16  ;;  %v1095_v32 = vcombine.low %v1086_v29, %v1094_v11  ;;  %v1303_v37 = vcombine.high %v1295_v30, %v4253_v3 }
 0x335   : > { %v1119_v16 = vcombine.low %v1110_v27, %v1118_v26  ;;  %v1304_v41 = vcombine.high %v1302_v33, %v4253_v3  ;;  %v1334_v46 = vshrl.u32 %v1295_v30, 16  ;;  %v1350_v49 = vshrl.u32 %v1302_v33, 16 }
 0x336   : > { %v1272_v20 = vpack.i.b16 %v1271_v18, %v1270_v17  ;;  %1275 = vst.msk [vmem:[#allocation2] sm:$0xf] %vm1274_vm1, %v1268_v15  ;;  %v1102_v40 = vrot.slane %v1095_v32, %v4621_v2  ;;  %v1342_v47 = vshrl.u32 %v1303_v37, 16 }
 0x337   : > { %v1126_v36 = vrot.slane %v1119_v16, %v4621_v2  ;;  %v1358_v54 = vshrl.u32 %v1304_v41, 16 }
 0x338   : > { %1276 = vst.msk [vmem:[#allocation2 + $0x4] sm:$0xf] %vm1274_vm1, %v1272_v20  ;;  %v1130_v9 = vshrl.u32 %v1102_v40, 16 }
 0x339   : > { %v1129_v45 = vpack.i.b16 %v1126_v36, %v1102_v40  ;;  %v1131_v63 = vshrl.u32 %v1126_v36, 16 }
 0x33b   : > { %v1132_v15 = vpack.i.b16 %v1131_v63, %v1130_v9 }
 0x33d   : > { %v1420_v31 = vld [vmem:[#allocation2] sm:$0xf] }
 0x33e   : > { %v1429_v51 = vsel %vm1424_vm2, %v1420_v31, 0 }
 0x33f   : > { %v1280_v34 = vpop.permute.xlu0 %1279  ;;  %3588 = vmatpush3.bf16.xpose.msra.mxu1 %v1429_v51  ;;  %v1421_v42 = vld [vmem:[#allocation2 + $0x4] sm:$0xf] }
 0x340   : > { %v1312_v35 = vrot.slane %v1280_v34, %v4616_v62  ;;  %3593 = vmatprep.subr.bf16.mxu1 %v4248_v4  ;;  %v1475_v53 = vsel %vm1424_vm2, %v1421_v42, 0 }
 0x342   : > { %v1313_v38 = vcombine.high %v1312_v35, %v4253_v3  ;;  %v1320_v39 = vrot.slane %v1312_v35, %v4621_v2 }
 0x344   : > { %v1327_v43 = vrot.slane %v1313_v38, %v4621_v2  ;;  %v1328_v44 = vcombine.high %v1320_v39, %v4253_v3  ;;  %v1335_v48 = vshrl.u32 %v1320_v39, 16  ;;  %v1332_v55 = vpack.i.b16 %v1320_v39, %v1295_v30 }
 0x346   : > { %v1329_v50 = vcombine.high %v1327_v43, %v4253_v3  ;;  %v1343_v52 = vshrl.u32 %v1328_v44, 16  ;;  %3590 = vmatmul.mubr.msk.bf16.vlgmr.msra.gmra.mxu1 %vm1424_vm2, %v1129_v45  ;;  %v1348_v56 = vpack.i.b16 %v1327_v43, %v1302_v33  ;;  %v1351_v57 = vshrl.u32 %v1327_v43, 16 }
 0x347   : > { %3594 = vmatpush3.bf16.xpose.msra.mxu1 %v1475_v53  ;;  %3595 = vmatprep.mubr.msk.bf16.mxu1 %vm4249_vm0, %v4248_v4  ;;  %v1340_v58 = vpack.i.b16 %v1328_v44, %v1303_v37  ;;  %v1336_v0 = vpack.i.b16 %v1335_v48, %v1334_v46  ;;  %v3790_v53 = vld [vmem:[#allocation13 + $0x38] sm:$0xff]  }
 0x348   : > { %v1356_v60 = vpack.i.b16 %v1329_v50, %v1304_v41  ;;  %v1359_v61 = vshrl.u32 %v1329_v50, 16  ;;  %3599 = vmatprep.subr.bf16.mxu1 %v4248_v4  ;;  %v1352_v1 = vpack.i.b16 %v1351_v57, %v1350_v49  ;;  %v1362_v5 = vcombine.low %v1332_v55, %v1348_v56  ;;  %3612 = vmatpush3.bf16.msra.mxu0 %v3790_v53  ;;  %v3792_v55 = vld [vmem:[#allocation13 + $0x28] sm:$0xff]   ;;  %v3793_v56 = vld [vmem:[#allocation13 + $0x20] sm:$0xff]   ;;  %v3794_v57 = vld [vmem:[#allocation13 + $0x18] sm:$0xff]  }
 0x349   : > { %v1344_v6 = vpack.i.b16 %v1343_v52, %v1342_v47  ;;  %3613 = vmatprep.subr.bf16.mxu0 %v4248_v4 }
 0x34a   : > { %v1360_v7 = vpack.i.b16 %v1359_v61, %v1358_v54  ;;  %v1370_v8 = vcombine.low %v1340_v58, %v1356_v60  ;;  %v1386_v10 = vcombine.low %v1336_v0, %v1352_v1  ;;  %v1369_v12 = vrot.slane %v1362_v5, %v4616_v62  ;;  %v3791_v54 = vld [vmem:[#allocation13 + $0x30] sm:$0xff]   ;;  %v3796_v60 = vld [vmem:[#allocation13 + $0x8] sm:$0xff]   ;;  %v3797_v61 = vld [vmem:[#allocation13] sm:$0xff]  }
 0x34b   : > { %v3795_v58 = vld [vmem:[#allocation13 + $0x10] sm:$0xff]  }
 0x34c   : > { %v1377_v13 = vrot.slane %v1370_v8, %v4616_v62  ;;  %v1394_v14 = vcombine.low %v1344_v6, %v1360_v7  ;;  %v1393_v18 = vrot.slane %v1386_v10, %v4616_v62  ;;  %3614 = vmatpush3.bf16.msra.mxu0 %v3791_v54 }
 0x34d   : > { %3615 = vmatprep.subr.bf16.mxu0 %v4248_v4 }
 0x34e   : > { %v1378_v17 = vcombine.low %v1369_v12, %v1377_v13  ;;  %v1401_v19 = vrot.slane %v1394_v14, %v4616_v62  ;;  %3596 = vmatmul.mubr.msk.bf16.vlgmr.msra.gmra.mxu1 %vm1424_vm2, %v1132_v15 }
 0x34f   : > { %3601 = vmatprep.mubr.msk.bf16.mxu1 %vm4249_vm0, %v4248_v4 }
 0x350   : > { %v1385_v20 = vrot.slane %v1378_v17, %v4621_v2  ;;  %v1402_v21 = vcombine.low %v1393_v18, %v1401_v19  ;;  %3616 = vmatpush3.bf16.msra.mxu0 %v3792_v55 }
 0x351   : > { %3617 = vmatprep.subr.bf16.mxu0 %v4248_v4 }
 0x352   : > { %v1409_v23 = vrot.slane %v1402_v21, %v4621_v2  ;;  %v1414_v25 = vshrl.u32 %v1385_v20, 16 }
 0x354   : > { %v1412_v24 = vpack.i.b16 %v1409_v23, %v1385_v20  ;;  %v1415_v22 = vshrl.u32 %v1409_v23, 16  ;;  %3618 = vmatpush3.bf16.msra.mxu0 %v3793_v56 }
 0x355   : > { %3619 = vmatprep.subr.bf16.mxu0 %v4248_v4 }
 0x356   : > { %v1416_v26 = vpack.i.b16 %v1415_v22, %v1414_v25  ;;  %1418 = vst.msk [vmem:[#allocation3] sm:$0xf] %vm1274_vm1, %v1412_v24 }
 0x358   : > { %1419 = vst.msk [vmem:[#allocation3 + $0x4] sm:$0xf] %vm1274_vm1, %v1416_v26  ;;  %3620 = vmatpush3.bf16.msra.mxu0 %v3794_v57 }
 0x359   : > { %3621 = vmatprep.subr.bf16.mxu0 %v4248_v4 }
 0x35c   : > { %3622 = vmatpush3.bf16.msra.mxu0 %v3795_v58 }
 0x35d   : > { %v1422_v11 = vld [vmem:[#allocation3] sm:$0xf]  ;;  %3623 = vmatprep.subr.bf16.mxu0 %v4248_v4 }
 0x35e   : > { %v1555_v27 = vsel %vm1553_vm3, %v1422_v11, 0 }
 0x35f   : > { %3600 = vmatpush3.bf16.msra.mxu1 %v1555_v27  ;;  %v1423_v45 = vld [vmem:[#allocation3 + $0x4] sm:$0xf] }
 0x360   : > { %3605 = vmatprep.subr.bf16.mxu1 %v4248_v4  ;;  %v1601_v48 = vsel %vm1553_vm3, %v1423_v45, 0  ;;  %3624 = vmatpush3.bf16.msra.mxu0 %v3796_v60 }
 0x361   : > { %3625 = vmatprep.subr.bf16.mxu0 %v4248_v4 }
 0x364   : > { %3626 = vmatpush3.bf16.msra.mxu0 %v3797_v61 }
 0x406   : > { %v1465_v28 = vpop.f32.mrf.mxu1 }
 0x407   : > { %v1518_v29 = vsel %vm1517_vm4, %v1465_v28, -inf }
 0x408   : > { %1519 = vmax.xlane.f32.xlu1 %v1518_v29  ;;  %v3591_v16 = vpop.f32.mrf.mxu1 }
 0x40a   : > { %v1468_v30 = vpop.f32.mrf.mxu1 }
 0x40c   : > { %v3592_v31 = vpop.f32.mrf.mxu1 }
 0x40e   : > { %v1511_v32 = vpop.f32.mrf.mxu1 }
 0x40f   : > { %v1521_v51 = vsel %vm1517_vm4, %v1511_v32, -inf }
 0x410   : > { %v3597_v33 = vpop.f32.mrf.mxu1  ;;  %1522 = vmax.xlane.f32.xlu0 %v1521_v51 }
 0x412   : > { %v1514_v34 = vpop.f32.mrf.mxu1 }
 0x414   : > { %v3598_v35 = vpop.f32.mrf.mxu1 }
 0x491   : > { %v1520_v36 = vpop.xlane.xlu1 %1519 }
 0x492   : > { %v1524_v37 = vmax.f32 %v1520_v36, -3.4028235e+38 }
 0x494   : > { %v1532_v38 = vsub.f32 %v1465_v28, %v1524_v37  ;;  %v1526_v63 = vsub.f32 -3.4028235e+38, %v1524_v37 }
 0x496   : > { %v1534_v39 = vmul.f32 1.442695, %v1532_v38  ;;  %v1528_v0 = vmul.f32 1.442695, %v1526_v63 }
 0x498   : > { %3896 = vpow2.f32 %v1534_v39 }
 0x499   : > { %v1523_v40 = vpop.xlane.xlu0 %1522 }
 0x49a   : > { %v1525_v41 = vmax.f32 %v1523_v40, -3.4028235e+38 }
 0x49c   : > { %v1533_v42 = vsub.f32 %v1511_v32, %v1525_v41  ;;  %v1527_v1 = vsub.f32 -3.4028235e+38, %v1525_v41 }
 0x49e   : > { %v1536_v43 = vmul.f32 1.442695, %v1533_v42  ;;  %v1530_v5 = vmul.f32 1.442695, %v1527_v1 }
 0x4a0   : > { %3898 = vpow2.f32 %v1536_v43 }
 0x4a1   : > { %3900 = vpow2.f32 %v1528_v0 }
 0x4a2   : > { %3902 = vpow2.f32 %v1530_v5 }
 0x4a5   : > { %v3897_v44 = vpop.eup %3896 }
 0x4a6   : > { %v1540_v46 = vsel %vm1517_vm4, %v3897_v44, 0.0  ;;  %v1548_v47 = vpack.c.bf16 %v3897_v44, %v3897_v44 }
 0x4a7   : > { %1541 = vadd.xlane.f32.xlu1 %v1540_v46 }
 0x4a8   : > { %3602 = vmatmul.mubr.msk.bf16.vlgmr.msra.gmra.mxu1 %vm1517_vm4, %v1548_v47 }
 0x4a9   : > { %3606 = vmatpush3.bf16.msra.mxu1 %v1601_v48  ;;  %3607 = vmatprep.mubr.msk.bf16.mxu1 %vm4249_vm0, %v4248_v4 }
 0x4ad   : > { %v3899_v49 = vpop.eup %3898 }
 0x4ae   : > { %v1543_v50 = vsel %vm1517_vm4, %v3899_v49, 0.0  ;;  %v1549_v52 = vpack.c.bf16 %v3899_v49, %v3899_v49  ;;  %v3901_v6 = vpop.eup %3900 }
 0x4af   : > { %1544 = vadd.xlane.f32.xlu1 %v1543_v50  ;;  %v1538_v8 = vmul.f32 0.0, %v3901_v6  ;;  %v3903_v10 = vpop.eup %3902 }
 0x4b0   : > { %3608 = vmatmul.mubr.msk.bf16.vlgmr.msra.gmra.mxu1 %vm1517_vm4, %v1549_v52  ;;  %v1539_v13 = vmul.f32 0.0, %v3903_v10 }
 0x530   : > { %v1542_v7 = vpop.xlane.xlu1 %1541 }
 0x531   : > { %v1546_v9 = vadd.f32 %v1542_v7, %v1538_v8 }
 0x533   : > { %3904 = vrcp.f32 %v1546_v9 }
 0x538   : > { %v1545_v12 = vpop.xlane.xlu1 %1544 }
 0x539   : > { %v1547_v14 = vadd.f32 %v1545_v12, %v1539_v13 }
 0x53b   : > { %3906 = vrcp.f32 %v1547_v14 }
 0x540   : > { %v3905_v4 = vpop.eup %3904 }
 0x548   : > { %v3907_v26 = vpop.eup %3906 }
 0x568   : > { %v1591_v15 = vpop.f32.mrf.mxu1 }
 0x569   : > { %v1643_v17 = vadd.f32 %v1591_v15, %v1538_v8 }
 0x56a   : > { %v3603_v18 = vpop.f32.mrf.mxu1 }
 0x56b   : > { %v1647_v19 = vmul.f32 %v3905_v4, %v1643_v17 }
 0x56c   : > { %v1594_v20 = vpop.f32.mrf.mxu1 }
 0x56d   : > { %v1649_v21 = vpack.c.bf16 %v1647_v19, %v1647_v19  ;;  %v3918_v19 = vld [vmem:[%s4545_s6] sm:$0xff] }
 0x56e   : > { %v3604_v23 = vpop.f32.mrf.mxu1 }
 0x56f   : > { %v1656_v24 = vrot.slane %v1649_v21, %v4616_v62  ;;  %v3798_v23 = vld [vmem:[#allocation15 + $0x78] sm:$0xff]  }
 0x570   : > { %v1637_v25 = vpop.f32.mrf.mxu1  ;;  %3411 = vmatprep.subr.bf16.mxu1 %v3798_v23  ;;  %v3846_v23 = vld [vmem:[#allocation16 + $0x58] sm:$0xff]  }
 0x571   : > { %v1644_v22 = vadd.f32 %v1637_v25, %v1539_v13  ;;  %v1657_v11 = vcombine.high %v1656_v24, %v4253_v3  ;;  %v1664_v29 = vrot.slane %v1656_v24, %v4621_v2  ;;  %v3799_v24 = vld [vmem:[#allocation15 + $0xf8] sm:$0xff]  }
 0x572   : > { %v3609_v27 = vpop.f32.mrf.mxu1  ;;  %v3800_v25 = vld [vmem:[#allocation15 + $0x38] sm:$0xff]   ;;  %3429 = vmatprep.subr.bf16.mxu0 %v3799_v24 }
 0x573   : > { %v1648_v28 = vmul.f32 %v3907_v26, %v1644_v22  ;;  %v1671_v31 = vrot.slane %v1657_v11, %v4621_v2  ;;  %v1672_v33 = vcombine.high %v1664_v29, %v4253_v3  ;;  %v1703_v37 = vshrl.u32 %v1664_v29, 16  ;;  %v3801_v22 = vld [vmem:[#allocation15 + $0xb8] sm:$0xff]   ;;  %v3802_v26 = vld [vmem:[#allocation15 + $0x70] sm:$0xff]   ;;  %3412 = vmatpush3.bf16.xpose.msra.mxu1 %v3800_v25 }
 0x574   : > { %v1640_v16 = vpop.f32.mrf.mxu1  ;;  %v3803_v11 = vld [vmem:[#allocation15 + $0xf0] sm:$0xff]   ;;  %3413 = vmatprep.subr.bf16.mxu1 %v3802_v26  ;;  %v3847_v24 = vld [vmem:[#allocation16 + $0xd8] sm:$0xff]  }
 0x575   : > { %v1674_v30 = vpack.c.bf16 %v1648_v28, %v1648_v28  ;;  %v1673_v36 = vcombine.high %v1671_v31, %v4253_v3  ;;  %v1711_v42 = vshrl.u32 %v1672_v33, 16  ;;  %v1719_v47 = vshrl.u32 %v1671_v31, 16  ;;  %v3804_v27 = vld [vmem:[#allocation15 + $0x30] sm:$0xff]   ;;  %v3807_v16 = vld [vmem:[#allocation15 + $0xe8] sm:$0xff]   ;;  %v3848_v25 = vld [vmem:[#allocation16 + $0x18] sm:$0xff]  }
 0x576   : > { %v3610_v32 = vpop.f32.mrf.mxu1  ;;  %v3805_v28 = vld [vmem:[#allocation15 + $0xb0] sm:$0xff]  }
 0x577   : > { %v1681_v51 = vrot.slane %v1674_v30, %v4616_v62  ;;  %v1727_v50 = vshrl.u32 %v1673_v36, 16  ;;  %v3808_v30 = vld [vmem:[#allocation15 + $0x28] sm:$0xff]   ;;  %v3810_v32 = vld [vmem:[#allocation15 + $0x60] sm:$0xff]   ;;  %v3850_v26 = vld [vmem:[#allocation16 + $0x50] sm:$0xff]  }
 0x579   : > { %v1682_v34 = vcombine.high %v1681_v51, %v4253_v3  ;;  %v1689_v35 = vrot.slane %v1681_v51, %v4621_v2  ;;  %v3811_v51 = vld [vmem:[#allocation15 + $0xe0] sm:$0xff]  }
 0x57b   : > { %v1696_v38 = vrot.slane %v1682_v34, %v4621_v2  ;;  %v1697_v39 = vcombine.high %v1689_v35, %v4253_v3  ;;  %v1701_v40 = vpack.i.b16 %v1689_v35, %v1664_v29  ;;  %v1704_v41 = vshrl.u32 %v1689_v35, 16  ;;  %v3806_v29 = vld [vmem:[#allocation15 + $0x68] sm:$0xff]   ;;  %3414 = vmatpush3.bf16.xpose.msra.mxu1 %v3804_v27  ;;  %v3813_v34 = vld [vmem:[#allocation15 + $0xa0] sm:$0xff]   ;;  %v3814_v35 = vld [vmem:[#allocation15 + $0x58] sm:$0xff]  }
 0x57c   : > { %3415 = vmatprep.subr.bf16.mxu1 %v3806_v29  ;;  %v3852_v27 = vld [vmem:[#allocation16 + $0x10] sm:$0xff]   ;;  %v3854_v29 = vld [vmem:[#allocation16 + $0x48] sm:$0xff]  }
 0x57d   : > { %v1698_v43 = vcombine.high %v1696_v38, %v4253_v3  ;;  %v1705_v44 = vpack.i.b16 %v1704_v41, %v1703_v37  ;;  %v1709_v45 = vpack.i.b16 %v1697_v39, %v1672_v33  ;;  %v1712_v46 = vshrl.u32 %v1697_v39, 16  ;;  %v3812_v33 = vld [vmem:[#allocation15 + $0x20] sm:$0xff]   ;;  %v3816_v37 = vld [vmem:[#allocation15 + $0x18] sm:$0xff]  }
 0x57e   : > { %v1717_v48 = vpack.i.b16 %v1696_v38, %v1671_v31  ;;  %v1720_v49 = vshrl.u32 %v1696_v38, 16  ;;  %v3809_v31 = vld [vmem:[#allocation15 + $0xa8] sm:$0xff]   ;;  %v3817_v38 = vld [vmem:[#allocation15 + $0x98] sm:$0xff]  }
 0x57f   : > { %v1713_v52 = vpack.i.b16 %v1712_v46, %v1711_v42  ;;  %v1725_v53 = vpack.i.b16 %v1698_v43, %v1673_v36  ;;  %v1728_v54 = vshrl.u32 %v1698_v43, 16  ;;  %v3815_v36 = vld [vmem:[#allocation15 + $0xd8] sm:$0xff]   ;;  %v3818_v43 = vld [vmem:[#allocation15 + $0x50] sm:$0xff]  }
 0x580   : > { %v1721_v55 = vpack.i.b16 %v1720_v49, %v1719_v47  ;;  %v1731_v56 = vcombine.low %v1701_v40, %v1717_v48  ;;  %v3821_v46 = vld [vmem:[#allocation15 + $0x90] sm:$0xff]   ;;  %v3822_v47 = vld [vmem:[#allocation15 + $0x48] sm:$0xff]  }
 0x581   : > { %v1729_v57 = vpack.i.b16 %v1728_v54, %v1727_v50  ;;  %v1739_v58 = vcombine.low %v1709_v45, %v1725_v53  ;;  %v3820_v45 = vld [vmem:[#allocation15 + $0x10] sm:$0xff]   ;;  %v3823_v48 = vld [vmem:[#allocation15 + $0xc8] sm:$0xff]   ;;  %v3827_v53 = vld [vmem:[#allocation15 + $0xc0] sm:$0xff]  }
 0x582   : > { %v1755_v60 = vcombine.low %v1705_v44, %v1721_v55  ;;  %v1738_v61 = vrot.slane %v1731_v56, %v4616_v62  ;;  %v3819_v44 = vld [vmem:[#allocation15 + $0xd0] sm:$0xff]   ;;  %v3824_v49 = vld [vmem:[#allocation15 + $0x8] sm:$0xff]   ;;  %v3828_v54 = vld [vmem:[#allocation15] sm:$0xff]  }
 0x583   : > { %v1746_v63 = vrot.slane %v1739_v58, %v4616_v62  ;;  %v1763_v3 = vcombine.low %v1713_v52, %v1729_v57  ;;  %3416 = vmatpush3.bf16.xpose.msra.mxu1 %v3808_v30  ;;  %v3825_v50 = vld [vmem:[#allocation15 + $0x88] sm:$0xff]   ;;  %v3826_v52 = vld [vmem:[#allocation15 + $0x40] sm:$0xff]   ;;  %v3830_v56 = vld [vmem:[#allocation16 + $0x78] sm:$0xff]  }
 0x584   : > { %v1762_v1 = vrot.slane %v1755_v60, %v4616_v62  ;;  %3417 = vmatprep.subr.bf16.mxu1 %v3810_v32  ;;  %v3829_v55 = vld [vmem:[#allocation15 + $0x80] sm:$0xff]   ;;  %v3831_v57 = vld [vmem:[#allocation16 + $0xf8] sm:$0xff]   ;;  %v3856_v30 = vld [vmem:[#allocation16 + $0x8] sm:$0xff]  }
 0x585   : > { %v1747_v0 = vcombine.low %v1738_v61, %v1746_v63  ;;  %v1770_v5 = vrot.slane %v1763_v3, %v4616_v62  ;;  %v3255_v62 = vld [vmem:[%s4831_s7] ss:$0 sm:$0xff]  ;;  %v3858_v32 = vld [vmem:[#allocation16 + $0x40] sm:$0xff]  }
 0x586   : > { %v3264_v3 = vld [vmem:[%s4832_s8] ss:$0 sm:$0xff] }
 0x587   : > { %v1754_v6 = vrot.slane %v1747_v0, %v4621_v2  ;;  %v1771_v7 = vcombine.low %v1762_v1, %v1770_v5  ;;  %v3265_v1 = vld [vmem:[%s4833_s9] ss:$0 sm:$0xff] }
 0x589   : > { %v1778_v8 = vrot.slane %v1771_v7, %v4621_v2  ;;  %v1782_v9 = vshrl.u32 %v1754_v6, 16 }
 0x58b   : > { %v1783_v10 = vshrl.u32 %v1778_v8, 16  ;;  %v1781_v12 = vpack.i.b16 %v1778_v8, %v1754_v6  ;;  %3418 = vmatpush3.bf16.xpose.msra.mxu1 %v3812_v33  ;;  %v3832_v8 = vld [vmem:[#allocation16 + $0x38] sm:$0xff]   ;;  %v3860_v33 = vld [vmem:[#allocation16] sm:$0xff]  }
 0x58c   : > { %3419 = vmatprep.subr.bf16.mxu1 %v3814_v35  ;;  %v3862_v35 = vld [vmem:[#allocation18 + $0x78] sm:$0xff]  }
 0x58d   : > { %v1784_v13 = vpack.i.b16 %v1783_v10, %v1782_v9  ;;  %v3833_v9 = vld [vmem:[#allocation16 + $0xb8] sm:$0xff]   ;;  %v3834_v10 = vld [vmem:[#allocation16 + $0x70] sm:$0xff]  }
 0x58f   : > { %1785 = vrot.lane.b32.xlu1 %v1784_v13, %s4250_s10  ;;  %v3836_v13 = vld [vmem:[#allocation16 + $0x30] sm:$0xff]   ;;  %s650_s10 = scalar_lea.vmem [#allocation19], %s3224_s3 }
 0x590   : > { %s3055_s11 = sshll.u32 %s650_s10, 4  ;;  %s3056_s11 = int_to_ptr.vmem [resolvable:$true] %s3055_s11 }
 0x591   : > { %s4155_s0 = scalar_lea.vmem %s3056_s11, 64  ;;  %p4162_p13 = scmp.lt.s32.totalorder %s3056_s11, %s4160_s25 }
 0x592   : > { %p4156_p0 = scmp.ne.s32.totalorder %s3056_s11, %s4155_s0  ;;  %p4163_p1 = scmp.lt.s32.totalorder %s4161_s27, %s4155_s0 }
 0x593   : > { %3420 = vmatpush3.bf16.xpose.msra.mxu1 %v3816_v37  ;;  %v3864_v37 = vld [vmem:[#allocation18 + $0x38] sm:$0xff]  }
 0x594   : > { %3421 = vmatprep.subr.bf16.mxu1 %v3818_v43  ;;  %v3870_v43 = vld [vmem:[#allocation18 + $0x68] sm:$0xff]   ;;  %p4157_p9 = pnand %p4156_p0, %p4888_p5  ;;  %p4164_p3 = por %p4163_p1, %p4162_p13 }
 0x596   : > { %p4158_p12 = pneg %p4157_p9 }
 0x598   : > { %p4165_p4 = pnand %p4164_p3, %p4158_p12 }
 0x59b   : > { %3422 = vmatpush3.bf16.xpose.msra.mxu1 %v3820_v45  ;;  %v3872_v45 = vld [vmem:[#allocation18 + $0x28] sm:$0xff]  }
 0x59c   : > { %3423 = vmatprep.subr.bf16.mxu1 %v3822_v47  ;;  %v3874_v47 = vld [vmem:[#allocation18 + $0x60] sm:$0xff]  }
 0x5a3   : > { %3424 = vmatpush3.bf16.xpose.msra.mxu1 %v3824_v49  ;;  %v3876_v49 = vld [vmem:[#allocation18 + $0x20] sm:$0xff]  }
 0x5a4   : > { %3425 = vmatprep.subr.bf16.mxu1 %v3826_v52  ;;  %v3878_v52 = vld [vmem:[#allocation18 + $0x58] sm:$0xff]  }
 0x5ab   : > { %3426 = vmatpush3.bf16.xpose.msra.mxu1 %v3828_v54  ;;  %v3880_v54 = vld [vmem:[#allocation18 + $0x18] sm:$0xff]  }
 0x5ac   : > { %3447 = vmatprep.subr.bf16.mxu1 %v3830_v56  ;;  %v3882_v56 = vld [vmem:[#allocation18 + $0x50] sm:$0xff]  }
 0x601   : > { %v1786_v14 = vpop.permute.xlu1 %1785 }
 0x602   : > { %v1789_v15 = vsel %vm1424_vm2, %v1781_v12, %v1786_v14  ;;  %v3835_v12 = vld [vmem:[#allocation16 + $0xf0] sm:$0xff]  }
 0x603   : > { %3628 = vmatmul.mubr.bf16.vlgmr.msra.gmra.mxu0 %v1789_v15  ;;  %v3837_v14 = vld [vmem:[#allocation16 + $0xb0] sm:$0xff]   ;;  %v3838_v15 = vld [vmem:[#allocation16 + $0x68] sm:$0xff]  }
 0x604   : > { %3430 = vmatpush3.bf16.xpose.msra.mxu0 %v3801_v22  ;;  %v3849_v22 = vld [vmem:[#allocation16 + $0x98] sm:$0xff]  }
 0x605   : > { %3431 = vmatprep.subr.bf16.mxu0 %v3803_v11  ;;  %v3851_v11 = vld [vmem:[#allocation16 + $0xd0] sm:$0xff]  }
 0x60c   : > { %3432 = vmatpush3.bf16.xpose.msra.mxu0 %v3805_v28  ;;  %v3853_v28 = vld [vmem:[#allocation16 + $0x90] sm:$0xff]  }
 0x60d   : > { %3433 = vmatprep.subr.bf16.mxu0 %v3807_v16  ;;  %v3855_v16 = vld [vmem:[#allocation16 + $0xc8] sm:$0xff]  }
 0x614   : > { %3434 = vmatpush3.bf16.xpose.msra.mxu0 %v3809_v31  ;;  %v3857_v31 = vld [vmem:[#allocation16 + $0x88] sm:$0xff]  }
 0x615   : > { %3435 = vmatprep.subr.bf16.mxu0 %v3811_v51  ;;  %v3859_v51 = vld [vmem:[#allocation16 + $0xc0] sm:$0xff]  }
 0x61c   : > { %3436 = vmatpush3.bf16.xpose.msra.mxu0 %v3813_v34  ;;  %v3861_v34 = vld [vmem:[#allocation16 + $0x80] sm:$0xff]  }
 0x61d   : > { %3437 = vmatprep.subr.bf16.mxu0 %v3815_v36  ;;  %v3863_v36 = vld [vmem:[#allocation18 + $0xf8] sm:$0xff]  }
 0x624   : > { %3438 = vmatpush3.bf16.xpose.msra.mxu0 %v3817_v38  ;;  %v3865_v38 = vld [vmem:[#allocation18 + $0xb8] sm:$0xff]  }
 0x625   : > { %3439 = vmatprep.subr.bf16.mxu0 %v3819_v44  ;;  %v3871_v44 = vld [vmem:[#allocation18 + $0xe8] sm:$0xff]  }
 0x62c   : > { %3440 = vmatpush3.bf16.xpose.msra.mxu0 %v3821_v46  ;;  %v3873_v46 = vld [vmem:[#allocation18 + $0xa8] sm:$0xff]  }
 0x62d   : > { %3441 = vmatprep.subr.bf16.mxu0 %v3823_v48  ;;  %v3875_v48 = vld [vmem:[#allocation18 + $0xe0] sm:$0xff]  }
 0x634   : > { %3442 = vmatpush3.bf16.xpose.msra.mxu0 %v3825_v50  ;;  %v3877_v50 = vld [vmem:[#allocation18 + $0xa0] sm:$0xff]  }
 0x635   : > { %3443 = vmatprep.subr.bf16.mxu0 %v3827_v53  ;;  %v3879_v53 = vld [vmem:[#allocation18 + $0xd8] sm:$0xff]  }
 0x63c   : > { %3444 = vmatpush3.bf16.xpose.msra.mxu0 %v3829_v55  ;;  %v3881_v55 = vld [vmem:[#allocation18 + $0x98] sm:$0xff]  }
 0x63d   : > { %3465 = vmatprep.subr.bf16.mxu0 %v3831_v57  ;;  %v3883_v57 = vld [vmem:[#allocation18 + $0xd0] sm:$0xff]  }
 0x6c3   : > { %v1896_v17 = vpop.f32.mrf.mxu0 }
 0x6c4   : > { %v1897_v4 = vadd.f32 %v3255_v62, %v1896_v17  ;;  %v3839_v62 = vld [vmem:[#allocation16 + $0xe8] sm:$0xff]  }
 0x6c5   : > { %v3629_v18 = vpop.f32.mrf.mxu0  ;;  %v3840_v17 = vld [vmem:[#allocation16 + $0x28] sm:$0xff]  }
 0x6c6   : > { %v4742_v20 = vadd.f32 %v3918_v19, %v1897_v4  ;;  %v3841_v4 = vld [vmem:[#allocation16 + $0xa8] sm:$0xff]   ;;  %v3842_v18 = vld [vmem:[#allocation16 + $0x60] sm:$0xff]  }
 0x6c7   : > { %v1899_v2 = vpop.f32.mrf.mxu0  ;;  %v3843_v19 = vld [vmem:[#allocation16 + $0xe0] sm:$0xff]  }
 0x6c8   : > { %1905 = vadd.xlane.f32.xlu0 %v4742_v20  ;;  %v3844_v2 = vld [vmem:[#allocation16 + $0x20] sm:$0xff]  }
 0x6c9   : > { %v3630_v21 = vpop.f32.mrf.mxu0 }
 0x6ca   : > { %v3845_v21 = vld [vmem:[#allocation16 + $0xa0] sm:$0xff]  }
 0x751   : > { %v1906_v39 = vpop.xlane.xlu0 %1905 }
 0x752   : > { %v1907_v40 = vmul.f32 0.0078125, %v1906_v39  ;;  %v3866_v39 = vld [vmem:[#allocation18 + $0x70] sm:$0xff]  }
 0x754   : > { %v1908_v41 = vsub.f32 %v4742_v20, %v1907_v40  ;;  %v3867_v40 = vld [vmem:[#allocation18 + $0xf0] sm:$0xff]  }
 0x756   : > { %v1909_v42 = vmul.f32 %v1908_v41, %v1908_v41 }
 0x758   : > { %1910 = vadd.xlane.f32.xlu0 %v1909_v42  ;;  %v3869_v42 = vld [vmem:[#allocation18 + $0xb0] sm:$0xff]  }
 0x7e1   : > { %v1911_v58 = vpop.xlane.xlu0 %1910 }
 0x7e2   : > { %v1912_v60 = vmul.f32 0.0078125, %v1911_v58  ;;  %v3884_v58 = vld [vmem:[#allocation18 + $0x10] sm:$0xff]  }
 0x7e4   : > { %v1913_v61 = vadd.f32 1e-05, %v1912_v60  ;;  %v3885_v60 = vld [vmem:[#allocation18 + $0x90] sm:$0xff]  }
 0x7e6   : > { %3908 = vrsqrt.f32 %v1913_v61  ;;  %v3886_v61 = vld [vmem:[#allocation18 + $0x48] sm:$0xff]  }
 0x7f3   : > { %v3909_v63 = vpop.eup %3908 }
 0x7f4   : > { %v1915_v0 = vmul.f32 %v3909_v63, %v1908_v41  ;;  %v3868_v41 = vld [vmem:[#allocation18 + $0x30] sm:$0xff]   ;;  %v3887_v63 = vld [vmem:[#allocation18 + $0xc8] sm:$0xff]  }
 0x7f6   : > { %v1922_v5 = vmul.f32 %v3264_v3, %v1915_v0  ;;  %v3888_v3 = vld [vmem:[#allocation18 + $0x8] sm:$0xff]  }
 0x7f7   : > { %v3889_v0 = vld [vmem:[#allocation18 + $0x88] sm:$0xff]  }
 0x7f8   : > { %v1929_v6 = vadd.f32 %v3265_v1, %v1922_v5  ;;  %v3890_v1 = vld [vmem:[#allocation18 + $0x40] sm:$0xff]  }
 0x7f9   : > { %v3891_v5 = vld [vmem:[#allocation18 + $0xc0] sm:$0xff]  }
 0x7fa   : > { %v4752_v7 = vpack.c.bf16 %v1929_v6, %v1929_v6  ;;  %v3892_v6 = vld [vmem:[#allocation18] sm:$0xff]  }
 0x7fc   : > { %3427 = vmatprep.mubr.bf16.mxu1 %v4752_v7  ;;  %3445 = vmatprep.mubr.bf16.mxu0 %v4752_v7 }
 0x7fd   : > { %3428 = vmatmul.mubr.bf16.vlgmr.msra.gmra.mxu1 %v4752_v7  ;;  %3446 = vmatmul.mubr.bf16.vlgmr.msra.gmra.mxu0 %v4752_v7 }
 0x7fe   : > { %3448 = vmatpush3.bf16.xpose.msra.mxu1 %v3832_v8  ;;  %3466 = vmatpush3.bf16.xpose.msra.mxu0 %v3833_v9 }
 0x7ff   : > { %3463 = vmatprep.mubr.bf16.mxu1 %v4752_v7  ;;  %3481 = vmatprep.mubr.bf16.mxu0 %v4752_v7 }
 0x800   : > { %3449 = vmatprep.subr.bf16.mxu1 %v3834_v10  ;;  %3467 = vmatprep.subr.bf16.mxu0 %v3835_v12 }
 0x806   : > { %3450 = vmatpush3.bf16.xpose.msra.mxu1 %v3836_v13  ;;  %3468 = vmatpush3.bf16.xpose.msra.mxu0 %v3837_v14 }
 0x807   : > { %3451 = vmatprep.subr.bf16.mxu1 %v3838_v15  ;;  %3469 = vmatprep.subr.bf16.mxu0 %v3839_v62 }
 0x80e   : > { %3452 = vmatpush3.bf16.xpose.msra.mxu1 %v3840_v17  ;;  %3470 = vmatpush3.bf16.xpose.msra.mxu0 %v3841_v4  ;;  %v2355_v17 = vld [vmem:[%s4837_s13] sm:$0xf]  ;;  %v2063_v4 = vsub.s32 0, %v4613_v59 }
 0x80f   : > { %3453 = vmatprep.subr.bf16.mxu1 %v3842_v18  ;;  %3471 = vmatprep.subr.bf16.mxu0 %v3843_v19  ;;  %v2071_v18 = vsub.s32 2, %v4613_v59  ;;  %v2067_v19 = vsub.s32 1, %v4613_v59 }
 0x816   : > { %3454 = vmatpush3.bf16.xpose.msra.mxu1 %v3844_v2  ;;  %3472 = vmatpush3.bf16.xpose.msra.mxu0 %v3845_v21  ;;  %v2075_v2 = vsub.s32 3, %v4613_v59  ;;  %v2360_v21 = vrot.slane %v2355_v17, %v2063_v4 }
 0x817   : > { %3455 = vmatprep.subr.bf16.mxu1 %v3846_v23  ;;  %3473 = vmatprep.subr.bf16.mxu0 %v3847_v24  ;;  %v2368_v23 = vrot.slane %v2355_v17, %v2071_v18  ;;  %v2364_v24 = vrot.slane %v2355_v17, %v2067_v19 }
 0x81e   : > { %3456 = vmatpush3.bf16.xpose.msra.mxu1 %v3848_v25  ;;  %3474 = vmatpush3.bf16.xpose.msra.mxu0 %v3849_v22  ;;  %v2372_v25 = vrot.slane %v2355_v17, %v2075_v2 }
 0x81f   : > { %3457 = vmatprep.subr.bf16.mxu1 %v3850_v26  ;;  %3475 = vmatprep.subr.bf16.mxu0 %v3851_v11 }
 0x826   : > { %3458 = vmatpush3.bf16.xpose.msra.mxu1 %v3852_v27  ;;  %3476 = vmatpush3.bf16.xpose.msra.mxu0 %v3853_v28 }
 0x827   : > { %3459 = vmatprep.subr.bf16.mxu1 %v3854_v29  ;;  %3477 = vmatprep.subr.bf16.mxu0 %v3855_v16 }
 0x82e   : > { %3460 = vmatpush3.bf16.xpose.msra.mxu1 %v3856_v30  ;;  %3478 = vmatpush3.bf16.xpose.msra.mxu0 %v3857_v31 }
 0x82f   : > { %3461 = vmatprep.subr.bf16.mxu1 %v3858_v32  ;;  %3479 = vmatprep.subr.bf16.mxu0 %v3859_v51 }
 0x836   : > { %3462 = vmatpush3.bf16.xpose.msra.mxu1 %v3860_v33  ;;  %3480 = vmatpush3.bf16.xpose.msra.mxu0 %v3861_v34 }
 0x837   : > { %3483 = vmatprep.subr.bf16.mxu1 %v3862_v35  ;;  %3505 = vmatprep.subr.bf16.mxu0 %v3863_v36 }
 0x83d   : > { %3464 = vmatmul.mubr.bf16.vlgmr.msra.gmra.mxu1 %v4752_v7  ;;  %3482 = vmatmul.mubr.bf16.vlgmr.msra.gmra.mxu0 %v4752_v7  ;;  %v3893_v7 = vld [vmem:[#allocation18 + $0x80] sm:$0xff]  }
 0x83e   : > { %3484 = vmatpush3.bf16.msra.mxu1 %v3864_v37  ;;  %3506 = vmatpush3.bf16.msra.mxu0 %v3865_v38 }
 0x83f   : > { %3485 = vmatprep.subr.bf16.mxu1 %v3866_v39  ;;  %3507 = vmatprep.subr.bf16.mxu0 %v3867_v40 }
 0x842   : > { %3486 = vmatpush3.bf16.msra.mxu1 %v3868_v41  ;;  %3508 = vmatpush3.bf16.msra.mxu0 %v3869_v42 }
 0x843   : > { %3487 = vmatprep.subr.bf16.mxu1 %v3870_v43  ;;  %3509 = vmatprep.subr.bf16.mxu0 %v3871_v44 }
 0x846   : > { %3488 = vmatpush3.bf16.msra.mxu1 %v3872_v45  ;;  %3510 = vmatpush3.bf16.msra.mxu0 %v3873_v46 }
 0x847   : > { %3489 = vmatprep.subr.bf16.mxu1 %v3874_v47  ;;  %3511 = vmatprep.subr.bf16.mxu0 %v3875_v48 }
 0x84a   : > { %3490 = vmatpush3.bf16.msra.mxu1 %v3876_v49  ;;  %3512 = vmatpush3.bf16.msra.mxu0 %v3877_v50 }
 0x84b   : > { %3491 = vmatprep.subr.bf16.mxu1 %v3878_v52  ;;  %3513 = vmatprep.subr.bf16.mxu0 %v3879_v53 }
 0x84e   : > { %3492 = vmatpush3.bf16.msra.mxu1 %v3880_v54  ;;  %3514 = vmatpush3.bf16.msra.mxu0 %v3881_v55  ;;  %v2059_v54 = vld [vmem:[%s4836_s12] sm:$0xf] }
 0x84f   : > { %3493 = vmatprep.subr.bf16.mxu1 %v3882_v56  ;;  %3515 = vmatprep.subr.bf16.mxu0 %v3883_v57 }
 0x852   : > { %3494 = vmatpush3.bf16.msra.mxu1 %v3884_v58  ;;  %3516 = vmatpush3.bf16.msra.mxu0 %v3885_v60  ;;  %v2064_v60 = vrot.slane %v2059_v54, %v2063_v4 }
 0x853   : > { %3495 = vmatprep.subr.bf16.mxu1 %v3886_v61  ;;  %3517 = vmatprep.subr.bf16.mxu0 %v3887_v63 }
 0x856   : > { %3496 = vmatpush3.bf16.msra.mxu1 %v3888_v3  ;;  %3518 = vmatpush3.bf16.msra.mxu0 %v3889_v0  ;;  %v2072_v3 = vrot.slane %v2059_v54, %v2071_v18  ;;  %v2068_v0 = vrot.slane %v2059_v54, %v2067_v19 }
 0x857   : > { %3497 = vmatprep.subr.bf16.mxu1 %v3890_v1  ;;  %3519 = vmatprep.subr.bf16.mxu0 %v3891_v5 }
 0x85a   : > { %3498 = vmatpush3.bf16.msra.mxu1 %v3892_v6  ;;  %3520 = vmatpush3.bf16.msra.mxu0 %v3893_v7  ;;  %v2076_v6 = vrot.slane %v2059_v54, %v2075_v2 }
 0x8bd   : > { %v4762_v8 = vpop.f32.mrf.mxu1  ;;  %v4764_v9 = vpop.f32.mrf.mxu0 }
 0x8bf   : > { %v4766_v10 = vpop.f32.mrf.mxu1  ;;  %v4768_v12 = vpop.f32.mrf.mxu0 }
 0x8c1   : > { %v2311_v13 = vpop.f32.mrf.mxu1  ;;  %v2352_v14 = vpop.f32.mrf.mxu0 }
 0x8c3   : > { %v2312_v15 = vpop.f32.mrf.mxu1  ;;  %v2353_v62 = vpop.f32.mrf.mxu0 }
 0x8c4   : > { %v2308_v62 = vadd.f32 %v4762_v8, %v2064_v60 }
 0x8fd   : > { %v2603_v22 = vpop.f32.mrf.mxu1  ;;  %v2644_v26 = vpop.f32.mrf.mxu0 }
 0x8fe   : > { %v2604_v11 = vadd.f32 %v2603_v22, %v2360_v21  ;;  %v2645_v27 = vadd.f32 %v2644_v26, %v2368_v23  ;;  %v2349_v23 = vadd.f32 %v4764_v9, %v2072_v3 }
 0x8ff   : > { %v2605_v28 = vpop.f32.mrf.mxu1  ;;  %v2646_v29 = vpop.f32.mrf.mxu0 }
 0x900   : > { %v2651_v16 = vmul.f32 %v2604_v11, %v2604_v11  ;;  %v2653_v30 = vmul.f32 %v2645_v27, %v2645_v27  ;;  %v2606_v31 = vadd.f32 %v2605_v28, %v2364_v24  ;;  %v2647_v32 = vadd.f32 %v2646_v29, %v2372_v25 }
 0x901   : > { %v2607_v51 = vpop.f32.mrf.mxu1  ;;  %v2648_v33 = vpop.f32.mrf.mxu0  ;;  %v2310_v24 = vadd.f32 %v4766_v10, %v2068_v0  ;;  %v2351_v25 = vadd.f32 %v4768_v12, %v2076_v6  ;;  %v3330_v12 = vld [vmem:[%s4839_s15] ss:$0 sm:$0xff] }
 0x902   : > { %v2655_v34 = vmul.f32 %v2651_v16, %v2604_v11  ;;  %v2657_v35 = vmul.f32 %v2653_v30, %v2645_v27  ;;  %v2652_v36 = vmul.f32 %v2606_v31, %v2606_v31  ;;  %v2654_v59 = vmul.f32 %v2647_v32, %v2647_v32 }
 0x903   : > { %v2608_v37 = vpop.f32.mrf.mxu1  ;;  %v2649_v38 = vpop.f32.mrf.mxu0 }
 0x904   : > { %v2659_v39 = vmul.f32 0.044715, %v2655_v34  ;;  %v2661_v40 = vmul.f32 0.044715, %v2657_v35  ;;  %v2656_v41 = vmul.f32 %v2652_v36, %v2606_v31  ;;  %v2658_v42 = vmul.f32 %v2654_v59, %v2647_v32 }
 0x906   : > { %v2663_v43 = vadd.f32 %v2659_v39, %v2604_v11  ;;  %v2665_v44 = vadd.f32 %v2661_v40, %v2645_v27  ;;  %v2660_v45 = vmul.f32 0.044715, %v2656_v41  ;;  %v2662_v46 = vmul.f32 0.044715, %v2658_v42 }
 0x908   : > { %v2667_v47 = vmul.f32 0.7978846, %v2663_v43  ;;  %v2669_v48 = vmul.f32 0.7978846, %v2665_v44  ;;  %v2664_v49 = vadd.f32 %v2660_v45, %v2606_v31  ;;  %v2666_v50 = vadd.f32 %v2662_v46, %v2647_v32 }
 0x90a   : > { %3910 = vtanh.f32 %v2667_v47  ;;  %v2668_v52 = vmul.f32 0.7978846, %v2664_v49  ;;  %v2670_v53 = vmul.f32 0.7978846, %v2666_v50 }
 0x90b   : > { %3912 = vtanh.f32 %v2669_v48 }
 0x90c   : > { %3914 = vtanh.f32 %v2668_v52 }
 0x90d   : > { %3916 = vtanh.f32 %v2670_v53 }
 0x917   : > { %v3911_v55 = vpop.eup %3910 }
 0x918   : > { %v3913_v56 = vpop.eup %3912  ;;  %v2675_v57 = vadd.f32 1.0, %v3911_v55 }
 0x919   : > { %v3915_v58 = vpop.eup %3914  ;;  %v2677_v61 = vadd.f32 1.0, %v3913_v56 }
 0x91a   : > { %v3917_v63 = vpop.eup %3916  ;;  %v2679_v1 = vmul.f32 0.5, %v2675_v57  ;;  %v2676_v5 = vadd.f32 1.0, %v3915_v58 }
 0x91b   : > { %v2681_v7 = vmul.f32 0.5, %v2677_v61  ;;  %v2678_v13 = vadd.f32 1.0, %v3917_v63 }
 0x91c   : > { %v2683_v14 = vmul.f32 %v2679_v1, %v2604_v11  ;;  %v2680_v15 = vmul.f32 0.5, %v2676_v5 }
 0x91d   : > { %v2685_v17 = vmul.f32 %v2681_v7, %v2645_v27  ;;  %v2682_v21 = vmul.f32 0.5, %v2678_v13 }
 0x91e   : > { %v2684_v4 = vmul.f32 %v2680_v15, %v2606_v31  ;;  %v2687_v19 = vmul.f32 %v2683_v14, %v2308_v62 }
 0x91f   : > { %v2686_v18 = vmul.f32 %v2682_v21, %v2647_v32  ;;  %v2689_v2 = vmul.f32 %v2685_v17, %v2349_v23 }
 0x920   : > { %v2688_v22 = vmul.f32 %v2684_v4, %v2310_v24  ;;  %v2691_v29 = vpack.c.bf16 %v2687_v19, %v2687_v19 }
 0x921   : > { %v2690_v26 = vmul.f32 %v2686_v18, %v2351_v25  ;;  %v2693_v8 = vpack.c.bf16 %v2689_v2, %v2689_v2 }
 0x922   : > { %v2692_v28 = vpack.c.bf16 %v2688_v22, %v2688_v22 }
 0x923   : > { %v2694_v11 = vpack.c.bf16 %v2690_v26, %v2690_v26 }
 0x924   : > { %2990 = vmatprep.mubr.bf16.mxu1 %v2692_v28 }
 0x925   : > { %3030 = vmatprep.mubr.bf16.mxu0 %v2694_v11  ;;  %2991 = vmatmul.mubr.bf16.vlgmr.msra.gmra.mxu1 %v2691_v29 }
 0x926   : > { %3031 = vmatmul.mubr.bf16.vlgmr.msra.gmra.mxu0 %v2693_v8 }
 0x9e5   : > { %v3499_v9 = vpop.f32.mrf.mxu1 }
 0x9e6   : > { %v3521_v10 = vpop.f32.mrf.mxu0 }
 0x9e7   : > { %v3500_v27 = vpop.f32.mrf.mxu1 }
 0x9e8   : > { %v3501_v16 = vadd.f32 %v3500_v27, %v3499_v9  ;;  %v3522_v30 = vpop.f32.mrf.mxu0 }
 0x9e9   : > { %v3502_v31 = vpop.f32.mrf.mxu1  ;;  %v3523_v51 = vadd.f32 %v3522_v30, %v3521_v10 }
 0x9ea   : > { %v2993_v32 = vadd.f32 %v3501_v16, %v3330_v12  ;;  %v3524_v33 = vpop.f32.mrf.mxu0 }
 0x9eb   : > { %v3503_v34 = vpop.f32.mrf.mxu1 }
 0x9ec   : > { %v3033_v35 = vadd.f32 %v3523_v51, %v2993_v32  ;;  %v3525_v36 = vpop.f32.mrf.mxu0 }
 0x9ee   : > { %v3038_v59 = vadd.f32 %v3033_v35, %v4742_v20 }
 0x9f0   : > { %v3039_v37 = vpack.c.bf16 %v3038_v59, %v3038_v59 }
 0x9f2   : > { %3040 = vst [vmem:[%s650_s10] sm:$0xf] %v3039_v37 }
 0x9f3   : > { %4168 = shalt.err (!%p4165_p4)
}
 0x9f4   : > { %s4169_s4 = scalar_lea.hbm %s3053_s2, 64  ;;  %s4173_s6 = scalar_lea.hbm %s4887_s20, 128 }
 0x9f5   : > { %p4170_p6 = scmp.ne.s32.totalorder %s3053_s2, %s4169_s4  ;;  %p4174_p7 = scmp.lt.s32.totalorder %s3053_s2, %s4887_s20 }
 0x9f6   : > { %p4175_p10 = scmp.lt.s32.totalorder %s4173_s6, %s4169_s4 }
 0x9f7   : > { %p4171_p8 = pnand %p4170_p6, %p4888_p5 }
 0x9f8   : > { %p4176_p2 = por %p4175_p10, %p4174_p7 }
 0x9f9   : > { %p4172_p11 = pneg %p4171_p8 }
 0x9fb   : > { %p4177_p0 = pnand %p4176_p2, %p4172_p11 }
 0x9fd   : > { %4180 = shalt.err (!%p4177_p0)
}
 0x9fe   : > { %3665 = dma.vmem_to_hbm [thread:$0]  (%p4888_p5), %s3056_s11, 64, %s3053_s2, %s3042_s18  }
 0x9ff PF: > { %s3067_s10 = sand.u32 1, %s4223_s21   ;;  %p4889_p9 = scmp.ne.s32.totalorder %s4874_s16, 0 }
 0xa00   : > { %p4890_p12 = scmp.ge.s32.totalorder %s4235_s24, 2  ;;  %s3068_s23 = scalar_lea.sflag [#allocation6], %s3067_s10 }
 0xa02   : > { %p3697_p13 = pnand %p4890_p12, %p4889_p9 }
 0xa04   : > { %p3698_p1 = pneg %p3697_p13 }
 0xa06   : > { %4218 = dma.done.wait (%p3698_p1), %s3068_s23, 64  }
 0xa07   : > { %4220 = vsyncadd (%p3698_p1), %s3068_s23, 4294967232  ;;  %s4891_s28 = sld [smem:[#allocation26_spill]]  ;;  %p33_p3 = scmp.ge.s32.totalorder %s4478_s19, 4  }
 0xa08   : > { %s4892_s23 = sld [smem:[#allocation27_spill]]  ;;  %s4893_s21 = smov %s4227_s22 }
 0xa09   : > { %s4895_s24 = smov %s4478_s19  ;;  %35 = sbr.rel (!%p33_p3) target bundleno = 20 (0x14), region = 161 }
 0xa0d   : > { %s4894_s22 = smov %s4891_s28 }
 0xa0e   :  { %3073 = vsyncpa [#allocation5], 1 }
 0xa0f   :  { %3075 = vsyncpa [#allocation5 + $0x1], 1 }
 0xa10   :  { %3076 = vsyncpa [#allocation8], 1 }
 0xa11   :  { %3077 = vsyncpa [#allocation11], 1 }
 0xa12   :  { %3078 = vsyncpa [#allocation14], 1 }
 0xa13   :  { %3079 = vsyncpa [#allocation17], 1 }
 0xa14   :  { %3080 = vsyncpa [#allocation6], 1 }
 0xa15   :  { %3082 = vsyncpa [#allocation6 + $0x1], 1 }

</bundles_post_ra>
